<compile_context>
chip_gen: v7x
topology: tpu7x:2x2x1
jax: 0.10.0
libtpu: 0.0.40
codegen_flags: <defaults>
</compile_context>

<pallas_src>
import jax
import jax.numpy as jnp
from jax import lax
from jax.experimental import pallas as pl
from jax.experimental.pallas import tpu as pltpu

NEG_SLOPE = 0.05
_VMEM_LIMIT = 32 * 1024 * 1024


def _lrelu(v):
    return jnp.where(v >= 0.0, v, NEG_SLOPE * v)


def _apply_act(v, act):
    if act == "lrelu":
        return _lrelu(v)
    if act == "relu":
        return jnp.maximum(v, 0.0)
    return v


def _round_up(x, m):
    return (x + m - 1) // m * m


def _full_spec(shape):
    zeros = (0,) * len(shape)
    return pl.BlockSpec(shape, lambda i, z=zeros: z)


def _compiler_params():
    return pltpu.CompilerParams(dimension_semantics=("arbitrary",),
                                vmem_limit_bytes=_VMEM_LIMIT)


# ---------------------------------------------------------------------------
# In-kernel construction of the tap-concatenated RHS for 3x3 convs
# ---------------------------------------------------------------------------
def _build_tap_rhs(x_ref, pad_scr, rhs_scr, N, Cin, H, W, base):
    """Fill rhs_scr (9*Cin, N*HW) with the 9 shifted taps of every image.

    pad_scr (Cin, base + HW + W + 1) is a zero-initialised row-padded scratch;
    `base` is a lane-aligned offset (>= W+1) so writing the image is aligned.
    Boundary columns of the +/-1 taps are zeroed with lane masks.
    """
    HW = H * W
    col = lax.broadcasted_iota(jnp.int32, (1, HW), 1) % W
    not_first = col != 0
    not_last = col != (W - 1)

    pad_scr[...] = jnp.zeros_like(pad_scr)
    for n in range(N):
        pad_scr[:, base:base + HW] = x_ref[n]
        for ky in range(3):
            for kxi, dxr in enumerate((-1, 0, 1)):
                off = base + (ky - 1) * W + dxr
                xs = pad_scr[:, off:off + HW]
                if dxr == -1:
                    xs = jnp.where(not_first, xs, jnp.zeros((), xs.dtype))
                elif dxr == 1:
                    xs = jnp.where(not_last, xs, jnp.zeros((), xs.dtype))
                t = ky * 3 + kxi
                rhs_scr[t * Cin:(t + 1) * Cin, n * HW:(n + 1) * HW] = xs


# ---------------------------------------------------------------------------
# Kernel bodies
# ---------------------------------------------------------------------------
def _make_conv3x3_kernel(N, Cin, Cout, H, W, act, has_res, base):
    """3x3 'same' conv as ONE (Cout, 9*Cin) x (9*Cin, N*HW) matmul with fused
    bias / residual / activation."""
    HW = H * W

    def kernel(*refs):
        x_ref, w_ref, b_ref = refs[0], refs[1], refs[2]
        i = 3
        res_ref = None
        if has_res:
            res_ref = refs[i]; i += 1
        o_ref = refs[i]; i += 1
        pad_scr, rhs_scr = refs[i], refs[i + 1]

        _build_tap_rhs(x_ref, pad_scr, rhs_scr, N, Cin, H, W, base)
        acc = jnp.dot(w_ref[...], rhs_scr[...],
                      preferred_element_type=jnp.float32)
        acc = acc + b_ref[...]
        for n in range(N):
            v = acc[:, n * HW:(n + 1) * HW]
            if res_ref is not None:
                v = v + res_ref[n].astype(jnp.float32)
            o_ref[n] = _apply_act(v, act).astype(o_ref.dtype)

    return kernel


def _make_dual_kernel(N, Cin, Cr, Cd, H, W, base):
    """One RFDB distillation step as a SINGLE matmul:
         LHS rows [0:Cr)      = tap-concatenated 3x3 weight
         LHS rows [Cr:Cr+Cd)  = 1x1 distill weight in the center-tap K-block
       then: rc = lrelu(conv3x3(x) + x),  dc = lrelu(conv1x1(x))."""
    HW = H * W

    def kernel(x_ref, w_ref, b_ref, rc_ref, dc_ref, pad_scr, rhs_scr):
        _build_tap_rhs(x_ref, pad_scr, rhs_scr, N, Cin, H, W, base)
        acc = jnp.dot(w_ref[...], rhs_scr[...],
                      preferred_element_type=jnp.float32)
        acc = acc + b_ref[...]
        for n in range(N):
            r = acc[:Cr, n * HW:(n + 1) * HW] + x_ref[n].astype(jnp.float32)
            rc_ref[n] = _lrelu(r).astype(rc_ref.dtype)
            d = acc[Cr:, n * HW:(n + 1) * HW]
            dc_ref[n] = _lrelu(d).astype(dc_ref.dtype)

    return kernel


def _make_cat1x1_kernel(N, nin, act):
    """1x1 conv over the (virtual) channel-concat of `nin` inputs: accumulate
    one dot per input against its resident weight column block (no HBM cat)."""
    def kernel(*refs):
        x_refs = refs[:nin]
        w_refs = refs[nin:2 * nin]
        b_ref = refs[2 * nin]
        o_ref = refs[2 * nin + 1]
        for n in range(N):
            acc = b_ref[...]
            for xr, wr in zip(x_refs, w_refs):
                acc = acc + jnp.dot(wr[...], xr[n],
                                    preferred_element_type=jnp.float32)
            o_ref[n] = _apply_act(acc, act).astype(o_ref.dtype)
    return kernel


def _make_gate1x1_kernel(N):
    """ESA tail: out = gate * sigmoid(conv1x1(x) + b), fully fused."""
    def kernel(x_ref, w_ref, b_ref, gate_ref, o_ref):
        for n in range(N):
            acc = jnp.dot(w_ref[...], x_ref[n],
                          preferred_element_type=jnp.float32) + b_ref[...]
            g = gate_ref[n].astype(jnp.float32)
            o_ref[n] = (g * jax.nn.sigmoid(acc)).astype(o_ref.dtype)
    return kernel


# ---------------------------------------------------------------------------
# pallas_call wrappers (inter-layer activations are (N, C, H*W) bf16)
# ---------------------------------------------------------------------------
def _flatten_w3(w4):
    """PyTorch OIHW (Cout,Cin,3,3) -> (Cout, 9*Cin), tap order t = ky*3 + kx."""
    Cout, Cin = w4.shape[0], w4.shape[1]
    return jnp.transpose(w4, (0, 2, 3, 1)).reshape(Cout, 9 * Cin)


def conv3x3(x, w4, b, act="none", res=None, H=None, W=None,
            out_dtype=jnp.bfloat16):
    """x:(N,Cin,HW)  w4:(Cout,Cin,3,3)  b:(Cout,)  res:(N,Cout,HW)|None."""
    N, Cin, HW = x.shape
    assert HW == H * W
    Cout = w4.shape[0]
    base = max(_round_up(W + 1, 128), 128)
    padlen = base + HW + W + 1

    wf = _flatten_w3(w4).astype(jnp.bfloat16)
    bf = b.astype(jnp.float32).reshape(Cout, 1)
    args = [x.astype(jnp.bfloat16), wf, bf]
    in_specs = [_full_spec((N, Cin, HW)),
                _full_spec((Cout, 9 * Cin)),
                _full_spec((Cout, 1))]
    if res is not None:
        args.append(res.astype(jnp.bfloat16))
        in_specs.append(_full_spec((N, Cout, HW)))

    return pl.pallas_call(
        _make_conv3x3_kernel(N, Cin, Cout, H, W, act, res is not None, base),
        out_shape=jax.ShapeDtypeStruct((N, Cout, HW), out_dtype),
        grid=(1,),
        in_specs=in_specs,
        out_specs=_full_spec((N, Cout, HW)),
        scratch_shapes=[pltpu.VMEM((Cin, padlen), jnp.bfloat16),
                        pltpu.VMEM((9 * Cin, N * HW), jnp.bfloat16)],
        compiler_params=_compiler_params(),
    )(*args)


def dual_conv(x, w3_4, b3, w1, b1, H, W, out_dtype=jnp.bfloat16):
    """Fused RFDB step: rc = lrelu(conv3x3(x)+x), dc = lrelu(conv1x1(x))."""
    N, Cin, HW = x.shape
    assert HW == H * W
    Cr, Cd = w3_4.shape[0], w1.shape[0]
    assert Cr == Cin, "fused residual requires Cr == Cin"
    base = max(_round_up(W + 1, 128), 128)
    padlen = base + HW + W + 1

    w3f = _flatten_w3(w3_4)
    w1f = jnp.zeros((Cd, 9 * Cin), w1.dtype).at[:, 4 * Cin:5 * Cin].set(w1)
    wf = jnp.concatenate([w3f, w1f], axis=0).astype(jnp.bfloat16)
    bf = jnp.concatenate([b3, b1], axis=0).astype(jnp.float32).reshape(Cr + Cd, 1)

    rc, dc = pl.pallas_call(
        _make_dual_kernel(N, Cin, Cr, Cd, H, W, base),
        out_shape=(jax.ShapeDtypeStruct((N, Cr, HW), out_dtype),
                   jax.ShapeDtypeStruct((N, Cd, HW), out_dtype)),
        grid=(1,),
        in_specs=[_full_spec((N, Cin, HW)),
                  _full_spec((Cr + Cd, 9 * Cin)),
                  _full_spec((Cr + Cd, 1))],
        out_specs=(_full_spec((N, Cr, HW)), _full_spec((N, Cd, HW))),
        scratch_shapes=[pltpu.VMEM((Cin, padlen), jnp.bfloat16),
                        pltpu.VMEM((9 * Cin, N * HW), jnp.bfloat16)],
        compiler_params=_compiler_params(),
    )(x.astype(jnp.bfloat16), wf, bf)
    return rc, dc


def cat_conv1x1(xs, w, b, act="none", out_dtype=jnp.bfloat16):
    """1x1 conv of concat(xs, channel dim) WITHOUT materializing the concat.
    xs: list of (N, Ck, HW);  w: (Cout, sum Ck);  b: (Cout,)."""
    nin = len(xs)
    N, _, HW = xs[0].shape
    Cout = w.shape[0]
    cks = [xk.shape[1] for xk in xs]

    w_blocks, off = [], 0
    for ck in cks:
        w_blocks.append(w[:, off:off + ck].astype(jnp.bfloat16))
        off += ck
    bf = b.astype(jnp.float32).reshape(Cout, 1)

    args = [xk.astype(jnp.bfloat16) for xk in xs] + w_blocks + [bf]
    in_specs = ([_full_spec((N, ck, HW)) for ck in cks]
                + [_full_spec((Cout, ck)) for ck in cks]
                + [_full_spec((Cout, 1))])

    return pl.pallas_call(
        _make_cat1x1_kernel(N, nin, act),
        out_shape=jax.ShapeDtypeStruct((N, Cout, HW), out_dtype),
        grid=(1,),
        in_specs=in_specs,
        out_specs=_full_spec((N, Cout, HW)),
        compiler_params=_compiler_params(),
    )(*args)


def gate_conv1x1(x, w, b, gate, out_dtype=jnp.bfloat16):
    """out = gate * sigmoid(conv1x1(x) + b).  x:(N,Cin,HW) gate:(N,Cout,HW)."""
    N, Cin, HW = x.shape
    Cout = w.shape[0]
    return pl.pallas_call(
        _make_gate1x1_kernel(N),
        out_shape=jax.ShapeDtypeStruct((N, Cout, HW), out_dtype),
        grid=(1,),
        in_specs=[_full_spec((N, Cin, HW)),
                  _full_spec((Cout, Cin)),
                  _full_spec((Cout, 1)),
                  _full_spec((N, Cout, HW))],
        out_specs=_full_spec((N, Cout, HW)),
        compiler_params=_compiler_params(),
    )(x.astype(jnp.bfloat16), w.astype(jnp.bfloat16),
      b.astype(jnp.float32).reshape(Cout, 1), gate.astype(jnp.bfloat16))


# ---------------------------------------------------------------------------
# Plain-JAX glue for ESA's tiny inner branch (<=7x7 maps, C = f = nf//4)
# ---------------------------------------------------------------------------
def _small_conv(x, w, b, stride=1, pad=0):
    out = lax.conv_general_dilated(
        x, w, window_strides=(stride, stride),
        padding=((pad, pad), (pad, pad)),
        dimension_numbers=("NCHW", "OIHW", "NCHW"))
    return out + b.reshape(1, -1, 1, 1)


def _bilinear_resize(x, out_h, out_w):
    """NCHW bilinear, F.interpolate(align_corners=False) semantics."""
    N, C, H, W = x.shape
    if H == out_h and W == out_w:
        return x
    sy, sx = H / out_h, W / out_w
    ys = jnp.maximum((jnp.arange(out_h, dtype=jnp.float32) + 0.5) * sy - 0.5, 0.0)
    xs = jnp.maximum((jnp.arange(out_w, dtype=jnp.float32) + 0.5) * sx - 0.5, 0.0)
    y0 = jnp.floor(ys).astype(jnp.int32)
    x0 = jnp.floor(xs).astype(jnp.int32)
    y1 = jnp.minimum(y0 + 1, H - 1)
    x1 = jnp.minimum(x0 + 1, W - 1)
    wy = (ys - y0.astype(jnp.float32))[None, None, :, None]
    wx = (xs - x0.astype(jnp.float32))[None, None, None, :]
    g = lambda yi, xi: x[:, :, yi][:, :, :, xi]
    top = g(y0, x0) * (1.0 - wx) + g(y0, x1) * wx
    bot = g(y1, x0) * (1.0 - wx) + g(y1, x1) * wx
    return top * (1.0 - wy) + bot * wy


# ---------------------------------------------------------------------------
# Model forward (activations: (N, C, H*W) bf16 between Pallas kernels)
# ---------------------------------------------------------------------------
def esa_forward(x, p, H, W):
    N, nf, HW = x.shape
    xf = x.astype(jnp.float32)
    w1, b1 = p["conv1"]
    c1_ = jnp.einsum("oc,nch->noh", w1, xf) + b1.reshape(1, -1, 1)   # (N,f,HW)
    f = c1_.shape[1]

    # Tiny inner branch in plain JAX (maps shrink to 7x7 -> 1x1).
    c1 = _small_conv(c1_.reshape(N, f, H, W), *p["conv2"], stride=2, pad=0)
    v_max = lax.reduce_window(c1, -jnp.inf, lax.max,
                              (1, 1, 7, 7), (1, 1, 3, 3), "VALID")
    v_range = jnp.maximum(_small_conv(v_max, *p["conv_max"], pad=1), 0.0)
    c3 = jnp.maximum(_small_conv(v_range, *p["conv3"], pad=1), 0.0)
    c3 = _small_conv(c3, *p["conv3_"], pad=1)
    c3 = _bilinear_resize(c3, H, W).reshape(N, f, HW)

    wf_, bf_ = p["conv_f"]
    cf = jnp.einsum("oc,nch->noh", wf_, c1_) + bf_.reshape(1, -1, 1)
    c4_in = c3 + cf
    w4, b4 = p["conv4"]
    # conv4 (1x1) fused with the sigmoid gate:  x * sigmoid(conv4(c3 + cf))
    return gate_conv1x1(c4_in, w4, b4, gate=x)


def rfdb_forward(x, p, H, W):
    rc1, dc1 = dual_conv(x, *p["c1_r"], *p["c1_d"], H=H, W=W)
    rc2, dc2 = dual_conv(rc1, *p["c2_r"], *p["c2_d"], H=H, W=W)
    rc3, dc3 = dual_conv(rc2, *p["c3_r"], *p["c3_d"], H=H, W=W)
    rc4 = conv3x3(rc3, *p["c4"], act="lrelu", H=H, W=W)
    out = cat_conv1x1([dc1, dc2, dc3, rc4], *p["c5"], act="none")
    return esa_forward(out, p["esa"], H, W)


def rfdn_forward(x_nchw, params):
    N, Cin, H, W = x_nchw.shape
    x = x_nchw.reshape(N, Cin, H * W)
    fea = conv3x3(x, *params["fea_conv"], H=H, W=W)
    b1 = rfdb_forward(fea, params["B1"], H, W)
    b2 = rfdb_forward(b1, params["B2"], H, W)
    b3 = rfdb_forward(b2, params["B3"], H, W)
    b4 = rfdb_forward(b3, params["B4"], H, W)
    out_b = cat_conv1x1([b1, b2, b3, b4], *params["c"], act="lrelu")
    out_lr = conv3x3(out_b, *params["LR_conv"], res=fea, H=H, W=W)
    nf = out_lr.shape[1]
    return out_lr.reshape(N, nf, H, W).astype(jnp.float32)


# ---------------------------------------------------------------------------
# Deterministic parameter init (shapes mirror the PyTorch __init__, OIHW)
# ---------------------------------------------------------------------------
def _conv_params(key, cin, cout, k):
    kw, kb = jax.random.split(key)
    if k == 1:
        w = jax.random.normal(kw, (cout, cin), jnp.float32) / jnp.sqrt(cin)
    else:
        w = jax.random.normal(kw, (cout, cin, k, k), jnp.float32) / jnp.sqrt(cin * k * k)
    b = 0.01 * jax.random.normal(kb, (cout,), jnp.float32)
    return w, b


def init_rfdb_params(key, in_channels):
    dc = in_channels // 2
    rc = in_channels
    f = in_channels // 4
    ks = jax.random.split(key, 15)
    return {
        "c1_d": _conv_params(ks[0], in_channels, dc, 1),
        "c1_r": _conv_params(ks[1], in_channels, rc, 3),
        "c2_d": _conv_params(ks[2], rc, dc, 1),
        "c2_r": _conv_params(ks[3], rc, rc, 3),
        "c3_d": _conv_params(ks[4], rc, dc, 1),
        "c3_r": _conv_params(ks[5], rc, rc, 3),
        "c4":   _conv_params(ks[6], rc, dc, 3),
        "c5":   _conv_params(ks[7], dc * 4, in_channels, 1),
        "esa": {
            "conv1":    _conv_params(ks[8], in_channels, f, 1),
            "conv_f":   _conv_params(ks[9], f, f, 1),
            "conv_max": _conv_params(ks[10], f, f, 3),
            "conv2":    _conv_params(ks[11], f, f, 3),
            "conv3":    _conv_params(ks[12], f, f, 3),
            "conv3_":   _conv_params(ks[13], f, f, 3),
            "conv4":    _conv_params(ks[14], f, in_channels, 1),
        },
    }


def init_rfdn_params(key, in_nc, nf, num_modules=4):
    ks = jax.random.split(key, num_modules + 3)
    params = {"fea_conv": _conv_params(ks[0], in_nc, nf, 3)}
    for i in range(num_modules):
        params[f"B{i + 1}"] = init_rfdb_params(ks[1 + i], nf)
    params["c"] = _conv_params(ks[num_modules + 1], nf * num_modules, nf, 1)
    params["LR_conv"] = _conv_params(ks[num_modules + 2], nf, nf, 3)
    return params


# ---------------------------------------------------------------------------
if __name__ == "__main__":
    key = jax.random.PRNGKey(0)
    kp, kx = jax.random.split(key)

    # Small config: in_nc = nf = 16 (distilled ch = 8, ESA ch = 4), 2x16x16 images.
    in_nc = nf = 16
    N, H, W = 2, 16, 16      # H, W >= 15 required by ESA (stride-2 conv -> 7x7 pool)

    params = init_rfdn_params(kp, in_nc, nf, num_modules=4)
    x = jax.random.normal(kx, (N, in_nc, H, W), jnp.float32)   # NCHW, like PyTorch

    fwd = jax.jit(rfdn_forward)
    out = fwd(x, params)
    jax.block_until_ready(out)

    assert out.shape == (N, nf, H, W), out.shape
    assert out.dtype == jnp.float32
    assert bool(jnp.all(jnp.isfinite(out)))
    print("KERNEL_OK")
</pallas_src>

<mosaic_0001>
module attributes {stable_mosaic.version = 11 : i64} {
  func.func @kernel(%arg0: i32, %arg1: memref<2x16x256xbf16, #tpu.memory_space<vmem>>, %arg2: memref<24x144xbf16, #tpu.memory_space<vmem>>, %arg3: memref<24x1xf32, #tpu.memory_space<vmem>>, %arg4: memref<2x16x256xbf16, #tpu.memory_space<vmem>>, %arg5: memref<2x8x256xbf16, #tpu.memory_space<vmem>>, %arg6: memref<16x401xbf16, #tpu.memory_space<vmem>>, %arg7: memref<144x512xbf16, #tpu.memory_space<vmem>>) attributes {dimension_semantics = [#tpu.dimension_semantics<arbitrary>], iteration_bounds = array<i64: 1>, scalar_prefetch = 0 : i64, scratch_operands = 2 : i64, tpu.core_type = #tpu.core_type<tc>, window_params = [{pipeline_mode = #tpu.pipeline_mode<synchronous>, transform_indices = @transform_0, window_bounds = array<i64: 2, 16, 256>}, {pipeline_mode = #tpu.pipeline_mode<synchronous>, transform_indices = @transform_1, window_bounds = array<i64: 24, 144>}, {pipeline_mode = #tpu.pipeline_mode<synchronous>, transform_indices = @transform_2, window_bounds = array<i64: 24, 1>}, {pipeline_mode = #tpu.pipeline_mode<synchronous>, transform_indices = @transform_3, window_bounds = array<i64: 2, 16, 256>}, {pipeline_mode = #tpu.pipeline_mode<synchronous>, transform_indices = @transform_4, window_bounds = array<i64: 2, 8, 256>}]} {
    %0 = tpu.iota {dimensions = array<i32: 1>} : vector<1x256xi32>
    %c16_i32 = arith.constant 16 : i32
    %c0_i32 = arith.constant 0 : i32
    %1 = arith.cmpi eq, %c16_i32, %c0_i32 : i32
    %c1_i32 = arith.constant 1 : i32
    %2 = arith.select %1, %c1_i32, %c16_i32 : i32
    %3 = vector.broadcast %2 : i32 to vector<1x256xi32>
    %4 = arith.remsi %0, %3 : vector<1x256xi32>
    %c0_i32_0 = arith.constant 0 : i32
    %5 = vector.broadcast %c0_i32_0 : i32 to vector<1x256xi32>
    %6 = arith.cmpi ne, %4, %5 : vector<1x256xi32>
    %c0_i32_1 = arith.constant 0 : i32
    %7 = vector.broadcast %c0_i32_1 : i32 to vector<1x256xi32>
    %8 = arith.cmpi slt, %4, %7 : vector<1x256xi32>
    %c0_i32_2 = arith.constant 0 : i32
    %9 = arith.cmpi slt, %2, %c0_i32_2 : i32
    %10 = vector.broadcast %9 : i1 to vector<1x256xi1>
    %11 = vector.broadcast %10 : vector<1x256xi1> to vector<1x256xi1>
    %12 = arith.xori %8, %11 : vector<1x256xi1>
    %13 = arith.andi %12, %6 : vector<1x256xi1>
    %14 = vector.broadcast %2 : i32 to vector<1x256xi32>
    %15 = arith.addi %4, %14 : vector<1x256xi32>
    %16 = arith.select %13, %15, %4 : vector<1x256xi1>, vector<1x256xi32>
    %c0_i32_3 = arith.constant 0 : i32
    %17 = vector.broadcast %c0_i32_3 : i32 to vector<1x256xi32>
    %18 = arith.cmpi ne, %16, %17 : vector<1x256xi32>
    %c15_i32 = arith.constant 15 : i32
    %19 = vector.broadcast %c15_i32 : i32 to vector<1x256xi32>
    %20 = arith.cmpi ne, %16, %19 : vector<1x256xi32>
    %cst = arith.constant 0.000000e+00 : bf16
    %21 = vector.broadcast %cst : bf16 to vector<16x401xbf16>
    %c0 = arith.constant 0 : index
    %c0_4 = arith.constant 0 : index
    %22 = vector.load %arg6[%c0, %c0_4] : memref<16x401xbf16, #tpu.memory_space<vmem>>, vector<16x401xbf16>
    tpu.vector_store %arg6[%c0, %c0_4], %21 {strides = array<i32>} : memref<16x401xbf16, #tpu.memory_space<vmem>>, vector<16x401xbf16>,
    %c0_5 = arith.constant 0 : index
    %c0_6 = arith.constant 0 : index
    %c0_7 = arith.constant 0 : index
    %23 = vector.load %arg1[%c0_5, %c0_6, %c0_7] : memref<2x16x256xbf16, #tpu.memory_space<vmem>>, vector<1x16x256xbf16>
    %24 = vector.shape_cast %23 : vector<1x16x256xbf16> to vector<16x256xbf16>
    %c0_8 = arith.constant 0 : index
    %c128 = arith.constant 128 : index
    %25 = vector.load %arg6[%c0_8, %c128] : memref<16x401xbf16, #tpu.memory_space<vmem>>, vector<16x256xbf16>
    tpu.vector_store %arg6[%c0_8, %c128], %24 {strides = array<i32>} : memref<16x401xbf16, #tpu.memory_space<vmem>>, vector<16x256xbf16>,
    %c0_9 = arith.constant 0 : index
    %c111 = arith.constant 111 : index
    %26 = vector.load %arg6[%c0_9, %c111] : memref<16x401xbf16, #tpu.memory_space<vmem>>, vector<16x256xbf16>
    %cst_10 = arith.constant 0.000000e+00 : bf16
    %27 = vector.shape_cast %18 : vector<1x256xi1> to vector<1x256xi1>
    %28 = vector.broadcast %27 : vector<1x256xi1> to vector<16x256xi1>
    %29 = vector.broadcast %cst_10 : bf16 to vector<16x256xbf16>
    %30 = arith.select %28, %26, %29 : vector<16x256xi1>, vector<16x256xbf16>
    %c0_11 = arith.constant 0 : index
    %c0_12 = arith.constant 0 : index
    %31 = vector.load %arg7[%c0_11, %c0_12] : memref<144x512xbf16, #tpu.memory_space<vmem>>, vector<16x256xbf16>
    tpu.vector_store %arg7[%c0_11, %c0_12], %30 {strides = array<i32>} : memref<144x512xbf16, #tpu.memory_space<vmem>>, vector<16x256xbf16>,
    %c0_13 = arith.constant 0 : index
    %c112 = arith.constant 112 : index
    %32 = vector.load %arg6[%c0_13, %c112] : memref<16x401xbf16, #tpu.memory_space<vmem>>, vector<16x256xbf16>
    %c16 = arith.constant 16 : index
    %c0_14 = arith.constant 0 : index
    %33 = vector.load %arg7[%c16, %c0_14] : memref<144x512xbf16, #tpu.memory_space<vmem>>, vector<16x256xbf16>
    tpu.vector_store %arg7[%c16, %c0_14], %32 {strides = array<i32>} : memref<144x512xbf16, #tpu.memory_space<vmem>>, vector<16x256xbf16>,
    %c0_15 = arith.constant 0 : index
    %c113 = arith.constant 113 : index
    %34 = vector.load %arg6[%c0_15, %c113] : memref<16x401xbf16, #tpu.memory_space<vmem>>, vector<16x256xbf16>
    %cst_16 = arith.constant 0.000000e+00 : bf16
    %35 = vector.shape_cast %20 : vector<1x256xi1> to vector<1x256xi1>
    %36 = vector.broadcast %35 : vector<1x256xi1> to vector<16x256xi1>
    %37 = vector.broadcast %cst_16 : bf16 to vector<16x256xbf16>
    %38 = arith.select %36, %34, %37 : vector<16x256xi1>, vector<16x256xbf16>
    %c32 = arith.constant 32 : index
    %c0_17 = arith.constant 0 : index
    %39 = vector.load %arg7[%c32, %c0_17] : memref<144x512xbf16, #tpu.memory_space<vmem>>, vector<16x256xbf16>
    tpu.vector_store %arg7[%c32, %c0_17], %38 {strides = array<i32>} : memref<144x512xbf16, #tpu.memory_space<vmem>>, vector<16x256xbf16>,
    %c0_18 = arith.constant 0 : index
    %c127 = arith.constant 127 : index
    %40 = vector.load %arg6[%c0_18, %c127] : memref<16x401xbf16, #tpu.memory_space<vmem>>, vector<16x256xbf16>
    %cst_19 = arith.constant 0.000000e+00 : bf16
    %41 = vector.shape_cast %18 : vector<1x256xi1> to vector<1x256xi1>
    %42 = vector.broadcast %41 : vector<1x256xi1> to vector<16x256xi1>
    %43 = vector.broadcast %cst_19 : bf16 to vector<16x256xbf16>
    %44 = arith.select %42, %40, %43 : vector<16x256xi1>, vector<16x256xbf16>
    %c48 = arith.constant 48 : index
    %c0_20 = arith.constant 0 : index
    %45 = vector.load %arg7[%c48, %c0_20] : memref<144x512xbf16, #tpu.memory_space<vmem>>, vector<16x256xbf16>
    tpu.vector_store %arg7[%c48, %c0_20], %44 {strides = array<i32>} : memref<144x512xbf16, #tpu.memory_space<vmem>>, vector<16x256xbf16>,
    %c0_21 = arith.constant 0 : index
    %c128_22 = arith.constant 128 : index
    %46 = vector.load %arg6[%c0_21, %c128_22] : memref<16x401xbf16, #tpu.memory_space<vmem>>, vector<16x256xbf16>
    %c64 = arith.constant 64 : index
    %c0_23 = arith.constant 0 : index
    %47 = vector.load %arg7[%c64, %c0_23] : memref<144x512xbf16, #tpu.memory_space<vmem>>, vector<16x256xbf16>
    tpu.vector_store %arg7[%c64, %c0_23], %46 {strides = array<i32>} : memref<144x512xbf16, #tpu.memory_space<vmem>>, vector<16x256xbf16>,
    %c0_24 = arith.constant 0 : index
    %c129 = arith.constant 129 : index
    %48 = vector.load %arg6[%c0_24, %c129] : memref<16x401xbf16, #tpu.memory_space<vmem>>, vector<16x256xbf16>
    %cst_25 = arith.constant 0.000000e+00 : bf16
    %49 = vector.shape_cast %20 : vector<1x256xi1> to vector<1x256xi1>
    %50 = vector.broadcast %49 : vector<1x256xi1> to vector<16x256xi1>
    %51 = vector.broadcast %cst_25 : bf16 to vector<16x256xbf16>
    %52 = arith.select %50, %48, %51 : vector<16x256xi1>, vector<16x256xbf16>
    %c80 = arith.constant 80 : index
    %c0_26 = arith.constant 0 : index
    %53 = vector.load %arg7[%c80, %c0_26] : memref<144x512xbf16, #tpu.memory_space<vmem>>, vector<16x256xbf16>
    tpu.vector_store %arg7[%c80, %c0_26], %52 {strides = array<i32>} : memref<144x512xbf16, #tpu.memory_space<vmem>>, vector<16x256xbf16>,
    %c0_27 = arith.constant 0 : index
    %c143 = arith.constant 143 : index
    %54 = vector.load %arg6[%c0_27, %c143] : memref<16x401xbf16, #tpu.memory_space<vmem>>, vector<16x256xbf16>
    %cst_28 = arith.constant 0.000000e+00 : bf16
    %55 = vector.shape_cast %18 : vector<1x256xi1> to vector<1x256xi1>
    %56 = vector.broadcast %55 : vector<1x256xi1> to vector<16x256xi1>
    %57 = vector.broadcast %cst_28 : bf16 to vector<16x256xbf16>
    %58 = arith.select %56, %54, %57 : vector<16x256xi1>, vector<16x256xbf16>
    %c96 = arith.constant 96 : index
    %c0_29 = arith.constant 0 : index
    %59 = vector.load %arg7[%c96, %c0_29] : memref<144x512xbf16, #tpu.memory_space<vmem>>, vector<16x256xbf16>
    tpu.vector_store %arg7[%c96, %c0_29], %58 {strides = array<i32>} : memref<144x512xbf16, #tpu.memory_space<vmem>>, vector<16x256xbf16>,
    %c0_30 = arith.constant 0 : index
    %c144 = arith.constant 144 : index
    %60 = vector.load %arg6[%c0_30, %c144] : memref<16x401xbf16, #tpu.memory_space<vmem>>, vector<16x256xbf16>
    %c112_31 = arith.constant 112 : index
    %c0_32 = arith.constant 0 : index
    %61 = vector.load %arg7[%c112_31, %c0_32] : memref<144x512xbf16, #tpu.memory_space<vmem>>, vector<16x256xbf16>
    tpu.vector_store %arg7[%c112_31, %c0_32], %60 {strides = array<i32>} : memref<144x512xbf16, #tpu.memory_space<vmem>>, vector<16x256xbf16>,
    %c0_33 = arith.constant 0 : index
    %c145 = arith.constant 145 : index
    %62 = vector.load %arg6[%c0_33, %c145] : memref<16x401xbf16, #tpu.memory_space<vmem>>, vector<16x256xbf16>
    %cst_34 = arith.constant 0.000000e+00 : bf16
    %63 = vector.shape_cast %20 : vector<1x256xi1> to vector<1x256xi1>
    %64 = vector.broadcast %63 : vector<1x256xi1> to vector<16x256xi1>
    %65 = vector.broadcast %cst_34 : bf16 to vector<16x256xbf16>
    %66 = arith.select %64, %62, %65 : vector<16x256xi1>, vector<16x256xbf16>
    %c128_35 = arith.constant 128 : index
    %c0_36 = arith.constant 0 : index
    %67 = vector.load %arg7[%c128_35, %c0_36] : memref<144x512xbf16, #tpu.memory_space<vmem>>, vector<16x256xbf16>
    tpu.vector_store %arg7[%c128_35, %c0_36], %66 {strides = array<i32>} : memref<144x512xbf16, #tpu.memory_space<vmem>>, vector<16x256xbf16>,
    %c1 = arith.constant 1 : index
    %c0_37 = arith.constant 0 : index
    %c0_38 = arith.constant 0 : index
    %68 = vector.load %arg1[%c1, %c0_37, %c0_38] : memref<2x16x256xbf16, #tpu.memory_space<vmem>>, vector<1x16x256xbf16>
    %69 = vector.shape_cast %68 : vector<1x16x256xbf16> to vector<16x256xbf16>
    %c0_39 = arith.constant 0 : index
    %c128_40 = arith.constant 128 : index
    %70 = vector.load %arg6[%c0_39, %c128_40] : memref<16x401xbf16, #tpu.memory_space<vmem>>, vector<16x256xbf16>
    tpu.vector_store %arg6[%c0_39, %c128_40], %69 {strides = array<i32>} : memref<16x401xbf16, #tpu.memory_space<vmem>>, vector<16x256xbf16>,
    %c0_41 = arith.constant 0 : index
    %c111_42 = arith.constant 111 : index
    %71 = vector.load %arg6[%c0_41, %c111_42] : memref<16x401xbf16, #tpu.memory_space<vmem>>, vector<16x256xbf16>
    %cst_43 = arith.constant 0.000000e+00 : bf16
    %72 = vector.shape_cast %18 : vector<1x256xi1> to vector<1x256xi1>
    %73 = vector.broadcast %72 : vector<1x256xi1> to vector<16x256xi1>
    %74 = vector.broadcast %cst_43 : bf16 to vector<16x256xbf16>
    %75 = arith.select %73, %71, %74 : vector<16x256xi1>, vector<16x256xbf16>
    %c0_44 = arith.constant 0 : index
    %c256 = arith.constant 256 : index
    %76 = vector.load %arg7[%c0_44, %c256] : memref<144x512xbf16, #tpu.memory_space<vmem>>, vector<16x256xbf16>
    tpu.vector_store %arg7[%c0_44, %c256], %75 {strides = array<i32>} : memref<144x512xbf16, #tpu.memory_space<vmem>>, vector<16x256xbf16>,
    %c0_45 = arith.constant 0 : index
    %c112_46 = arith.constant 112 : index
    %77 = vector.load %arg6[%c0_45, %c112_46] : memref<16x401xbf16, #tpu.memory_space<vmem>>, vector<16x256xbf16>
    %c16_47 = arith.constant 16 : index
    %c256_48 = arith.constant 256 : index
    %78 = vector.load %arg7[%c16_47, %c256_48] : memref<144x512xbf16, #tpu.memory_space<vmem>>, vector<16x256xbf16>
    tpu.vector_store %arg7[%c16_47, %c256_48], %77 {strides = array<i32>} : memref<144x512xbf16, #tpu.memory_space<vmem>>, vector<16x256xbf16>,
    %c0_49 = arith.constant 0 : index
    %c113_50 = arith.constant 113 : index
    %79 = vector.load %arg6[%c0_49, %c113_50] : memref<16x401xbf16, #tpu.memory_space<vmem>>, vector<16x256xbf16>
    %cst_51 = arith.constant 0.000000e+00 : bf16
    %80 = vector.shape_cast %20 : vector<1x256xi1> to vector<1x256xi1>
    %81 = vector.broadcast %80 : vector<1x256xi1> to vector<16x256xi1>
    %82 = vector.broadcast %cst_51 : bf16 to vector<16x256xbf16>
    %83 = arith.select %81, %79, %82 : vector<16x256xi1>, vector<16x256xbf16>
    %c32_52 = arith.constant 32 : index
    %c256_53 = arith.constant 256 : index
    %84 = vector.load %arg7[%c32_52, %c256_53] : memref<144x512xbf16, #tpu.memory_space<vmem>>, vector<16x256xbf16>
    tpu.vector_store %arg7[%c32_52, %c256_53], %83 {strides = array<i32>} : memref<144x512xbf16, #tpu.memory_space<vmem>>, vector<16x256xbf16>,
    %c0_54 = arith.constant 0 : index
    %c127_55 = arith.constant 127 : index
    %85 = vector.load %arg6[%c0_54, %c127_55] : memref<16x401xbf16, #tpu.memory_space<vmem>>, vector<16x256xbf16>
    %cst_56 = arith.constant 0.000000e+00 : bf16
    %86 = vector.shape_cast %18 : vector<1x256xi1> to vector<1x256xi1>
    %87 = vector.broadcast %86 : vector<1x256xi1> to vector<16x256xi1>
    %88 = vector.broadcast %cst_56 : bf16 to vector<16x256xbf16>
    %89 = arith.select %87, %85, %88 : vector<16x256xi1>, vector<16x256xbf16>
    %c48_57 = arith.constant 48 : index
    %c256_58 = arith.constant 256 : index
    %90 = vector.load %arg7[%c48_57, %c256_58] : memref<144x512xbf16, #tpu.memory_space<vmem>>, vector<16x256xbf16>
    tpu.vector_store %arg7[%c48_57, %c256_58], %89 {strides = array<i32>} : memref<144x512xbf16, #tpu.memory_space<vmem>>, vector<16x256xbf16>,
    %c0_59 = arith.constant 0 : index
    %c128_60 = arith.constant 128 : index
    %91 = vector.load %arg6[%c0_59, %c128_60] : memref<16x401xbf16, #tpu.memory_space<vmem>>, vector<16x256xbf16>
    %c64_61 = arith.constant 64 : index
    %c256_62 = arith.constant 256 : index
    %92 = vector.load %arg7[%c64_61, %c256_62] : memref<144x512xbf16, #tpu.memory_space<vmem>>, vector<16x256xbf16>
    tpu.vector_store %arg7[%c64_61, %c256_62], %91 {strides = array<i32>} : memref<144x512xbf16, #tpu.memory_space<vmem>>, vector<16x256xbf16>,
    %c0_63 = arith.constant 0 : index
    %c129_64 = arith.constant 129 : index
    %93 = vector.load %arg6[%c0_63, %c129_64] : memref<16x401xbf16, #tpu.memory_space<vmem>>, vector<16x256xbf16>
    %cst_65 = arith.constant 0.000000e+00 : bf16
    %94 = vector.shape_cast %20 : vector<1x256xi1> to vector<1x256xi1>
    %95 = vector.broadcast %94 : vector<1x256xi1> to vector<16x256xi1>
    %96 = vector.broadcast %cst_65 : bf16 to vector<16x256xbf16>
    %97 = arith.select %95, %93, %96 : vector<16x256xi1>, vector<16x256xbf16>
    %c80_66 = arith.constant 80 : index
    %c256_67 = arith.constant 256 : index
    %98 = vector.load %arg7[%c80_66, %c256_67] : memref<144x512xbf16, #tpu.memory_space<vmem>>, vector<16x256xbf16>
    tpu.vector_store %arg7[%c80_66, %c256_67], %97 {strides = array<i32>} : memref<144x512xbf16, #tpu.memory_space<vmem>>, vector<16x256xbf16>,
    %c0_68 = arith.constant 0 : index
    %c143_69 = arith.constant 143 : index
    %99 = vector.load %arg6[%c0_68, %c143_69] : memref<16x401xbf16, #tpu.memory_space<vmem>>, vector<16x256xbf16>
    %cst_70 = arith.constant 0.000000e+00 : bf16
    %100 = vector.shape_cast %18 : vector<1x256xi1> to vector<1x256xi1>
    %101 = vector.broadcast %100 : vector<1x256xi1> to vector<16x256xi1>
    %102 = vector.broadcast %cst_70 : bf16 to vector<16x256xbf16>
    %103 = arith.select %101, %99, %102 : vector<16x256xi1>, vector<16x256xbf16>
    %c96_71 = arith.constant 96 : index
    %c256_72 = arith.constant 256 : index
    %104 = vector.load %arg7[%c96_71, %c256_72] : memref<144x512xbf16, #tpu.memory_space<vmem>>, vector<16x256xbf16>
    tpu.vector_store %arg7[%c96_71, %c256_72], %103 {strides = array<i32>} : memref<144x512xbf16, #tpu.memory_space<vmem>>, vector<16x256xbf16>,
    %c0_73 = arith.constant 0 : index
    %c144_74 = arith.constant 144 : index
    %105 = vector.load %arg6[%c0_73, %c144_74] : memref<16x401xbf16, #tpu.memory_space<vmem>>, vector<16x256xbf16>
    %c112_75 = arith.constant 112 : index
    %c256_76 = arith.constant 256 : index
    %106 = vector.load %arg7[%c112_75, %c256_76] : memref<144x512xbf16, #tpu.memory_space<vmem>>, vector<16x256xbf16>
    tpu.vector_store %arg7[%c112_75, %c256_76], %105 {strides = array<i32>} : memref<144x512xbf16, #tpu.memory_space<vmem>>, vector<16x256xbf16>,
    %c0_77 = arith.constant 0 : index
    %c145_78 = arith.constant 145 : index
    %107 = vector.load %arg6[%c0_77, %c145_78] : memref<16x401xbf16, #tpu.memory_space<vmem>>, vector<16x256xbf16>
    %cst_79 = arith.constant 0.000000e+00 : bf16
    %108 = vector.shape_cast %20 : vector<1x256xi1> to vector<1x256xi1>
    %109 = vector.broadcast %108 : vector<1x256xi1> to vector<16x256xi1>
    %110 = vector.broadcast %cst_79 : bf16 to vector<16x256xbf16>
    %111 = arith.select %109, %107, %110 : vector<16x256xi1>, vector<16x256xbf16>
    %c128_80 = arith.constant 128 : index
    %c256_81 = arith.constant 256 : index
    %112 = vector.load %arg7[%c128_80, %c256_81] : memref<144x512xbf16, #tpu.memory_space<vmem>>, vector<16x256xbf16>
    tpu.vector_store %arg7[%c128_80, %c256_81], %111 {strides = array<i32>} : memref<144x512xbf16, #tpu.memory_space<vmem>>, vector<16x256xbf16>,
    %c0_82 = arith.constant 0 : index
    %c0_83 = arith.constant 0 : index
    %113 = vector.load %arg2[%c0_82, %c0_83] : memref<24x144xbf16, #tpu.memory_space<vmem>>, vector<24x144xbf16>
    %c0_84 = arith.constant 0 : index
    %c0_85 = arith.constant 0 : index
    %114 = vector.load %arg7[%c0_84, %c0_85] : memref<144x512xbf16, #tpu.memory_space<vmem>>, vector<144x512xbf16>
    %cst_86 = arith.constant dense<0.000000e+00> : vector<24x512xf32>
    %115 = tpu.matmul %113, %114, %cst_86 {dimension_numbers = #tpu.dot_dimension_numbers<[1], [0], [0], [1], [0, 0, 1, 1], [], []>} : vector<24x144xbf16>, vector<144x512xbf16>, vector<24x512xf32> -> vector<24x512xf32>
    %c0_87 = arith.constant 0 : index
    %c0_88 = arith.constant 0 : index
    %116 = vector.load %arg3[%c0_87, %c0_88] : memref<24x1xf32, #tpu.memory_space<vmem>>, vector<24x1xf32>
    %117 = vector.broadcast %116 : vector<24x1xf32> to vector<24x512xf32>
    %118 = arith.addf %115, %117 : vector<24x512xf32>
    %119 = vector.extract_strided_slice %118 {offsets = [0, 0], sizes = [16, 256], strides = [1, 1]} : vector<24x512xf32> to vector<16x256xf32>
    %c0_89 = arith.constant 0 : index
    %c0_90 = arith.constant 0 : index
    %c0_91 = arith.constant 0 : index
    %120 = vector.load %arg1[%c0_89, %c0_90, %c0_91] : memref<2x16x256xbf16, #tpu.memory_space<vmem>>, vector<1x16x256xbf16>
    %121 = vector.shape_cast %120 : vector<1x16x256xbf16> to vector<16x256xbf16>
    %122 = arith.extf %121 : vector<16x256xbf16> to vector<16x256xf32>
    %123 = arith.addf %119, %122 : vector<16x256xf32>
    %cst_92 = arith.constant 0.000000e+00 : f32
    %124 = vector.broadcast %cst_92 : f32 to vector<16x256xf32>
    %125 = arith.cmpf oge, %123, %124 : vector<16x256xf32>
    %cst_93 = arith.constant 5.000000e-02 : f32
    %126 = vector.broadcast %cst_93 : f32 to vector<16x256xf32>
    %127 = arith.mulf %126, %123 : vector<16x256xf32>
    %128 = arith.select %125, %123, %127 : vector<16x256xi1>, vector<16x256xf32>
    %129 = arith.truncf %128 : vector<16x256xf32> to vector<16x256xbf16>
    %c0_94 = arith.constant 0 : index
    %c0_95 = arith.constant 0 : index
    %c0_96 = arith.constant 0 : index
    %130 = vector.load %arg4[%c0_94, %c0_95, %c0_96] : memref<2x16x256xbf16, #tpu.memory_space<vmem>>, vector<1x16x256xbf16>
    %131 = vector.shape_cast %130 : vector<1x16x256xbf16> to vector<16x256xbf16>
    %132 = vector.shape_cast %129 : vector<16x256xbf16> to vector<1x16x256xbf16>
    tpu.vector_store %arg4[%c0_94, %c0_95, %c0_96], %132 {strides = array<i32>} : memref<2x16x256xbf16, #tpu.memory_space<vmem>>, vector<1x16x256xbf16>,
    %133 = vector.extract_strided_slice %118 {offsets = [16, 0], sizes = [8, 256], strides = [1, 1]} : vector<24x512xf32> to vector<8x256xf32>
    %cst_97 = arith.constant 0.000000e+00 : f32
    %134 = vector.broadcast %cst_97 : f32 to vector<8x256xf32>
    %135 = arith.cmpf oge, %133, %134 : vector<8x256xf32>
    %cst_98 = arith.constant 5.000000e-02 : f32
    %136 = vector.broadcast %cst_98 : f32 to vector<8x256xf32>
    %137 = arith.mulf %136, %133 : vector<8x256xf32>
    %138 = arith.select %135, %133, %137 : vector<8x256xi1>, vector<8x256xf32>
    %139 = arith.truncf %138 : vector<8x256xf32> to vector<8x256xbf16>
    %c0_99 = arith.constant 0 : index
    %c0_100 = arith.constant 0 : index
    %c0_101 = arith.constant 0 : index
    %140 = vector.load %arg5[%c0_99, %c0_100, %c0_101] : memref<2x8x256xbf16, #tpu.memory_space<vmem>>, vector<1x8x256xbf16>
    %141 = vector.shape_cast %140 : vector<1x8x256xbf16> to vector<8x256xbf16>
    %142 = vector.shape_cast %139 : vector<8x256xbf16> to vector<1x8x256xbf16>
    tpu.vector_store %arg5[%c0_99, %c0_100, %c0_101], %142 {strides = array<i32>} : memref<2x8x256xbf16, #tpu.memory_space<vmem>>, vector<1x8x256xbf16>,
    %143 = vector.extract_strided_slice %118 {offsets = [0, 256], sizes = [16, 256], strides = [1, 1]} : vector<24x512xf32> to vector<16x256xf32>
    %c1_102 = arith.constant 1 : index
    %c0_103 = arith.constant 0 : index
    %c0_104 = arith.constant 0 : index
    %144 = vector.load %arg1[%c1_102, %c0_103, %c0_104] : memref<2x16x256xbf16, #tpu.memory_space<vmem>>, vector<1x16x256xbf16>
    %145 = vector.shape_cast %144 : vector<1x16x256xbf16> to vector<16x256xbf16>
    %146 = arith.extf %145 : vector<16x256xbf16> to vector<16x256xf32>
    %147 = arith.addf %143, %146 : vector<16x256xf32>
    %cst_105 = arith.constant 0.000000e+00 : f32
    %148 = vector.broadcast %cst_105 : f32 to vector<16x256xf32>
    %149 = arith.cmpf oge, %147, %148 : vector<16x256xf32>
    %cst_106 = arith.constant 5.000000e-02 : f32
    %150 = vector.broadcast %cst_106 : f32 to vector<16x256xf32>
    %151 = arith.mulf %150, %147 : vector<16x256xf32>
    %152 = arith.select %149, %147, %151 : vector<16x256xi1>, vector<16x256xf32>
    %153 = arith.truncf %152 : vector<16x256xf32> to vector<16x256xbf16>
    %c1_107 = arith.constant 1 : index
    %c0_108 = arith.constant 0 : index
    %c0_109 = arith.constant 0 : index
    %154 = vector.load %arg4[%c1_107, %c0_108, %c0_109] : memref<2x16x256xbf16, #tpu.memory_space<vmem>>, vector<1x16x256xbf16>
    %155 = vector.shape_cast %154 : vector<1x16x256xbf16> to vector<16x256xbf16>
    %156 = vector.shape_cast %153 : vector<16x256xbf16> to vector<1x16x256xbf16>
    tpu.vector_store %arg4[%c1_107, %c0_108, %c0_109], %156 {strides = array<i32>} : memref<2x16x256xbf16, #tpu.memory_space<vmem>>, vector<1x16x256xbf16>,
    %157 = vector.extract_strided_slice %118 {offsets = [16, 256], sizes = [8, 256], strides = [1, 1]} : vector<24x512xf32> to vector<8x256xf32>
    %cst_110 = arith.constant 0.000000e+00 : f32
    %158 = vector.broadcast %cst_110 : f32 to vector<8x256xf32>
    %159 = arith.cmpf oge, %157, %158 : vector<8x256xf32>
    %cst_111 = arith.constant 5.000000e-02 : f32
    %160 = vector.broadcast %cst_111 : f32 to vector<8x256xf32>
    %161 = arith.mulf %160, %157 : vector<8x256xf32>
    %162 = arith.select %159, %157, %161 : vector<8x256xi1>, vector<8x256xf32>
    %163 = arith.truncf %162 : vector<8x256xf32> to vector<8x256xbf16>
    %c1_112 = arith.constant 1 : index
    %c0_113 = arith.constant 0 : index
    %c0_114 = arith.constant 0 : index
    %164 = vector.load %arg5[%c1_112, %c0_113, %c0_114] : memref<2x8x256xbf16, #tpu.memory_space<vmem>>, vector<1x8x256xbf16>
    %165 = vector.shape_cast %164 : vector<1x8x256xbf16> to vector<8x256xbf16>
    %166 = vector.shape_cast %163 : vector<8x256xbf16> to vector<1x8x256xbf16>
    tpu.vector_store %arg5[%c1_112, %c0_113, %c0_114], %166 {strides = array<i32>} : memref<2x8x256xbf16, #tpu.memory_space<vmem>>, vector<1x8x256xbf16>,
    return
  }
  func.func @transform_0(%arg0: i32) -> (i32, i32, i32) {
    %c0_i32 = arith.constant 0 : i32
    %c0_i32_0 = arith.constant 0 : i32
    %c0_i32_1 = arith.constant 0 : i32
    %c0_i32_2 = arith.constant 0 : i32
    return %c0_i32, %c0_i32_0, %c0_i32_1 : i32, i32, i32
  }
  func.func @transform_1(%arg0: i32) -> (i32, i32) {
    %c0_i32 = arith.constant 0 : i32
    %c0_i32_0 = arith.constant 0 : i32
    %c0_i32_1 = arith.constant 0 : i32
    return %c0_i32, %c0_i32_0 : i32, i32
  }
  func.func @transform_2(%arg0: i32) -> (i32, i32) {
    %c0_i32 = arith.constant 0 : i32
    %c0_i32_0 = arith.constant 0 : i32
    %c0_i32_1 = arith.constant 0 : i32
    return %c0_i32, %c0_i32_0 : i32, i32
  }
  func.func @transform_3(%arg0: i32) -> (i32, i32, i32) {
    %c0_i32 = arith.constant 0 : i32
    %c0_i32_0 = arith.constant 0 : i32
    %c0_i32_1 = arith.constant 0 : i32
    %c0_i32_2 = arith.constant 0 : i32
    return %c0_i32, %c0_i32_0, %c0_i32_1 : i32, i32, i32
  }
  func.func @transform_4(%arg0: i32) -> (i32, i32, i32) {
    %c0_i32 = arith.constant 0 : i32
    %c0_i32_0 = arith.constant 0 : i32
    %c0_i32_1 = arith.constant 0 : i32
    %c0_i32_2 = arith.constant 0 : i32
    return %c0_i32, %c0_i32_0, %c0_i32_1 : i32, i32, i32
  }
}

module attributes {stable_mosaic.version = 11 : i64} {
  func.func @kernel(%arg0: i32, %arg1: memref<2x16x256xbf16, #tpu.memory_space<vmem>>, %arg2: memref<16x144xbf16, #tpu.memory_space<vmem>>, %arg3: memref<16x1xf32, #tpu.memory_space<vmem>>, %arg4: memref<2x16x256xbf16, #tpu.memory_space<vmem>>, %arg5: memref<16x401xbf16, #tpu.memory_space<vmem>>, %arg6: memref<144x512xbf16, #tpu.memory_space<vmem>>) attributes {dimension_semantics = [#tpu.dimension_semantics<arbitrary>], iteration_bounds = array<i64: 1>, scalar_prefetch = 0 : i64, scratch_operands = 2 : i64, tpu.core_type = #tpu.core_type<tc>, window_params = [{pipeline_mode = #tpu.pipeline_mode<synchronous>, transform_indices = @transform_0, window_bounds = array<i64: 2, 16, 256>}, {pipeline_mode = #tpu.pipeline_mode<synchronous>, transform_indices = @transform_1, window_bounds = array<i64: 16, 144>}, {pipeline_mode = #tpu.pipeline_mode<synchronous>, transform_indices = @transform_2, window_bounds = array<i64: 16, 1>}, {pipeline_mode = #tpu.pipeline_mode<synchronous>, transform_indices = @transform_3, window_bounds = array<i64: 2, 16, 256>}]} {
    %0 = tpu.iota {dimensions = array<i32: 1>} : vector<1x256xi32>
    %c16_i32 = arith.constant 16 : i32
    %c0_i32 = arith.constant 0 : i32
    %1 = arith.cmpi eq, %c16_i32, %c0_i32 : i32
    %c1_i32 = arith.constant 1 : i32
    %2 = arith.select %1, %c1_i32, %c16_i32 : i32
    %3 = vector.broadcast %2 : i32 to vector<1x256xi32>
    %4 = arith.remsi %0, %3 : vector<1x256xi32>
    %c0_i32_0 = arith.constant 0 : i32
    %5 = vector.broadcast %c0_i32_0 : i32 to vector<1x256xi32>
    %6 = arith.cmpi ne, %4, %5 : vector<1x256xi32>
    %c0_i32_1 = arith.constant 0 : i32
    %7 = vector.broadcast %c0_i32_1 : i32 to vector<1x256xi32>
    %8 = arith.cmpi slt, %4, %7 : vector<1x256xi32>
    %c0_i32_2 = arith.constant 0 : i32
    %9 = arith.cmpi slt, %2, %c0_i32_2 : i32
    %10 = vector.broadcast %9 : i1 to vector<1x256xi1>
    %11 = vector.broadcast %10 : vector<1x256xi1> to vector<1x256xi1>
    %12 = arith.xori %8, %11 : vector<1x256xi1>
    %13 = arith.andi %12, %6 : vector<1x256xi1>
    %14 = vector.broadcast %2 : i32 to vector<1x256xi32>
    %15 = arith.addi %4, %14 : vector<1x256xi32>
    %16 = arith.select %13, %15, %4 : vector<1x256xi1>, vector<1x256xi32>
    %c0_i32_3 = arith.constant 0 : i32
    %17 = vector.broadcast %c0_i32_3 : i32 to vector<1x256xi32>
    %18 = arith.cmpi ne, %16, %17 : vector<1x256xi32>
    %c15_i32 = arith.constant 15 : i32
    %19 = vector.broadcast %c15_i32 : i32 to vector<1x256xi32>
    %20 = arith.cmpi ne, %16, %19 : vector<1x256xi32>
    %cst = arith.constant 0.000000e+00 : bf16
    %21 = vector.broadcast %cst : bf16 to vector<16x401xbf16>
    %c0 = arith.constant 0 : index
    %c0_4 = arith.constant 0 : index
    %22 = vector.load %arg5[%c0, %c0_4] : memref<16x401xbf16, #tpu.memory_space<vmem>>, vector<16x401xbf16>
    tpu.vector_store %arg5[%c0, %c0_4], %21 {strides = array<i32>} : memref<16x401xbf16, #tpu.memory_space<vmem>>, vector<16x401xbf16>,
    %c0_5 = arith.constant 0 : index
    %c0_6 = arith.constant 0 : index
    %c0_7 = arith.constant 0 : index
    %23 = vector.load %arg1[%c0_5, %c0_6, %c0_7] : memref<2x16x256xbf16, #tpu.memory_space<vmem>>, vector<1x16x256xbf16>
    %24 = vector.shape_cast %23 : vector<1x16x256xbf16> to vector<16x256xbf16>
    %c0_8 = arith.constant 0 : index
    %c128 = arith.constant 128 : index
    %25 = vector.load %arg5[%c0_8, %c128] : memref<16x401xbf16, #tpu.memory_space<vmem>>, vector<16x256xbf16>
    tpu.vector_store %arg5[%c0_8, %c128], %24 {strides = array<i32>} : memref<16x401xbf16, #tpu.memory_space<vmem>>, vector<16x256xbf16>,
    %c0_9 = arith.constant 0 : index
    %c111 = arith.constant 111 : index
    %26 = vector.load %arg5[%c0_9, %c111] : memref<16x401xbf16, #tpu.memory_space<vmem>>, vector<16x256xbf16>
    %cst_10 = arith.constant 0.000000e+00 : bf16
    %27 = vector.shape_cast %18 : vector<1x256xi1> to vector<1x256xi1>
    %28 = vector.broadcast %27 : vector<1x256xi1> to vector<16x256xi1>
    %29 = vector.broadcast %cst_10 : bf16 to vector<16x256xbf16>
    %30 = arith.select %28, %26, %29 : vector<16x256xi1>, vector<16x256xbf16>
    %c0_11 = arith.constant 0 : index
    %c0_12 = arith.constant 0 : index
    %31 = vector.load %arg6[%c0_11, %c0_12] : memref<144x512xbf16, #tpu.memory_space<vmem>>, vector<16x256xbf16>
    tpu.vector_store %arg6[%c0_11, %c0_12], %30 {strides = array<i32>} : memref<144x512xbf16, #tpu.memory_space<vmem>>, vector<16x256xbf16>,
    %c0_13 = arith.constant 0 : index
    %c112 = arith.constant 112 : index
    %32 = vector.load %arg5[%c0_13, %c112] : memref<16x401xbf16, #tpu.memory_space<vmem>>, vector<16x256xbf16>
    %c16 = arith.constant 16 : index
    %c0_14 = arith.constant 0 : index
    %33 = vector.load %arg6[%c16, %c0_14] : memref<144x512xbf16, #tpu.memory_space<vmem>>, vector<16x256xbf16>
    tpu.vector_store %arg6[%c16, %c0_14], %32 {strides = array<i32>} : memref<144x512xbf16, #tpu.memory_space<vmem>>, vector<16x256xbf16>,
    %c0_15 = arith.constant 0 : index
    %c113 = arith.constant 113 : index
    %34 = vector.load %arg5[%c0_15, %c113] : memref<16x401xbf16, #tpu.memory_space<vmem>>, vector<16x256xbf16>
    %cst_16 = arith.constant 0.000000e+00 : bf16
    %35 = vector.shape_cast %20 : vector<1x256xi1> to vector<1x256xi1>
    %36 = vector.broadcast %35 : vector<1x256xi1> to vector<16x256xi1>
    %37 = vector.broadcast %cst_16 : bf16 to vector<16x256xbf16>
    %38 = arith.select %36, %34, %37 : vector<16x256xi1>, vector<16x256xbf16>
    %c32 = arith.constant 32 : index
    %c0_17 = arith.constant 0 : index
    %39 = vector.load %arg6[%c32, %c0_17] : memref<144x512xbf16, #tpu.memory_space<vmem>>, vector<16x256xbf16>
    tpu.vector_store %arg6[%c32, %c0_17], %38 {strides = array<i32>} : memref<144x512xbf16, #tpu.memory_space<vmem>>, vector<16x256xbf16>,
    %c0_18 = arith.constant 0 : index
    %c127 = arith.constant 127 : index
    %40 = vector.load %arg5[%c0_18, %c127] : memref<16x401xbf16, #tpu.memory_space<vmem>>, vector<16x256xbf16>
    %cst_19 = arith.constant 0.000000e+00 : bf16
    %41 = vector.shape_cast %18 : vector<1x256xi1> to vector<1x256xi1>
    %42 = vector.broadcast %41 : vector<1x256xi1> to vector<16x256xi1>
    %43 = vector.broadcast %cst_19 : bf16 to vector<16x256xbf16>
    %44 = arith.select %42, %40, %43 : vector<16x256xi1>, vector<16x256xbf16>
    %c48 = arith.constant 48 : index
    %c0_20 = arith.constant 0 : index
    %45 = vector.load %arg6[%c48, %c0_20] : memref<144x512xbf16, #tpu.memory_space<vmem>>, vector<16x256xbf16>
    tpu.vector_store %arg6[%c48, %c0_20], %44 {strides = array<i32>} : memref<144x512xbf16, #tpu.memory_space<vmem>>, vector<16x256xbf16>,
    %c0_21 = arith.constant 0 : index
    %c128_22 = arith.constant 128 : index
    %46 = vector.load %arg5[%c0_21, %c128_22] : memref<16x401xbf16, #tpu.memory_space<vmem>>, vector<16x256xbf16>
    %c64 = arith.constant 64 : index
    %c0_23 = arith.constant 0 : index
    %47 = vector.load %arg6[%c64, %c0_23] : memref<144x512xbf16, #tpu.memory_space<vmem>>, vector<16x256xbf16>
    tpu.vector_store %arg6[%c64, %c0_23], %46 {strides = array<i32>} : memref<144x512xbf16, #tpu.memory_space<vmem>>, vector<16x256xbf16>,
    %c0_24 = arith.constant 0 : index
    %c129 = arith.constant 129 : index
    %48 = vector.load %arg5[%c0_24, %c129] : memref<16x401xbf16, #tpu.memory_space<vmem>>, vector<16x256xbf16>
    %cst_25 = arith.constant 0.000000e+00 : bf16
    %49 = vector.shape_cast %20 : vector<1x256xi1> to vector<1x256xi1>
    %50 = vector.broadcast %49 : vector<1x256xi1> to vector<16x256xi1>
    %51 = vector.broadcast %cst_25 : bf16 to vector<16x256xbf16>
    %52 = arith.select %50, %48, %51 : vector<16x256xi1>, vector<16x256xbf16>
    %c80 = arith.constant 80 : index
    %c0_26 = arith.constant 0 : index
    %53 = vector.load %arg6[%c80, %c0_26] : memref<144x512xbf16, #tpu.memory_space<vmem>>, vector<16x256xbf16>
    tpu.vector_store %arg6[%c80, %c0_26], %52 {strides = array<i32>} : memref<144x512xbf16, #tpu.memory_space<vmem>>, vector<16x256xbf16>,
    %c0_27 = arith.constant 0 : index
    %c143 = arith.constant 143 : index
    %54 = vector.load %arg5[%c0_27, %c143] : memref<16x401xbf16, #tpu.memory_space<vmem>>, vector<16x256xbf16>
    %cst_28 = arith.constant 0.000000e+00 : bf16
    %55 = vector.shape_cast %18 : vector<1x256xi1> to vector<1x256xi1>
    %56 = vector.broadcast %55 : vector<1x256xi1> to vector<16x256xi1>
    %57 = vector.broadcast %cst_28 : bf16 to vector<16x256xbf16>
    %58 = arith.select %56, %54, %57 : vector<16x256xi1>, vector<16x256xbf16>
    %c96 = arith.constant 96 : index
    %c0_29 = arith.constant 0 : index
    %59 = vector.load %arg6[%c96, %c0_29] : memref<144x512xbf16, #tpu.memory_space<vmem>>, vector<16x256xbf16>
    tpu.vector_store %arg6[%c96, %c0_29], %58 {strides = array<i32>} : memref<144x512xbf16, #tpu.memory_space<vmem>>, vector<16x256xbf16>,
    %c0_30 = arith.constant 0 : index
    %c144 = arith.constant 144 : index
    %60 = vector.load %arg5[%c0_30, %c144] : memref<16x401xbf16, #tpu.memory_space<vmem>>, vector<16x256xbf16>
    %c112_31 = arith.constant 112 : index
    %c0_32 = arith.constant 0 : index
    %61 = vector.load %arg6[%c112_31, %c0_32] : memref<144x512xbf16, #tpu.memory_space<vmem>>, vector<16x256xbf16>
    tpu.vector_store %arg6[%c112_31, %c0_32], %60 {strides = array<i32>} : memref<144x512xbf16, #tpu.memory_space<vmem>>, vector<16x256xbf16>,
    %c0_33 = arith.constant 0 : index
    %c145 = arith.constant 145 : index
    %62 = vector.load %arg5[%c0_33, %c145] : memref<16x401xbf16, #tpu.memory_space<vmem>>, vector<16x256xbf16>
    %cst_34 = arith.constant 0.000000e+00 : bf16
    %63 = vector.shape_cast %20 : vector<1x256xi1> to vector<1x256xi1>
    %64 = vector.broadcast %63 : vector<1x256xi1> to vector<16x256xi1>
    %65 = vector.broadcast %cst_34 : bf16 to vector<16x256xbf16>
    %66 = arith.select %64, %62, %65 : vector<16x256xi1>, vector<16x256xbf16>
    %c128_35 = arith.constant 128 : index
    %c0_36 = arith.constant 0 : index
    %67 = vector.load %arg6[%c128_35, %c0_36] : memref<144x512xbf16, #tpu.memory_space<vmem>>, vector<16x256xbf16>
    tpu.vector_store %arg6[%c128_35, %c0_36], %66 {strides = array<i32>} : memref<144x512xbf16, #tpu.memory_space<vmem>>, vector<16x256xbf16>,
    %c1 = arith.constant 1 : index
    %c0_37 = arith.constant 0 : index
    %c0_38 = arith.constant 0 : index
    %68 = vector.load %arg1[%c1, %c0_37, %c0_38] : memref<2x16x256xbf16, #tpu.memory_space<vmem>>, vector<1x16x256xbf16>
    %69 = vector.shape_cast %68 : vector<1x16x256xbf16> to vector<16x256xbf16>
    %c0_39 = arith.constant 0 : index
    %c128_40 = arith.constant 128 : index
    %70 = vector.load %arg5[%c0_39, %c128_40] : memref<16x401xbf16, #tpu.memory_space<vmem>>, vector<16x256xbf16>
    tpu.vector_store %arg5[%c0_39, %c128_40], %69 {strides = array<i32>} : memref<16x401xbf16, #tpu.memory_space<vmem>>, vector<16x256xbf16>,
    %c0_41 = arith.constant 0 : index
    %c111_42 = arith.constant 111 : index
    %71 = vector.load %arg5[%c0_41, %c111_42] : memref<16x401xbf16, #tpu.memory_space<vmem>>, vector<16x256xbf16>
    %cst_43 = arith.constant 0.000000e+00 : bf16
    %72 = vector.shape_cast %18 : vector<1x256xi1> to vector<1x256xi1>
    %73 = vector.broadcast %72 : vector<1x256xi1> to vector<16x256xi1>
    %74 = vector.broadcast %cst_43 : bf16 to vector<16x256xbf16>
    %75 = arith.select %73, %71, %74 : vector<16x256xi1>, vector<16x256xbf16>
    %c0_44 = arith.constant 0 : index
    %c256 = arith.constant 256 : index
    %76 = vector.load %arg6[%c0_44, %c256] : memref<144x512xbf16, #tpu.memory_space<vmem>>, vector<16x256xbf16>
    tpu.vector_store %arg6[%c0_44, %c256], %75 {strides = array<i32>} : memref<144x512xbf16, #tpu.memory_space<vmem>>, vector<16x256xbf16>,
    %c0_45 = arith.constant 0 : index
    %c112_46 = arith.constant 112 : index
    %77 = vector.load %arg5[%c0_45, %c112_46] : memref<16x401xbf16, #tpu.memory_space<vmem>>, vector<16x256xbf16>
    %c16_47 = arith.constant 16 : index
    %c256_48 = arith.constant 256 : index
    %78 = vector.load %arg6[%c16_47, %c256_48] : memref<144x512xbf16, #tpu.memory_space<vmem>>, vector<16x256xbf16>
    tpu.vector_store %arg6[%c16_47, %c256_48], %77 {strides = array<i32>} : memref<144x512xbf16, #tpu.memory_space<vmem>>, vector<16x256xbf16>,
    %c0_49 = arith.constant 0 : index
    %c113_50 = arith.constant 113 : index
    %79 = vector.load %arg5[%c0_49, %c113_50] : memref<16x401xbf16, #tpu.memory_space<vmem>>, vector<16x256xbf16>
    %cst_51 = arith.constant 0.000000e+00 : bf16
    %80 = vector.shape_cast %20 : vector<1x256xi1> to vector<1x256xi1>
    %81 = vector.broadcast %80 : vector<1x256xi1> to vector<16x256xi1>
    %82 = vector.broadcast %cst_51 : bf16 to vector<16x256xbf16>
    %83 = arith.select %81, %79, %82 : vector<16x256xi1>, vector<16x256xbf16>
    %c32_52 = arith.constant 32 : index
    %c256_53 = arith.constant 256 : index
    %84 = vector.load %arg6[%c32_52, %c256_53] : memref<144x512xbf16, #tpu.memory_space<vmem>>, vector<16x256xbf16>
    tpu.vector_store %arg6[%c32_52, %c256_53], %83 {strides = array<i32>} : memref<144x512xbf16, #tpu.memory_space<vmem>>, vector<16x256xbf16>,
    %c0_54 = arith.constant 0 : index
    %c127_55 = arith.constant 127 : index
    %85 = vector.load %arg5[%c0_54, %c127_55] : memref<16x401xbf16, #tpu.memory_space<vmem>>, vector<16x256xbf16>
    %cst_56 = arith.constant 0.000000e+00 : bf16
    %86 = vector.shape_cast %18 : vector<1x256xi1> to vector<1x256xi1>
    %87 = vector.broadcast %86 : vector<1x256xi1> to vector<16x256xi1>
    %88 = vector.broadcast %cst_56 : bf16 to vector<16x256xbf16>
    %89 = arith.select %87, %85, %88 : vector<16x256xi1>, vector<16x256xbf16>
    %c48_57 = arith.constant 48 : index
    %c256_58 = arith.constant 256 : index
    %90 = vector.load %arg6[%c48_57, %c256_58] : memref<144x512xbf16, #tpu.memory_space<vmem>>, vector<16x256xbf16>
    tpu.vector_store %arg6[%c48_57, %c256_58], %89 {strides = array<i32>} : memref<144x512xbf16, #tpu.memory_space<vmem>>, vector<16x256xbf16>,
    %c0_59 = arith.constant 0 : index
    %c128_60 = arith.constant 128 : index
    %91 = vector.load %arg5[%c0_59, %c128_60] : memref<16x401xbf16, #tpu.memory_space<vmem>>, vector<16x256xbf16>
    %c64_61 = arith.constant 64 : index
    %c256_62 = arith.constant 256 : index
    %92 = vector.load %arg6[%c64_61, %c256_62] : memref<144x512xbf16, #tpu.memory_space<vmem>>, vector<16x256xbf16>
    tpu.vector_store %arg6[%c64_61, %c256_62], %91 {strides = array<i32>} : memref<144x512xbf16, #tpu.memory_space<vmem>>, vector<16x256xbf16>,
    %c0_63 = arith.constant 0 : index
    %c129_64 = arith.constant 129 : index
    %93 = vector.load %arg5[%c0_63, %c129_64] : memref<16x401xbf16, #tpu.memory_space<vmem>>, vector<16x256xbf16>
    %cst_65 = arith.constant 0.000000e+00 : bf16
    %94 = vector.shape_cast %20 : vector<1x256xi1> to vector<1x256xi1>
    %95 = vector.broadcast %94 : vector<1x256xi1> to vector<16x256xi1>
    %96 = vector.broadcast %cst_65 : bf16 to vector<16x256xbf16>
    %97 = arith.select %95, %93, %96 : vector<16x256xi1>, vector<16x256xbf16>
    %c80_66 = arith.constant 80 : index
    %c256_67 = arith.constant 256 : index
    %98 = vector.load %arg6[%c80_66, %c256_67] : memref<144x512xbf16, #tpu.memory_space<vmem>>, vector<16x256xbf16>
    tpu.vector_store %arg6[%c80_66, %c256_67], %97 {strides = array<i32>} : memref<144x512xbf16, #tpu.memory_space<vmem>>, vector<16x256xbf16>,
    %c0_68 = arith.constant 0 : index
    %c143_69 = arith.constant 143 : index
    %99 = vector.load %arg5[%c0_68, %c143_69] : memref<16x401xbf16, #tpu.memory_space<vmem>>, vector<16x256xbf16>
    %cst_70 = arith.constant 0.000000e+00 : bf16
    %100 = vector.shape_cast %18 : vector<1x256xi1> to vector<1x256xi1>
    %101 = vector.broadcast %100 : vector<1x256xi1> to vector<16x256xi1>
    %102 = vector.broadcast %cst_70 : bf16 to vector<16x256xbf16>
    %103 = arith.select %101, %99, %102 : vector<16x256xi1>, vector<16x256xbf16>
    %c96_71 = arith.constant 96 : index
    %c256_72 = arith.constant 256 : index
    %104 = vector.load %arg6[%c96_71, %c256_72] : memref<144x512xbf16, #tpu.memory_space<vmem>>, vector<16x256xbf16>
    tpu.vector_store %arg6[%c96_71, %c256_72], %103 {strides = array<i32>} : memref<144x512xbf16, #tpu.memory_space<vmem>>, vector<16x256xbf16>,
    %c0_73 = arith.constant 0 : index
    %c144_74 = arith.constant 144 : index
    %105 = vector.load %arg5[%c0_73, %c144_74] : memref<16x401xbf16, #tpu.memory_space<vmem>>, vector<16x256xbf16>
    %c112_75 = arith.constant 112 : index
    %c256_76 = arith.constant 256 : index
    %106 = vector.load %arg6[%c112_75, %c256_76] : memref<144x512xbf16, #tpu.memory_space<vmem>>, vector<16x256xbf16>
    tpu.vector_store %arg6[%c112_75, %c256_76], %105 {strides = array<i32>} : memref<144x512xbf16, #tpu.memory_space<vmem>>, vector<16x256xbf16>,
    %c0_77 = arith.constant 0 : index
    %c145_78 = arith.constant 145 : index
    %107 = vector.load %arg5[%c0_77, %c145_78] : memref<16x401xbf16, #tpu.memory_space<vmem>>, vector<16x256xbf16>
    %cst_79 = arith.constant 0.000000e+00 : bf16
    %108 = vector.shape_cast %20 : vector<1x256xi1> to vector<1x256xi1>
    %109 = vector.broadcast %108 : vector<1x256xi1> to vector<16x256xi1>
    %110 = vector.broadcast %cst_79 : bf16 to vector<16x256xbf16>
    %111 = arith.select %109, %107, %110 : vector<16x256xi1>, vector<16x256xbf16>
    %c128_80 = arith.constant 128 : index
    %c256_81 = arith.constant 256 : index
    %112 = vector.load %arg6[%c128_80, %c256_81] : memref<144x512xbf16, #tpu.memory_space<vmem>>, vector<16x256xbf16>
    tpu.vector_store %arg6[%c128_80, %c256_81], %111 {strides = array<i32>} : memref<144x512xbf16, #tpu.memory_space<vmem>>, vector<16x256xbf16>,
    %c0_82 = arith.constant 0 : index
    %c0_83 = arith.constant 0 : index
    %113 = vector.load %arg2[%c0_82, %c0_83] : memref<16x144xbf16, #tpu.memory_space<vmem>>, vector<16x144xbf16>
    %c0_84 = arith.constant 0 : index
    %c0_85 = arith.constant 0 : index
    %114 = vector.load %arg6[%c0_84, %c0_85] : memref<144x512xbf16, #tpu.memory_space<vmem>>, vector<144x512xbf16>
    %cst_86 = arith.constant dense<0.000000e+00> : vector<16x512xf32>
    %115 = tpu.matmul %113, %114, %cst_86 {dimension_numbers = #tpu.dot_dimension_numbers<[1], [0], [0], [1], [0, 0, 1, 1], [], []>} : vector<16x144xbf16>, vector<144x512xbf16>, vector<16x512xf32> -> vector<16x512xf32>
    %c0_87 = arith.constant 0 : index
    %c0_88 = arith.constant 0 : index
    %116 = vector.load %arg3[%c0_87, %c0_88] : memref<16x1xf32, #tpu.memory_space<vmem>>, vector<16x1xf32>
    %117 = vector.broadcast %116 : vector<16x1xf32> to vector<16x512xf32>
    %118 = arith.addf %115, %117 : vector<16x512xf32>
    %119 = vector.extract_strided_slice %118 {offsets = [0, 0], sizes = [16, 256], strides = [1, 1]} : vector<16x512xf32> to vector<16x256xf32>
    %120 = arith.truncf %119 : vector<16x256xf32> to vector<16x256xbf16>
    %c0_89 = arith.constant 0 : index
    %c0_90 = arith.constant 0 : index
    %c0_91 = arith.constant 0 : index
    %121 = vector.load %arg4[%c0_89, %c0_90, %c0_91] : memref<2x16x256xbf16, #tpu.memory_space<vmem>>, vector<1x16x256xbf16>
    %122 = vector.shape_cast %121 : vector<1x16x256xbf16> to vector<16x256xbf16>
    %123 = vector.shape_cast %120 : vector<16x256xbf16> to vector<1x16x256xbf16>
    tpu.vector_store %arg4[%c0_89, %c0_90, %c0_91], %123 {strides = array<i32>} : memref<2x16x256xbf16, #tpu.memory_space<vmem>>, vector<1x16x256xbf16>,
    %124 = vector.extract_strided_slice %118 {offsets = [0, 256], sizes = [16, 256], strides = [1, 1]} : vector<16x512xf32> to vector<16x256xf32>
    %125 = arith.truncf %124 : vector<16x256xf32> to vector<16x256xbf16>
    %c1_92 = arith.constant 1 : index
    %c0_93 = arith.constant 0 : index
    %c0_94 = arith.constant 0 : index
    %126 = vector.load %arg4[%c1_92, %c0_93, %c0_94] : memref<2x16x256xbf16, #tpu.memory_space<vmem>>, vector<1x16x256xbf16>
    %127 = vector.shape_cast %126 : vector<1x16x256xbf16> to vector<16x256xbf16>
    %128 = vector.shape_cast %125 : vector<16x256xbf16> to vector<1x16x256xbf16>
    tpu.vector_store %arg4[%c1_92, %c0_93, %c0_94], %128 {strides = array<i32>} : memref<2x16x256xbf16, #tpu.memory_space<vmem>>, vector<1x16x256xbf16>,
    return
  }
  func.func @transform_0(%arg0: i32) -> (i32, i32, i32) {
    %c0_i32 = arith.constant 0 : i32
    %c0_i32_0 = arith.constant 0 : i32
    %c0_i32_1 = arith.constant 0 : i32
    %c0_i32_2 = arith.constant 0 : i32
    return %c0_i32, %c0_i32_0, %c0_i32_1 : i32, i32, i32
  }
  func.func @transform_1(%arg0: i32) -> (i32, i32) {
    %c0_i32 = arith.constant 0 : i32
    %c0_i32_0 = arith.constant 0 : i32
    %c0_i32_1 = arith.constant 0 : i32
    return %c0_i32, %c0_i32_0 : i32, i32
  }
  func.func @transform_2(%arg0: i32) -> (i32, i32) {
    %c0_i32 = arith.constant 0 : i32
    %c0_i32_0 = arith.constant 0 : i32
    %c0_i32_1 = arith.constant 0 : i32
    return %c0_i32, %c0_i32_0 : i32, i32
  }
  func.func @transform_3(%arg0: i32) -> (i32, i32, i32) {
    %c0_i32 = arith.constant 0 : i32
    %c0_i32_0 = arith.constant 0 : i32
    %c0_i32_1 = arith.constant 0 : i32
    %c0_i32_2 = arith.constant 0 : i32
    return %c0_i32, %c0_i32_0, %c0_i32_1 : i32, i32, i32
  }
}

module attributes {stable_mosaic.version = 11 : i64} {
  func.func @kernel(%arg0: i32, %arg1: memref<2x16x256xbf16, #tpu.memory_space<vmem>>, %arg2: memref<8x144xbf16, #tpu.memory_space<vmem>>, %arg3: memref<8x1xf32, #tpu.memory_space<vmem>>, %arg4: memref<2x8x256xbf16, #tpu.memory_space<vmem>>, %arg5: memref<16x401xbf16, #tpu.memory_space<vmem>>, %arg6: memref<144x512xbf16, #tpu.memory_space<vmem>>) attributes {dimension_semantics = [#tpu.dimension_semantics<arbitrary>], iteration_bounds = array<i64: 1>, scalar_prefetch = 0 : i64, scratch_operands = 2 : i64, tpu.core_type = #tpu.core_type<tc>, window_params = [{pipeline_mode = #tpu.pipeline_mode<synchronous>, transform_indices = @transform_0, window_bounds = array<i64: 2, 16, 256>}, {pipeline_mode = #tpu.pipeline_mode<synchronous>, transform_indices = @transform_1, window_bounds = array<i64: 8, 144>}, {pipeline_mode = #tpu.pipeline_mode<synchronous>, transform_indices = @transform_2, window_bounds = array<i64: 8, 1>}, {pipeline_mode = #tpu.pipeline_mode<synchronous>, transform_indices = @transform_3, window_bounds = array<i64: 2, 8, 256>}]} {
    %0 = tpu.iota {dimensions = array<i32: 1>} : vector<1x256xi32>
    %c16_i32 = arith.constant 16 : i32
    %c0_i32 = arith.constant 0 : i32
    %1 = arith.cmpi eq, %c16_i32, %c0_i32 : i32
    %c1_i32 = arith.constant 1 : i32
    %2 = arith.select %1, %c1_i32, %c16_i32 : i32
    %3 = vector.broadcast %2 : i32 to vector<1x256xi32>
    %4 = arith.remsi %0, %3 : vector<1x256xi32>
    %c0_i32_0 = arith.constant 0 : i32
    %5 = vector.broadcast %c0_i32_0 : i32 to vector<1x256xi32>
    %6 = arith.cmpi ne, %4, %5 : vector<1x256xi32>
    %c0_i32_1 = arith.constant 0 : i32
    %7 = vector.broadcast %c0_i32_1 : i32 to vector<1x256xi32>
    %8 = arith.cmpi slt, %4, %7 : vector<1x256xi32>
    %c0_i32_2 = arith.constant 0 : i32
    %9 = arith.cmpi slt, %2, %c0_i32_2 : i32
    %10 = vector.broadcast %9 : i1 to vector<1x256xi1>
    %11 = vector.broadcast %10 : vector<1x256xi1> to vector<1x256xi1>
    %12 = arith.xori %8, %11 : vector<1x256xi1>
    %13 = arith.andi %12, %6 : vector<1x256xi1>
    %14 = vector.broadcast %2 : i32 to vector<1x256xi32>
    %15 = arith.addi %4, %14 : vector<1x256xi32>
    %16 = arith.select %13, %15, %4 : vector<1x256xi1>, vector<1x256xi32>
    %c0_i32_3 = arith.constant 0 : i32
    %17 = vector.broadcast %c0_i32_3 : i32 to vector<1x256xi32>
    %18 = arith.cmpi ne, %16, %17 : vector<1x256xi32>
    %c15_i32 = arith.constant 15 : i32
    %19 = vector.broadcast %c15_i32 : i32 to vector<1x256xi32>
    %20 = arith.cmpi ne, %16, %19 : vector<1x256xi32>
    %cst = arith.constant 0.000000e+00 : bf16
    %21 = vector.broadcast %cst : bf16 to vector<16x401xbf16>
    %c0 = arith.constant 0 : index
    %c0_4 = arith.constant 0 : index
    %22 = vector.load %arg5[%c0, %c0_4] : memref<16x401xbf16, #tpu.memory_space<vmem>>, vector<16x401xbf16>
    tpu.vector_store %arg5[%c0, %c0_4], %21 {strides = array<i32>} : memref<16x401xbf16, #tpu.memory_space<vmem>>, vector<16x401xbf16>,
    %c0_5 = arith.constant 0 : index
    %c0_6 = arith.constant 0 : index
    %c0_7 = arith.constant 0 : index
    %23 = vector.load %arg1[%c0_5, %c0_6, %c0_7] : memref<2x16x256xbf16, #tpu.memory_space<vmem>>, vector<1x16x256xbf16>
    %24 = vector.shape_cast %23 : vector<1x16x256xbf16> to vector<16x256xbf16>
    %c0_8 = arith.constant 0 : index
    %c128 = arith.constant 128 : index
    %25 = vector.load %arg5[%c0_8, %c128] : memref<16x401xbf16, #tpu.memory_space<vmem>>, vector<16x256xbf16>
    tpu.vector_store %arg5[%c0_8, %c128], %24 {strides = array<i32>} : memref<16x401xbf16, #tpu.memory_space<vmem>>, vector<16x256xbf16>,
    %c0_9 = arith.constant 0 : index
    %c111 = arith.constant 111 : index
    %26 = vector.load %arg5[%c0_9, %c111] : memref<16x401xbf16, #tpu.memory_space<vmem>>, vector<16x256xbf16>
    %cst_10 = arith.constant 0.000000e+00 : bf16
    %27 = vector.shape_cast %18 : vector<1x256xi1> to vector<1x256xi1>
    %28 = vector.broadcast %27 : vector<1x256xi1> to vector<16x256xi1>
    %29 = vector.broadcast %cst_10 : bf16 to vector<16x256xbf16>
    %30 = arith.select %28, %26, %29 : vector<16x256xi1>, vector<16x256xbf16>
    %c0_11 = arith.constant 0 : index
    %c0_12 = arith.constant 0 : index
    %31 = vector.load %arg6[%c0_11, %c0_12] : memref<144x512xbf16, #tpu.memory_space<vmem>>, vector<16x256xbf16>
    tpu.vector_store %arg6[%c0_11, %c0_12], %30 {strides = array<i32>} : memref<144x512xbf16, #tpu.memory_space<vmem>>, vector<16x256xbf16>,
    %c0_13 = arith.constant 0 : index
    %c112 = arith.constant 112 : index
    %32 = vector.load %arg5[%c0_13, %c112] : memref<16x401xbf16, #tpu.memory_space<vmem>>, vector<16x256xbf16>
    %c16 = arith.constant 16 : index
    %c0_14 = arith.constant 0 : index
    %33 = vector.load %arg6[%c16, %c0_14] : memref<144x512xbf16, #tpu.memory_space<vmem>>, vector<16x256xbf16>
    tpu.vector_store %arg6[%c16, %c0_14], %32 {strides = array<i32>} : memref<144x512xbf16, #tpu.memory_space<vmem>>, vector<16x256xbf16>,
    %c0_15 = arith.constant 0 : index
    %c113 = arith.constant 113 : index
    %34 = vector.load %arg5[%c0_15, %c113] : memref<16x401xbf16, #tpu.memory_space<vmem>>, vector<16x256xbf16>
    %cst_16 = arith.constant 0.000000e+00 : bf16
    %35 = vector.shape_cast %20 : vector<1x256xi1> to vector<1x256xi1>
    %36 = vector.broadcast %35 : vector<1x256xi1> to vector<16x256xi1>
    %37 = vector.broadcast %cst_16 : bf16 to vector<16x256xbf16>
    %38 = arith.select %36, %34, %37 : vector<16x256xi1>, vector<16x256xbf16>
    %c32 = arith.constant 32 : index
    %c0_17 = arith.constant 0 : index
    %39 = vector.load %arg6[%c32, %c0_17] : memref<144x512xbf16, #tpu.memory_space<vmem>>, vector<16x256xbf16>
    tpu.vector_store %arg6[%c32, %c0_17], %38 {strides = array<i32>} : memref<144x512xbf16, #tpu.memory_space<vmem>>, vector<16x256xbf16>,
    %c0_18 = arith.constant 0 : index
    %c127 = arith.constant 127 : index
    %40 = vector.load %arg5[%c0_18, %c127] : memref<16x401xbf16, #tpu.memory_space<vmem>>, vector<16x256xbf16>
    %cst_19 = arith.constant 0.000000e+00 : bf16
    %41 = vector.shape_cast %18 : vector<1x256xi1> to vector<1x256xi1>
    %42 = vector.broadcast %41 : vector<1x256xi1> to vector<16x256xi1>
    %43 = vector.broadcast %cst_19 : bf16 to vector<16x256xbf16>
    %44 = arith.select %42, %40, %43 : vector<16x256xi1>, vector<16x256xbf16>
    %c48 = arith.constant 48 : index
    %c0_20 = arith.constant 0 : index
    %45 = vector.load %arg6[%c48, %c0_20] : memref<144x512xbf16, #tpu.memory_space<vmem>>, vector<16x256xbf16>
    tpu.vector_store %arg6[%c48, %c0_20], %44 {strides = array<i32>} : memref<144x512xbf16, #tpu.memory_space<vmem>>, vector<16x256xbf16>,
    %c0_21 = arith.constant 0 : index
    %c128_22 = arith.constant 128 : index
    %46 = vector.load %arg5[%c0_21, %c128_22] : memref<16x401xbf16, #tpu.memory_space<vmem>>, vector<16x256xbf16>
    %c64 = arith.constant 64 : index
    %c0_23 = arith.constant 0 : index
    %47 = vector.load %arg6[%c64, %c0_23] : memref<144x512xbf16, #tpu.memory_space<vmem>>, vector<16x256xbf16>
    tpu.vector_store %arg6[%c64, %c0_23], %46 {strides = array<i32>} : memref<144x512xbf16, #tpu.memory_space<vmem>>, vector<16x256xbf16>,
    %c0_24 = arith.constant 0 : index
    %c129 = arith.constant 129 : index
    %48 = vector.load %arg5[%c0_24, %c129] : memref<16x401xbf16, #tpu.memory_space<vmem>>, vector<16x256xbf16>
    %cst_25 = arith.constant 0.000000e+00 : bf16
    %49 = vector.shape_cast %20 : vector<1x256xi1> to vector<1x256xi1>
    %50 = vector.broadcast %49 : vector<1x256xi1> to vector<16x256xi1>
    %51 = vector.broadcast %cst_25 : bf16 to vector<16x256xbf16>
    %52 = arith.select %50, %48, %51 : vector<16x256xi1>, vector<16x256xbf16>
    %c80 = arith.constant 80 : index
    %c0_26 = arith.constant 0 : index
    %53 = vector.load %arg6[%c80, %c0_26] : memref<144x512xbf16, #tpu.memory_space<vmem>>, vector<16x256xbf16>
    tpu.vector_store %arg6[%c80, %c0_26], %52 {strides = array<i32>} : memref<144x512xbf16, #tpu.memory_space<vmem>>, vector<16x256xbf16>,
    %c0_27 = arith.constant 0 : index
    %c143 = arith.constant 143 : index
    %54 = vector.load %arg5[%c0_27, %c143] : memref<16x401xbf16, #tpu.memory_space<vmem>>, vector<16x256xbf16>
    %cst_28 = arith.constant 0.000000e+00 : bf16
    %55 = vector.shape_cast %18 : vector<1x256xi1> to vector<1x256xi1>
    %56 = vector.broadcast %55 : vector<1x256xi1> to vector<16x256xi1>
    %57 = vector.broadcast %cst_28 : bf16 to vector<16x256xbf16>
    %58 = arith.select %56, %54, %57 : vector<16x256xi1>, vector<16x256xbf16>
    %c96 = arith.constant 96 : index
    %c0_29 = arith.constant 0 : index
    %59 = vector.load %arg6[%c96, %c0_29] : memref<144x512xbf16, #tpu.memory_space<vmem>>, vector<16x256xbf16>
    tpu.vector_store %arg6[%c96, %c0_29], %58 {strides = array<i32>} : memref<144x512xbf16, #tpu.memory_space<vmem>>, vector<16x256xbf16>,
    %c0_30 = arith.constant 0 : index
    %c144 = arith.constant 144 : index
    %60 = vector.load %arg5[%c0_30, %c144] : memref<16x401xbf16, #tpu.memory_space<vmem>>, vector<16x256xbf16>
    %c112_31 = arith.constant 112 : index
    %c0_32 = arith.constant 0 : index
    %61 = vector.load %arg6[%c112_31, %c0_32] : memref<144x512xbf16, #tpu.memory_space<vmem>>, vector<16x256xbf16>
    tpu.vector_store %arg6[%c112_31, %c0_32], %60 {strides = array<i32>} : memref<144x512xbf16, #tpu.memory_space<vmem>>, vector<16x256xbf16>,
    %c0_33 = arith.constant 0 : index
    %c145 = arith.constant 145 : index
    %62 = vector.load %arg5[%c0_33, %c145] : memref<16x401xbf16, #tpu.memory_space<vmem>>, vector<16x256xbf16>
    %cst_34 = arith.constant 0.000000e+00 : bf16
    %63 = vector.shape_cast %20 : vector<1x256xi1> to vector<1x256xi1>
    %64 = vector.broadcast %63 : vector<1x256xi1> to vector<16x256xi1>
    %65 = vector.broadcast %cst_34 : bf16 to vector<16x256xbf16>
    %66 = arith.select %64, %62, %65 : vector<16x256xi1>, vector<16x256xbf16>
    %c128_35 = arith.constant 128 : index
    %c0_36 = arith.constant 0 : index
    %67 = vector.load %arg6[%c128_35, %c0_36] : memref<144x512xbf16, #tpu.memory_space<vmem>>, vector<16x256xbf16>
    tpu.vector_store %arg6[%c128_35, %c0_36], %66 {strides = array<i32>} : memref<144x512xbf16, #tpu.memory_space<vmem>>, vector<16x256xbf16>,
    %c1 = arith.constant 1 : index
    %c0_37 = arith.constant 0 : index
    %c0_38 = arith.constant 0 : index
    %68 = vector.load %arg1[%c1, %c0_37, %c0_38] : memref<2x16x256xbf16, #tpu.memory_space<vmem>>, vector<1x16x256xbf16>
    %69 = vector.shape_cast %68 : vector<1x16x256xbf16> to vector<16x256xbf16>
    %c0_39 = arith.constant 0 : index
    %c128_40 = arith.constant 128 : index
    %70 = vector.load %arg5[%c0_39, %c128_40] : memref<16x401xbf16, #tpu.memory_space<vmem>>, vector<16x256xbf16>
    tpu.vector_store %arg5[%c0_39, %c128_40], %69 {strides = array<i32>} : memref<16x401xbf16, #tpu.memory_space<vmem>>, vector<16x256xbf16>,
    %c0_41 = arith.constant 0 : index
    %c111_42 = arith.constant 111 : index
    %71 = vector.load %arg5[%c0_41, %c111_42] : memref<16x401xbf16, #tpu.memory_space<vmem>>, vector<16x256xbf16>
    %cst_43 = arith.constant 0.000000e+00 : bf16
    %72 = vector.shape_cast %18 : vector<1x256xi1> to vector<1x256xi1>
    %73 = vector.broadcast %72 : vector<1x256xi1> to vector<16x256xi1>
    %74 = vector.broadcast %cst_43 : bf16 to vector<16x256xbf16>
    %75 = arith.select %73, %71, %74 : vector<16x256xi1>, vector<16x256xbf16>
    %c0_44 = arith.constant 0 : index
    %c256 = arith.constant 256 : index
    %76 = vector.load %arg6[%c0_44, %c256] : memref<144x512xbf16, #tpu.memory_space<vmem>>, vector<16x256xbf16>
    tpu.vector_store %arg6[%c0_44, %c256], %75 {strides = array<i32>} : memref<144x512xbf16, #tpu.memory_space<vmem>>, vector<16x256xbf16>,
    %c0_45 = arith.constant 0 : index
    %c112_46 = arith.constant 112 : index
    %77 = vector.load %arg5[%c0_45, %c112_46] : memref<16x401xbf16, #tpu.memory_space<vmem>>, vector<16x256xbf16>
    %c16_47 = arith.constant 16 : index
    %c256_48 = arith.constant 256 : index
    %78 = vector.load %arg6[%c16_47, %c256_48] : memref<144x512xbf16, #tpu.memory_space<vmem>>, vector<16x256xbf16>
    tpu.vector_store %arg6[%c16_47, %c256_48], %77 {strides = array<i32>} : memref<144x512xbf16, #tpu.memory_space<vmem>>, vector<16x256xbf16>,
    %c0_49 = arith.constant 0 : index
    %c113_50 = arith.constant 113 : index
    %79 = vector.load %arg5[%c0_49, %c113_50] : memref<16x401xbf16, #tpu.memory_space<vmem>>, vector<16x256xbf16>
    %cst_51 = arith.constant 0.000000e+00 : bf16
    %80 = vector.shape_cast %20 : vector<1x256xi1> to vector<1x256xi1>
    %81 = vector.broadcast %80 : vector<1x256xi1> to vector<16x256xi1>
    %82 = vector.broadcast %cst_51 : bf16 to vector<16x256xbf16>
    %83 = arith.select %81, %79, %82 : vector<16x256xi1>, vector<16x256xbf16>
    %c32_52 = arith.constant 32 : index
    %c256_53 = arith.constant 256 : index
    %84 = vector.load %arg6[%c32_52, %c256_53] : memref<144x512xbf16, #tpu.memory_space<vmem>>, vector<16x256xbf16>
    tpu.vector_store %arg6[%c32_52, %c256_53], %83 {strides = array<i32>} : memref<144x512xbf16, #tpu.memory_space<vmem>>, vector<16x256xbf16>,
    %c0_54 = arith.constant 0 : index
    %c127_55 = arith.constant 127 : index
    %85 = vector.load %arg5[%c0_54, %c127_55] : memref<16x401xbf16, #tpu.memory_space<vmem>>, vector<16x256xbf16>
    %cst_56 = arith.constant 0.000000e+00 : bf16
    %86 = vector.shape_cast %18 : vector<1x256xi1> to vector<1x256xi1>
    %87 = vector.broadcast %86 : vector<1x256xi1> to vector<16x256xi1>
    %88 = vector.broadcast %cst_56 : bf16 to vector<16x256xbf16>
    %89 = arith.select %87, %85, %88 : vector<16x256xi1>, vector<16x256xbf16>
    %c48_57 = arith.constant 48 : index
    %c256_58 = arith.constant 256 : index
    %90 = vector.load %arg6[%c48_57, %c256_58] : memref<144x512xbf16, #tpu.memory_space<vmem>>, vector<16x256xbf16>
    tpu.vector_store %arg6[%c48_57, %c256_58], %89 {strides = array<i32>} : memref<144x512xbf16, #tpu.memory_space<vmem>>, vector<16x256xbf16>,
    %c0_59 = arith.constant 0 : index
    %c128_60 = arith.constant 128 : index
    %91 = vector.load %arg5[%c0_59, %c128_60] : memref<16x401xbf16, #tpu.memory_space<vmem>>, vector<16x256xbf16>
    %c64_61 = arith.constant 64 : index
    %c256_62 = arith.constant 256 : index
    %92 = vector.load %arg6[%c64_61, %c256_62] : memref<144x512xbf16, #tpu.memory_space<vmem>>, vector<16x256xbf16>
    tpu.vector_store %arg6[%c64_61, %c256_62], %91 {strides = array<i32>} : memref<144x512xbf16, #tpu.memory_space<vmem>>, vector<16x256xbf16>,
    %c0_63 = arith.constant 0 : index
    %c129_64 = arith.constant 129 : index
    %93 = vector.load %arg5[%c0_63, %c129_64] : memref<16x401xbf16, #tpu.memory_space<vmem>>, vector<16x256xbf16>
    %cst_65 = arith.constant 0.000000e+00 : bf16
    %94 = vector.shape_cast %20 : vector<1x256xi1> to vector<1x256xi1>
    %95 = vector.broadcast %94 : vector<1x256xi1> to vector<16x256xi1>
    %96 = vector.broadcast %cst_65 : bf16 to vector<16x256xbf16>
    %97 = arith.select %95, %93, %96 : vector<16x256xi1>, vector<16x256xbf16>
    %c80_66 = arith.constant 80 : index
    %c256_67 = arith.constant 256 : index
    %98 = vector.load %arg6[%c80_66, %c256_67] : memref<144x512xbf16, #tpu.memory_space<vmem>>, vector<16x256xbf16>
    tpu.vector_store %arg6[%c80_66, %c256_67], %97 {strides = array<i32>} : memref<144x512xbf16, #tpu.memory_space<vmem>>, vector<16x256xbf16>,
    %c0_68 = arith.constant 0 : index
    %c143_69 = arith.constant 143 : index
    %99 = vector.load %arg5[%c0_68, %c143_69] : memref<16x401xbf16, #tpu.memory_space<vmem>>, vector<16x256xbf16>
    %cst_70 = arith.constant 0.000000e+00 : bf16
    %100 = vector.shape_cast %18 : vector<1x256xi1> to vector<1x256xi1>
    %101 = vector.broadcast %100 : vector<1x256xi1> to vector<16x256xi1>
    %102 = vector.broadcast %cst_70 : bf16 to vector<16x256xbf16>
    %103 = arith.select %101, %99, %102 : vector<16x256xi1>, vector<16x256xbf16>
    %c96_71 = arith.constant 96 : index
    %c256_72 = arith.constant 256 : index
    %104 = vector.load %arg6[%c96_71, %c256_72] : memref<144x512xbf16, #tpu.memory_space<vmem>>, vector<16x256xbf16>
    tpu.vector_store %arg6[%c96_71, %c256_72], %103 {strides = array<i32>} : memref<144x512xbf16, #tpu.memory_space<vmem>>, vector<16x256xbf16>,
    %c0_73 = arith.constant 0 : index
    %c144_74 = arith.constant 144 : index
    %105 = vector.load %arg5[%c0_73, %c144_74] : memref<16x401xbf16, #tpu.memory_space<vmem>>, vector<16x256xbf16>
    %c112_75 = arith.constant 112 : index
    %c256_76 = arith.constant 256 : index
    %106 = vector.load %arg6[%c112_75, %c256_76] : memref<144x512xbf16, #tpu.memory_space<vmem>>, vector<16x256xbf16>
    tpu.vector_store %arg6[%c112_75, %c256_76], %105 {strides = array<i32>} : memref<144x512xbf16, #tpu.memory_space<vmem>>, vector<16x256xbf16>,
    %c0_77 = arith.constant 0 : index
    %c145_78 = arith.constant 145 : index
    %107 = vector.load %arg5[%c0_77, %c145_78] : memref<16x401xbf16, #tpu.memory_space<vmem>>, vector<16x256xbf16>
    %cst_79 = arith.constant 0.000000e+00 : bf16
    %108 = vector.shape_cast %20 : vector<1x256xi1> to vector<1x256xi1>
    %109 = vector.broadcast %108 : vector<1x256xi1> to vector<16x256xi1>
    %110 = vector.broadcast %cst_79 : bf16 to vector<16x256xbf16>
    %111 = arith.select %109, %107, %110 : vector<16x256xi1>, vector<16x256xbf16>
    %c128_80 = arith.constant 128 : index
    %c256_81 = arith.constant 256 : index
    %112 = vector.load %arg6[%c128_80, %c256_81] : memref<144x512xbf16, #tpu.memory_space<vmem>>, vector<16x256xbf16>
    tpu.vector_store %arg6[%c128_80, %c256_81], %111 {strides = array<i32>} : memref<144x512xbf16, #tpu.memory_space<vmem>>, vector<16x256xbf16>,
    %c0_82 = arith.constant 0 : index
    %c0_83 = arith.constant 0 : index
    %113 = vector.load %arg2[%c0_82, %c0_83] : memref<8x144xbf16, #tpu.memory_space<vmem>>, vector<8x144xbf16>
    %c0_84 = arith.constant 0 : index
    %c0_85 = arith.constant 0 : index
    %114 = vector.load %arg6[%c0_84, %c0_85] : memref<144x512xbf16, #tpu.memory_space<vmem>>, vector<144x512xbf16>
    %cst_86 = arith.constant dense<0.000000e+00> : vector<8x512xf32>
    %115 = tpu.matmul %113, %114, %cst_86 {dimension_numbers = #tpu.dot_dimension_numbers<[1], [0], [0], [1], [0, 0, 1, 1], [], []>} : vector<8x144xbf16>, vector<144x512xbf16>, vector<8x512xf32> -> vector<8x512xf32>
    %c0_87 = arith.constant 0 : index
    %c0_88 = arith.constant 0 : index
    %116 = vector.load %arg3[%c0_87, %c0_88] : memref<8x1xf32, #tpu.memory_space<vmem>>, vector<8x1xf32>
    %117 = vector.broadcast %116 : vector<8x1xf32> to vector<8x512xf32>
    %118 = arith.addf %115, %117 : vector<8x512xf32>
    %119 = vector.extract_strided_slice %118 {offsets = [0, 0], sizes = [8, 256], strides = [1, 1]} : vector<8x512xf32> to vector<8x256xf32>
    %cst_89 = arith.constant 0.000000e+00 : f32
    %120 = vector.broadcast %cst_89 : f32 to vector<8x256xf32>
    %121 = arith.cmpf oge, %119, %120 : vector<8x256xf32>
    %cst_90 = arith.constant 5.000000e-02 : f32
    %122 = vector.broadcast %cst_90 : f32 to vector<8x256xf32>
    %123 = arith.mulf %122, %119 : vector<8x256xf32>
    %124 = arith.select %121, %119, %123 : vector<8x256xi1>, vector<8x256xf32>
    %125 = arith.truncf %124 : vector<8x256xf32> to vector<8x256xbf16>
    %c0_91 = arith.constant 0 : index
    %c0_92 = arith.constant 0 : index
    %c0_93 = arith.constant 0 : index
    %126 = vector.load %arg4[%c0_91, %c0_92, %c0_93] : memref<2x8x256xbf16, #tpu.memory_space<vmem>>, vector<1x8x256xbf16>
    %127 = vector.shape_cast %126 : vector<1x8x256xbf16> to vector<8x256xbf16>
    %128 = vector.shape_cast %125 : vector<8x256xbf16> to vector<1x8x256xbf16>
    tpu.vector_store %arg4[%c0_91, %c0_92, %c0_93], %128 {strides = array<i32>} : memref<2x8x256xbf16, #tpu.memory_space<vmem>>, vector<1x8x256xbf16>,
    %129 = vector.extract_strided_slice %118 {offsets = [0, 256], sizes = [8, 256], strides = [1, 1]} : vector<8x512xf32> to vector<8x256xf32>
    %cst_94 = arith.constant 0.000000e+00 : f32
    %130 = vector.broadcast %cst_94 : f32 to vector<8x256xf32>
    %131 = arith.cmpf oge, %129, %130 : vector<8x256xf32>
    %cst_95 = arith.constant 5.000000e-02 : f32
    %132 = vector.broadcast %cst_95 : f32 to vector<8x256xf32>
    %133 = arith.mulf %132, %129 : vector<8x256xf32>
    %134 = arith.select %131, %129, %133 : vector<8x256xi1>, vector<8x256xf32>
    %135 = arith.truncf %134 : vector<8x256xf32> to vector<8x256xbf16>
    %c1_96 = arith.constant 1 : index
    %c0_97 = arith.constant 0 : index
    %c0_98 = arith.constant 0 : index
    %136 = vector.load %arg4[%c1_96, %c0_97, %c0_98] : memref<2x8x256xbf16, #tpu.memory_space<vmem>>, vector<1x8x256xbf16>
    %137 = vector.shape_cast %136 : vector<1x8x256xbf16> to vector<8x256xbf16>
    %138 = vector.shape_cast %135 : vector<8x256xbf16> to vector<1x8x256xbf16>
    tpu.vector_store %arg4[%c1_96, %c0_97, %c0_98], %138 {strides = array<i32>} : memref<2x8x256xbf16, #tpu.memory_space<vmem>>, vector<1x8x256xbf16>,
    return
  }
  func.func @transform_0(%arg0: i32) -> (i32, i32, i32) {
    %c0_i32 = arith.constant 0 : i32
    %c0_i32_0 = arith.constant 0 : i32
    %c0_i32_1 = arith.constant 0 : i32
    %c0_i32_2 = arith.constant 0 : i32
    return %c0_i32, %c0_i32_0, %c0_i32_1 : i32, i32, i32
  }
  func.func @transform_1(%arg0: i32) -> (i32, i32) {
    %c0_i32 = arith.constant 0 : i32
    %c0_i32_0 = arith.constant 0 : i32
    %c0_i32_1 = arith.constant 0 : i32
    return %c0_i32, %c0_i32_0 : i32, i32
  }
  func.func @transform_2(%arg0: i32) -> (i32, i32) {
    %c0_i32 = arith.constant 0 : i32
    %c0_i32_0 = arith.constant 0 : i32
    %c0_i32_1 = arith.constant 0 : i32
    return %c0_i32, %c0_i32_0 : i32, i32
  }
  func.func @transform_3(%arg0: i32) -> (i32, i32, i32) {
    %c0_i32 = arith.constant 0 : i32
    %c0_i32_0 = arith.constant 0 : i32
    %c0_i32_1 = arith.constant 0 : i32
    %c0_i32_2 = arith.constant 0 : i32
    return %c0_i32, %c0_i32_0, %c0_i32_1 : i32, i32, i32
  }
}

module attributes {stable_mosaic.version = 11 : i64} {
  func.func @kernel(%arg0: i32, %arg1: memref<2x8x256xbf16, #tpu.memory_space<vmem>>, %arg2: memref<2x8x256xbf16, #tpu.memory_space<vmem>>, %arg3: memref<2x8x256xbf16, #tpu.memory_space<vmem>>, %arg4: memref<2x8x256xbf16, #tpu.memory_space<vmem>>, %arg5: memref<16x8xbf16, #tpu.memory_space<vmem>>, %arg6: memref<16x8xbf16, #tpu.memory_space<vmem>>, %arg7: memref<16x8xbf16, #tpu.memory_space<vmem>>, %arg8: memref<16x8xbf16, #tpu.memory_space<vmem>>, %arg9: memref<16x1xf32, #tpu.memory_space<vmem>>, %arg10: memref<2x16x256xbf16, #tpu.memory_space<vmem>>) attributes {dimension_semantics = [#tpu.dimension_semantics<arbitrary>], iteration_bounds = array<i64: 1>, scalar_prefetch = 0 : i64, scratch_operands = 0 : i64, tpu.core_type = #tpu.core_type<tc>, window_params = [{pipeline_mode = #tpu.pipeline_mode<synchronous>, transform_indices = @transform_0, window_bounds = array<i64: 2, 8, 256>}, {pipeline_mode = #tpu.pipeline_mode<synchronous>, transform_indices = @transform_1, window_bounds = array<i64: 2, 8, 256>}, {pipeline_mode = #tpu.pipeline_mode<synchronous>, transform_indices = @transform_2, window_bounds = array<i64: 2, 8, 256>}, {pipeline_mode = #tpu.pipeline_mode<synchronous>, transform_indices = @transform_3, window_bounds = array<i64: 2, 8, 256>}, {pipeline_mode = #tpu.pipeline_mode<synchronous>, transform_indices = @transform_4, window_bounds = array<i64: 16, 8>}, {pipeline_mode = #tpu.pipeline_mode<synchronous>, transform_indices = @transform_5, window_bounds = array<i64: 16, 8>}, {pipeline_mode = #tpu.pipeline_mode<synchronous>, transform_indices = @transform_6, window_bounds = array<i64: 16, 8>}, {pipeline_mode = #tpu.pipeline_mode<synchronous>, transform_indices = @transform_7, window_bounds = array<i64: 16, 8>}, {pipeline_mode = #tpu.pipeline_mode<synchronous>, transform_indices = @transform_8, window_bounds = array<i64: 16, 1>}, {pipeline_mode = #tpu.pipeline_mode<synchronous>, transform_indices = @transform_9, window_bounds = array<i64: 2, 16, 256>}]} {
    %c0 = arith.constant 0 : index
    %c0_0 = arith.constant 0 : index
    %0 = vector.load %arg9[%c0, %c0_0] : memref<16x1xf32, #tpu.memory_space<vmem>>, vector<16x1xf32>
    %c0_1 = arith.constant 0 : index
    %c0_2 = arith.constant 0 : index
    %1 = vector.load %arg5[%c0_1, %c0_2] : memref<16x8xbf16, #tpu.memory_space<vmem>>, vector<16x8xbf16>
    %c0_3 = arith.constant 0 : index
    %c0_4 = arith.constant 0 : index
    %c0_5 = arith.constant 0 : index
    %2 = vector.load %arg1[%c0_3, %c0_4, %c0_5] : memref<2x8x256xbf16, #tpu.memory_space<vmem>>, vector<1x8x256xbf16>
    %3 = vector.shape_cast %2 : vector<1x8x256xbf16> to vector<8x256xbf16>
    %cst = arith.constant dense<0.000000e+00> : vector<16x256xf32>
    %4 = tpu.matmul %1, %3, %cst {dimension_numbers = #tpu.dot_dimension_numbers<[1], [0], [0], [1], [0, 0, 1, 1], [], []>} : vector<16x8xbf16>, vector<8x256xbf16>, vector<16x256xf32> -> vector<16x256xf32>
    %5 = vector.broadcast %0 : vector<16x1xf32> to vector<16x256xf32>
    %6 = arith.addf %5, %4 : vector<16x256xf32>
    %c0_6 = arith.constant 0 : index
    %c0_7 = arith.constant 0 : index
    %7 = vector.load %arg6[%c0_6, %c0_7] : memref<16x8xbf16, #tpu.memory_space<vmem>>, vector<16x8xbf16>
    %c0_8 = arith.constant 0 : index
    %c0_9 = arith.constant 0 : index
    %c0_10 = arith.constant 0 : index
    %8 = vector.load %arg2[%c0_8, %c0_9, %c0_10] : memref<2x8x256xbf16, #tpu.memory_space<vmem>>, vector<1x8x256xbf16>
    %9 = vector.shape_cast %8 : vector<1x8x256xbf16> to vector<8x256xbf16>
    %cst_11 = arith.constant dense<0.000000e+00> : vector<16x256xf32>
    %10 = tpu.matmul %7, %9, %cst_11 {dimension_numbers = #tpu.dot_dimension_numbers<[1], [0], [0], [1], [0, 0, 1, 1], [], []>} : vector<16x8xbf16>, vector<8x256xbf16>, vector<16x256xf32> -> vector<16x256xf32>
    %11 = arith.addf %6, %10 : vector<16x256xf32>
    %c0_12 = arith.constant 0 : index
    %c0_13 = arith.constant 0 : index
    %12 = vector.load %arg7[%c0_12, %c0_13] : memref<16x8xbf16, #tpu.memory_space<vmem>>, vector<16x8xbf16>
    %c0_14 = arith.constant 0 : index
    %c0_15 = arith.constant 0 : index
    %c0_16 = arith.constant 0 : index
    %13 = vector.load %arg3[%c0_14, %c0_15, %c0_16] : memref<2x8x256xbf16, #tpu.memory_space<vmem>>, vector<1x8x256xbf16>
    %14 = vector.shape_cast %13 : vector<1x8x256xbf16> to vector<8x256xbf16>
    %cst_17 = arith.constant dense<0.000000e+00> : vector<16x256xf32>
    %15 = tpu.matmul %12, %14, %cst_17 {dimension_numbers = #tpu.dot_dimension_numbers<[1], [0], [0], [1], [0, 0, 1, 1], [], []>} : vector<16x8xbf16>, vector<8x256xbf16>, vector<16x256xf32> -> vector<16x256xf32>
    %16 = arith.addf %11, %15 : vector<16x256xf32>
    %c0_18 = arith.constant 0 : index
    %c0_19 = arith.constant 0 : index
    %17 = vector.load %arg8[%c0_18, %c0_19] : memref<16x8xbf16, #tpu.memory_space<vmem>>, vector<16x8xbf16>
    %c0_20 = arith.constant 0 : index
    %c0_21 = arith.constant 0 : index
    %c0_22 = arith.constant 0 : index
    %18 = vector.load %arg4[%c0_20, %c0_21, %c0_22] : memref<2x8x256xbf16, #tpu.memory_space<vmem>>, vector<1x8x256xbf16>
    %19 = vector.shape_cast %18 : vector<1x8x256xbf16> to vector<8x256xbf16>
    %cst_23 = arith.constant dense<0.000000e+00> : vector<16x256xf32>
    %20 = tpu.matmul %17, %19, %cst_23 {dimension_numbers = #tpu.dot_dimension_numbers<[1], [0], [0], [1], [0, 0, 1, 1], [], []>} : vector<16x8xbf16>, vector<8x256xbf16>, vector<16x256xf32> -> vector<16x256xf32>
    %21 = arith.addf %16, %20 : vector<16x256xf32>
    %22 = arith.truncf %21 : vector<16x256xf32> to vector<16x256xbf16>
    %c0_24 = arith.constant 0 : index
    %c0_25 = arith.constant 0 : index
    %c0_26 = arith.constant 0 : index
    %23 = vector.load %arg10[%c0_24, %c0_25, %c0_26] : memref<2x16x256xbf16, #tpu.memory_space<vmem>>, vector<1x16x256xbf16>
    %24 = vector.shape_cast %23 : vector<1x16x256xbf16> to vector<16x256xbf16>
    %25 = vector.shape_cast %22 : vector<16x256xbf16> to vector<1x16x256xbf16>
    tpu.vector_store %arg10[%c0_24, %c0_25, %c0_26], %25 {strides = array<i32>} : memref<2x16x256xbf16, #tpu.memory_space<vmem>>, vector<1x16x256xbf16>,
    %c0_27 = arith.constant 0 : index
    %c0_28 = arith.constant 0 : index
    %26 = vector.load %arg9[%c0_27, %c0_28] : memref<16x1xf32, #tpu.memory_space<vmem>>, vector<16x1xf32>
    %c0_29 = arith.constant 0 : index
    %c0_30 = arith.constant 0 : index
    %27 = vector.load %arg5[%c0_29, %c0_30] : memref<16x8xbf16, #tpu.memory_space<vmem>>, vector<16x8xbf16>
    %c1 = arith.constant 1 : index
    %c0_31 = arith.constant 0 : index
    %c0_32 = arith.constant 0 : index
    %28 = vector.load %arg1[%c1, %c0_31, %c0_32] : memref<2x8x256xbf16, #tpu.memory_space<vmem>>, vector<1x8x256xbf16>
    %29 = vector.shape_cast %28 : vector<1x8x256xbf16> to vector<8x256xbf16>
    %cst_33 = arith.constant dense<0.000000e+00> : vector<16x256xf32>
    %30 = tpu.matmul %27, %29, %cst_33 {dimension_numbers = #tpu.dot_dimension_numbers<[1], [0], [0], [1], [0, 0, 1, 1], [], []>} : vector<16x8xbf16>, vector<8x256xbf16>, vector<16x256xf32> -> vector<16x256xf32>
    %31 = vector.broadcast %26 : vector<16x1xf32> to vector<16x256xf32>
    %32 = arith.addf %31, %30 : vector<16x256xf32>
    %c0_34 = arith.constant 0 : index
    %c0_35 = arith.constant 0 : index
    %33 = vector.load %arg6[%c0_34, %c0_35] : memref<16x8xbf16, #tpu.memory_space<vmem>>, vector<16x8xbf16>
    %c1_36 = arith.constant 1 : index
    %c0_37 = arith.constant 0 : index
    %c0_38 = arith.constant 0 : index
    %34 = vector.load %arg2[%c1_36, %c0_37, %c0_38] : memref<2x8x256xbf16, #tpu.memory_space<vmem>>, vector<1x8x256xbf16>
    %35 = vector.shape_cast %34 : vector<1x8x256xbf16> to vector<8x256xbf16>
    %cst_39 = arith.constant dense<0.000000e+00> : vector<16x256xf32>
    %36 = tpu.matmul %33, %35, %cst_39 {dimension_numbers = #tpu.dot_dimension_numbers<[1], [0], [0], [1], [0, 0, 1, 1], [], []>} : vector<16x8xbf16>, vector<8x256xbf16>, vector<16x256xf32> -> vector<16x256xf32>
    %37 = arith.addf %32, %36 : vector<16x256xf32>
    %c0_40 = arith.constant 0 : index
    %c0_41 = arith.constant 0 : index
    %38 = vector.load %arg7[%c0_40, %c0_41] : memref<16x8xbf16, #tpu.memory_space<vmem>>, vector<16x8xbf16>
    %c1_42 = arith.constant 1 : index
    %c0_43 = arith.constant 0 : index
    %c0_44 = arith.constant 0 : index
    %39 = vector.load %arg3[%c1_42, %c0_43, %c0_44] : memref<2x8x256xbf16, #tpu.memory_space<vmem>>, vector<1x8x256xbf16>
    %40 = vector.shape_cast %39 : vector<1x8x256xbf16> to vector<8x256xbf16>
    %cst_45 = arith.constant dense<0.000000e+00> : vector<16x256xf32>
    %41 = tpu.matmul %38, %40, %cst_45 {dimension_numbers = #tpu.dot_dimension_numbers<[1], [0], [0], [1], [0, 0, 1, 1], [], []>} : vector<16x8xbf16>, vector<8x256xbf16>, vector<16x256xf32> -> vector<16x256xf32>
    %42 = arith.addf %37, %41 : vector<16x256xf32>
    %c0_46 = arith.constant 0 : index
    %c0_47 = arith.constant 0 : index
    %43 = vector.load %arg8[%c0_46, %c0_47] : memref<16x8xbf16, #tpu.memory_space<vmem>>, vector<16x8xbf16>
    %c1_48 = arith.constant 1 : index
    %c0_49 = arith.constant 0 : index
    %c0_50 = arith.constant 0 : index
    %44 = vector.load %arg4[%c1_48, %c0_49, %c0_50] : memref<2x8x256xbf16, #tpu.memory_space<vmem>>, vector<1x8x256xbf16>
    %45 = vector.shape_cast %44 : vector<1x8x256xbf16> to vector<8x256xbf16>
    %cst_51 = arith.constant dense<0.000000e+00> : vector<16x256xf32>
    %46 = tpu.matmul %43, %45, %cst_51 {dimension_numbers = #tpu.dot_dimension_numbers<[1], [0], [0], [1], [0, 0, 1, 1], [], []>} : vector<16x8xbf16>, vector<8x256xbf16>, vector<16x256xf32> -> vector<16x256xf32>
    %47 = arith.addf %42, %46 : vector<16x256xf32>
    %48 = arith.truncf %47 : vector<16x256xf32> to vector<16x256xbf16>
    %c1_52 = arith.constant 1 : index
    %c0_53 = arith.constant 0 : index
    %c0_54 = arith.constant 0 : index
    %49 = vector.load %arg10[%c1_52, %c0_53, %c0_54] : memref<2x16x256xbf16, #tpu.memory_space<vmem>>, vector<1x16x256xbf16>
    %50 = vector.shape_cast %49 : vector<1x16x256xbf16> to vector<16x256xbf16>
    %51 = vector.shape_cast %48 : vector<16x256xbf16> to vector<1x16x256xbf16>
    tpu.vector_store %arg10[%c1_52, %c0_53, %c0_54], %51 {strides = array<i32>} : memref<2x16x256xbf16, #tpu.memory_space<vmem>>, vector<1x16x256xbf16>,
    return
  }
  func.func @transform_0(%arg0: i32) -> (i32, i32, i32) {
    %c0_i32 = arith.constant 0 : i32
    %c0_i32_0 = arith.constant 0 : i32
    %c0_i32_1 = arith.constant 0 : i32
    %c0_i32_2 = arith.constant 0 : i32
    return %c0_i32, %c0_i32_0, %c0_i32_1 : i32, i32, i32
  }
  func.func @transform_1(%arg0: i32) -> (i32, i32, i32) {
    %c0_i32 = arith.constant 0 : i32
    %c0_i32_0 = arith.constant 0 : i32
    %c0_i32_1 = arith.constant 0 : i32
    %c0_i32_2 = arith.constant 0 : i32
    return %c0_i32, %c0_i32_0, %c0_i32_1 : i32, i32, i32
  }
  func.func @transform_2(%arg0: i32) -> (i32, i32, i32) {
    %c0_i32 = arith.constant 0 : i32
    %c0_i32_0 = arith.constant 0 : i32
    %c0_i32_1 = arith.constant 0 : i32
    %c0_i32_2 = arith.constant 0 : i32
    return %c0_i32, %c0_i32_0, %c0_i32_1 : i32, i32, i32
  }
  func.func @transform_3(%arg0: i32) -> (i32, i32, i32) {
    %c0_i32 = arith.constant 0 : i32
    %c0_i32_0 = arith.constant 0 : i32
    %c0_i32_1 = arith.constant 0 : i32
    %c0_i32_2 = arith.constant 0 : i32
    return %c0_i32, %c0_i32_0, %c0_i32_1 : i32, i32, i32
  }
  func.func @transform_4(%arg0: i32) -> (i32, i32) {
    %c0_i32 = arith.constant 0 : i32
    %c0_i32_0 = arith.constant 0 : i32
    %c0_i32_1 = arith.constant 0 : i32
    return %c0_i32, %c0_i32_0 : i32, i32
  }
  func.func @transform_5(%arg0: i32) -> (i32, i32) {
    %c0_i32 = arith.constant 0 : i32
    %c0_i32_0 = arith.constant 0 : i32
    %c0_i32_1 = arith.constant 0 : i32
    return %c0_i32, %c0_i32_0 : i32, i32
  }
  func.func @transform_6(%arg0: i32) -> (i32, i32) {
    %c0_i32 = arith.constant 0 : i32
    %c0_i32_0 = arith.constant 0 : i32
    %c0_i32_1 = arith.constant 0 : i32
    return %c0_i32, %c0_i32_0 : i32, i32
  }
  func.func @transform_7(%arg0: i32) -> (i32, i32) {
    %c0_i32 = arith.constant 0 : i32
    %c0_i32_0 = arith.constant 0 : i32
    %c0_i32_1 = arith.constant 0 : i32
    return %c0_i32, %c0_i32_0 : i32, i32
  }
  func.func @transform_8(%arg0: i32) -> (i32, i32) {
    %c0_i32 = arith.constant 0 : i32
    %c0_i32_0 = arith.constant 0 : i32
    %c0_i32_1 = arith.constant 0 : i32
    return %c0_i32, %c0_i32_0 : i32, i32
  }
  func.func @transform_9(%arg0: i32) -> (i32, i32, i32) {
    %c0_i32 = arith.constant 0 : i32
    %c0_i32_0 = arith.constant 0 : i32
    %c0_i32_1 = arith.constant 0 : i32
    %c0_i32_2 = arith.constant 0 : i32
    return %c0_i32, %c0_i32_0, %c0_i32_1 : i32, i32, i32
  }
}

module attributes {stable_mosaic.version = 11 : i64} {
  func.func @kernel(%arg0: i32, %arg1: memref<2x4x256xbf16, #tpu.memory_space<vmem>>, %arg2: memref<16x4xbf16, #tpu.memory_space<vmem>>, %arg3: memref<16x1xf32, #tpu.memory_space<vmem>>, %arg4: memref<2x16x256xbf16, #tpu.memory_space<vmem>>, %arg5: memref<2x16x256xbf16, #tpu.memory_space<vmem>>) attributes {dimension_semantics = [#tpu.dimension_semantics<arbitrary>], iteration_bounds = array<i64: 1>, scalar_prefetch = 0 : i64, scratch_operands = 0 : i64, tpu.core_type = #tpu.core_type<tc>, window_params = [{pipeline_mode = #tpu.pipeline_mode<synchronous>, transform_indices = @transform_0, window_bounds = array<i64: 2, 4, 256>}, {pipeline_mode = #tpu.pipeline_mode<synchronous>, transform_indices = @transform_1, window_bounds = array<i64: 16, 4>}, {pipeline_mode = #tpu.pipeline_mode<synchronous>, transform_indices = @transform_2, window_bounds = array<i64: 16, 1>}, {pipeline_mode = #tpu.pipeline_mode<synchronous>, transform_indices = @transform_3, window_bounds = array<i64: 2, 16, 256>}, {pipeline_mode = #tpu.pipeline_mode<synchronous>, transform_indices = @transform_4, window_bounds = array<i64: 2, 16, 256>}]} {
    %c0 = arith.constant 0 : index
    %c0_0 = arith.constant 0 : index
    %0 = vector.load %arg2[%c0, %c0_0] : memref<16x4xbf16, #tpu.memory_space<vmem>>, vector<16x4xbf16>
    %c0_1 = arith.constant 0 : index
    %c0_2 = arith.constant 0 : index
    %c0_3 = arith.constant 0 : index
    %1 = vector.load %arg1[%c0_1, %c0_2, %c0_3] : memref<2x4x256xbf16, #tpu.memory_space<vmem>>, vector<1x4x256xbf16>
    %2 = vector.shape_cast %1 : vector<1x4x256xbf16> to vector<4x256xbf16>
    %cst = arith.constant dense<0.000000e+00> : vector<16x256xf32>
    %3 = tpu.matmul %0, %2, %cst {dimension_numbers = #tpu.dot_dimension_numbers<[1], [0], [0], [1], [0, 0, 1, 1], [], []>} : vector<16x4xbf16>, vector<4x256xbf16>, vector<16x256xf32> -> vector<16x256xf32>
    %c0_4 = arith.constant 0 : index
    %c0_5 = arith.constant 0 : index
    %4 = vector.load %arg3[%c0_4, %c0_5] : memref<16x1xf32, #tpu.memory_space<vmem>>, vector<16x1xf32>
    %5 = vector.broadcast %4 : vector<16x1xf32> to vector<16x256xf32>
    %6 = arith.addf %3, %5 : vector<16x256xf32>
    %c0_6 = arith.constant 0 : index
    %c0_7 = arith.constant 0 : index
    %c0_8 = arith.constant 0 : index
    %7 = vector.load %arg4[%c0_6, %c0_7, %c0_8] : memref<2x16x256xbf16, #tpu.memory_space<vmem>>, vector<1x16x256xbf16>
    %8 = vector.shape_cast %7 : vector<1x16x256xbf16> to vector<16x256xbf16>
    %9 = arith.extf %8 : vector<16x256xbf16> to vector<16x256xf32>
    %10 = arith.negf %6 : vector<16x256xf32>
    %11 = math.exp %10 : vector<16x256xf32>
    %cst_9 = arith.constant 1.000000e+00 : f32
    %12 = vector.broadcast %cst_9 : f32 to vector<16x256xf32>
    %13 = arith.addf %12, %11 : vector<16x256xf32>
    %14 = arith.divf %12, %13 : vector<16x256xf32>
    %15 = arith.mulf %9, %14 : vector<16x256xf32>
    %16 = arith.truncf %15 : vector<16x256xf32> to vector<16x256xbf16>
    %c0_10 = arith.constant 0 : index
    %c0_11 = arith.constant 0 : index
    %c0_12 = arith.constant 0 : index
    %17 = vector.load %arg5[%c0_10, %c0_11, %c0_12] : memref<2x16x256xbf16, #tpu.memory_space<vmem>>, vector<1x16x256xbf16>
    %18 = vector.shape_cast %17 : vector<1x16x256xbf16> to vector<16x256xbf16>
    %19 = vector.shape_cast %16 : vector<16x256xbf16> to vector<1x16x256xbf16>
    tpu.vector_store %arg5[%c0_10, %c0_11, %c0_12], %19 {strides = array<i32>} : memref<2x16x256xbf16, #tpu.memory_space<vmem>>, vector<1x16x256xbf16>,
    %c0_13 = arith.constant 0 : index
    %c0_14 = arith.constant 0 : index
    %20 = vector.load %arg2[%c0_13, %c0_14] : memref<16x4xbf16, #tpu.memory_space<vmem>>, vector<16x4xbf16>
    %c1 = arith.constant 1 : index
    %c0_15 = arith.constant 0 : index
    %c0_16 = arith.constant 0 : index
    %21 = vector.load %arg1[%c1, %c0_15, %c0_16] : memref<2x4x256xbf16, #tpu.memory_space<vmem>>, vector<1x4x256xbf16>
    %22 = vector.shape_cast %21 : vector<1x4x256xbf16> to vector<4x256xbf16>
    %cst_17 = arith.constant dense<0.000000e+00> : vector<16x256xf32>
    %23 = tpu.matmul %20, %22, %cst_17 {dimension_numbers = #tpu.dot_dimension_numbers<[1], [0], [0], [1], [0, 0, 1, 1], [], []>} : vector<16x4xbf16>, vector<4x256xbf16>, vector<16x256xf32> -> vector<16x256xf32>
    %c0_18 = arith.constant 0 : index
    %c0_19 = arith.constant 0 : index
    %24 = vector.load %arg3[%c0_18, %c0_19] : memref<16x1xf32, #tpu.memory_space<vmem>>, vector<16x1xf32>
    %25 = vector.broadcast %24 : vector<16x1xf32> to vector<16x256xf32>
    %26 = arith.addf %23, %25 : vector<16x256xf32>
    %c1_20 = arith.constant 1 : index
    %c0_21 = arith.constant 0 : index
    %c0_22 = arith.constant 0 : index
    %27 = vector.load %arg4[%c1_20, %c0_21, %c0_22] : memref<2x16x256xbf16, #tpu.memory_space<vmem>>, vector<1x16x256xbf16>
    %28 = vector.shape_cast %27 : vector<1x16x256xbf16> to vector<16x256xbf16>
    %29 = arith.extf %28 : vector<16x256xbf16> to vector<16x256xf32>
    %30 = arith.negf %26 : vector<16x256xf32>
    %31 = math.exp %30 : vector<16x256xf32>
    %cst_23 = arith.constant 1.000000e+00 : f32
    %32 = vector.broadcast %cst_23 : f32 to vector<16x256xf32>
    %33 = arith.addf %32, %31 : vector<16x256xf32>
    %34 = arith.divf %32, %33 : vector<16x256xf32>
    %35 = arith.mulf %29, %34 : vector<16x256xf32>
    %36 = arith.truncf %35 : vector<16x256xf32> to vector<16x256xbf16>
    %c1_24 = arith.constant 1 : index
    %c0_25 = arith.constant 0 : index
    %c0_26 = arith.constant 0 : index
    %37 = vector.load %arg5[%c1_24, %c0_25, %c0_26] : memref<2x16x256xbf16, #tpu.memory_space<vmem>>, vector<1x16x256xbf16>
    %38 = vector.shape_cast %37 : vector<1x16x256xbf16> to vector<16x256xbf16>
    %39 = vector.shape_cast %36 : vector<16x256xbf16> to vector<1x16x256xbf16>
    tpu.vector_store %arg5[%c1_24, %c0_25, %c0_26], %39 {strides = array<i32>} : memref<2x16x256xbf16, #tpu.memory_space<vmem>>, vector<1x16x256xbf16>,
    return
  }
  func.func @transform_0(%arg0: i32) -> (i32, i32, i32) {
    %c0_i32 = arith.constant 0 : i32
    %c0_i32_0 = arith.constant 0 : i32
    %c0_i32_1 = arith.constant 0 : i32
    %c0_i32_2 = arith.constant 0 : i32
    return %c0_i32, %c0_i32_0, %c0_i32_1 : i32, i32, i32
  }
  func.func @transform_1(%arg0: i32) -> (i32, i32) {
    %c0_i32 = arith.constant 0 : i32
    %c0_i32_0 = arith.constant 0 : i32
    %c0_i32_1 = arith.constant 0 : i32
    return %c0_i32, %c0_i32_0 : i32, i32
  }
  func.func @transform_2(%arg0: i32) -> (i32, i32) {
    %c0_i32 = arith.constant 0 : i32
    %c0_i32_0 = arith.constant 0 : i32
    %c0_i32_1 = arith.constant 0 : i32
    return %c0_i32, %c0_i32_0 : i32, i32
  }
  func.func @transform_3(%arg0: i32) -> (i32, i32, i32) {
    %c0_i32 = arith.constant 0 : i32
    %c0_i32_0 = arith.constant 0 : i32
    %c0_i32_1 = arith.constant 0 : i32
    %c0_i32_2 = arith.constant 0 : i32
    return %c0_i32, %c0_i32_0, %c0_i32_1 : i32, i32, i32
  }
  func.func @transform_4(%arg0: i32) -> (i32, i32, i32) {
    %c0_i32 = arith.constant 0 : i32
    %c0_i32_0 = arith.constant 0 : i32
    %c0_i32_1 = arith.constant 0 : i32
    %c0_i32_2 = arith.constant 0 : i32
    return %c0_i32, %c0_i32_0, %c0_i32_1 : i32, i32, i32
  }
}

module attributes {stable_mosaic.version = 11 : i64} {
  func.func @kernel(%arg0: i32, %arg1: memref<2x16x256xbf16, #tpu.memory_space<vmem>>, %arg2: memref<16x144xbf16, #tpu.memory_space<vmem>>, %arg3: memref<16x1xf32, #tpu.memory_space<vmem>>, %arg4: memref<2x16x256xbf16, #tpu.memory_space<vmem>>, %arg5: memref<2x16x256xbf16, #tpu.memory_space<vmem>>, %arg6: memref<16x401xbf16, #tpu.memory_space<vmem>>, %arg7: memref<144x512xbf16, #tpu.memory_space<vmem>>) attributes {dimension_semantics = [#tpu.dimension_semantics<arbitrary>], iteration_bounds = array<i64: 1>, scalar_prefetch = 0 : i64, scratch_operands = 2 : i64, tpu.core_type = #tpu.core_type<tc>, window_params = [{pipeline_mode = #tpu.pipeline_mode<synchronous>, transform_indices = @transform_0, window_bounds = array<i64: 2, 16, 256>}, {pipeline_mode = #tpu.pipeline_mode<synchronous>, transform_indices = @transform_1, window_bounds = array<i64: 16, 144>}, {pipeline_mode = #tpu.pipeline_mode<synchronous>, transform_indices = @transform_2, window_bounds = array<i64: 16, 1>}, {pipeline_mode = #tpu.pipeline_mode<synchronous>, transform_indices = @transform_3, window_bounds = array<i64: 2, 16, 256>}, {pipeline_mode = #tpu.pipeline_mode<synchronous>, transform_indices = @transform_4, window_bounds = array<i64: 2, 16, 256>}]} {
    %0 = tpu.iota {dimensions = array<i32: 1>} : vector<1x256xi32>
    %c16_i32 = arith.constant 16 : i32
    %c0_i32 = arith.constant 0 : i32
    %1 = arith.cmpi eq, %c16_i32, %c0_i32 : i32
    %c1_i32 = arith.constant 1 : i32
    %2 = arith.select %1, %c1_i32, %c16_i32 : i32
    %3 = vector.broadcast %2 : i32 to vector<1x256xi32>
    %4 = arith.remsi %0, %3 : vector<1x256xi32>
    %c0_i32_0 = arith.constant 0 : i32
    %5 = vector.broadcast %c0_i32_0 : i32 to vector<1x256xi32>
    %6 = arith.cmpi ne, %4, %5 : vector<1x256xi32>
    %c0_i32_1 = arith.constant 0 : i32
    %7 = vector.broadcast %c0_i32_1 : i32 to vector<1x256xi32>
    %8 = arith.cmpi slt, %4, %7 : vector<1x256xi32>
    %c0_i32_2 = arith.constant 0 : i32
    %9 = arith.cmpi slt, %2, %c0_i32_2 : i32
    %10 = vector.broadcast %9 : i1 to vector<1x256xi1>
    %11 = vector.broadcast %10 : vector<1x256xi1> to vector<1x256xi1>
    %12 = arith.xori %8, %11 : vector<1x256xi1>
    %13 = arith.andi %12, %6 : vector<1x256xi1>
    %14 = vector.broadcast %2 : i32 to vector<1x256xi32>
    %15 = arith.addi %4, %14 : vector<1x256xi32>
    %16 = arith.select %13, %15, %4 : vector<1x256xi1>, vector<1x256xi32>
    %c0_i32_3 = arith.constant 0 : i32
    %17 = vector.broadcast %c0_i32_3 : i32 to vector<1x256xi32>
    %18 = arith.cmpi ne, %16, %17 : vector<1x256xi32>
    %c15_i32 = arith.constant 15 : i32
    %19 = vector.broadcast %c15_i32 : i32 to vector<1x256xi32>
    %20 = arith.cmpi ne, %16, %19 : vector<1x256xi32>
    %cst = arith.constant 0.000000e+00 : bf16
    %21 = vector.broadcast %cst : bf16 to vector<16x401xbf16>
    %c0 = arith.constant 0 : index
    %c0_4 = arith.constant 0 : index
    %22 = vector.load %arg6[%c0, %c0_4] : memref<16x401xbf16, #tpu.memory_space<vmem>>, vector<16x401xbf16>
    tpu.vector_store %arg6[%c0, %c0_4], %21 {strides = array<i32>} : memref<16x401xbf16, #tpu.memory_space<vmem>>, vector<16x401xbf16>,
    %c0_5 = arith.constant 0 : index
    %c0_6 = arith.constant 0 : index
    %c0_7 = arith.constant 0 : index
    %23 = vector.load %arg1[%c0_5, %c0_6, %c0_7] : memref<2x16x256xbf16, #tpu.memory_space<vmem>>, vector<1x16x256xbf16>
    %24 = vector.shape_cast %23 : vector<1x16x256xbf16> to vector<16x256xbf16>
    %c0_8 = arith.constant 0 : index
    %c128 = arith.constant 128 : index
    %25 = vector.load %arg6[%c0_8, %c128] : memref<16x401xbf16, #tpu.memory_space<vmem>>, vector<16x256xbf16>
    tpu.vector_store %arg6[%c0_8, %c128], %24 {strides = array<i32>} : memref<16x401xbf16, #tpu.memory_space<vmem>>, vector<16x256xbf16>,
    %c0_9 = arith.constant 0 : index
    %c111 = arith.constant 111 : index
    %26 = vector.load %arg6[%c0_9, %c111] : memref<16x401xbf16, #tpu.memory_space<vmem>>, vector<16x256xbf16>
    %cst_10 = arith.constant 0.000000e+00 : bf16
    %27 = vector.shape_cast %18 : vector<1x256xi1> to vector<1x256xi1>
    %28 = vector.broadcast %27 : vector<1x256xi1> to vector<16x256xi1>
    %29 = vector.broadcast %cst_10 : bf16 to vector<16x256xbf16>
    %30 = arith.select %28, %26, %29 : vector<16x256xi1>, vector<16x256xbf16>
    %c0_11 = arith.constant 0 : index
    %c0_12 = arith.constant 0 : index
    %31 = vector.load %arg7[%c0_11, %c0_12] : memref<144x512xbf16, #tpu.memory_space<vmem>>, vector<16x256xbf16>
    tpu.vector_store %arg7[%c0_11, %c0_12], %30 {strides = array<i32>} : memref<144x512xbf16, #tpu.memory_space<vmem>>, vector<16x256xbf16>,
    %c0_13 = arith.constant 0 : index
    %c112 = arith.constant 112 : index
    %32 = vector.load %arg6[%c0_13, %c112] : memref<16x401xbf16, #tpu.memory_space<vmem>>, vector<16x256xbf16>
    %c16 = arith.constant 16 : index
    %c0_14 = arith.constant 0 : index
    %33 = vector.load %arg7[%c16, %c0_14] : memref<144x512xbf16, #tpu.memory_space<vmem>>, vector<16x256xbf16>
    tpu.vector_store %arg7[%c16, %c0_14], %32 {strides = array<i32>} : memref<144x512xbf16, #tpu.memory_space<vmem>>, vector<16x256xbf16>,
    %c0_15 = arith.constant 0 : index
    %c113 = arith.constant 113 : index
    %34 = vector.load %arg6[%c0_15, %c113] : memref<16x401xbf16, #tpu.memory_space<vmem>>, vector<16x256xbf16>
    %cst_16 = arith.constant 0.000000e+00 : bf16
    %35 = vector.shape_cast %20 : vector<1x256xi1> to vector<1x256xi1>
    %36 = vector.broadcast %35 : vector<1x256xi1> to vector<16x256xi1>
    %37 = vector.broadcast %cst_16 : bf16 to vector<16x256xbf16>
    %38 = arith.select %36, %34, %37 : vector<16x256xi1>, vector<16x256xbf16>
    %c32 = arith.constant 32 : index
    %c0_17 = arith.constant 0 : index
    %39 = vector.load %arg7[%c32, %c0_17] : memref<144x512xbf16, #tpu.memory_space<vmem>>, vector<16x256xbf16>
    tpu.vector_store %arg7[%c32, %c0_17], %38 {strides = array<i32>} : memref<144x512xbf16, #tpu.memory_space<vmem>>, vector<16x256xbf16>,
    %c0_18 = arith.constant 0 : index
    %c127 = arith.constant 127 : index
    %40 = vector.load %arg6[%c0_18, %c127] : memref<16x401xbf16, #tpu.memory_space<vmem>>, vector<16x256xbf16>
    %cst_19 = arith.constant 0.000000e+00 : bf16
    %41 = vector.shape_cast %18 : vector<1x256xi1> to vector<1x256xi1>
    %42 = vector.broadcast %41 : vector<1x256xi1> to vector<16x256xi1>
    %43 = vector.broadcast %cst_19 : bf16 to vector<16x256xbf16>
    %44 = arith.select %42, %40, %43 : vector<16x256xi1>, vector<16x256xbf16>
    %c48 = arith.constant 48 : index
    %c0_20 = arith.constant 0 : index
    %45 = vector.load %arg7[%c48, %c0_20] : memref<144x512xbf16, #tpu.memory_space<vmem>>, vector<16x256xbf16>
    tpu.vector_store %arg7[%c48, %c0_20], %44 {strides = array<i32>} : memref<144x512xbf16, #tpu.memory_space<vmem>>, vector<16x256xbf16>,
    %c0_21 = arith.constant 0 : index
    %c128_22 = arith.constant 128 : index
    %46 = vector.load %arg6[%c0_21, %c128_22] : memref<16x401xbf16, #tpu.memory_space<vmem>>, vector<16x256xbf16>
    %c64 = arith.constant 64 : index
    %c0_23 = arith.constant 0 : index
    %47 = vector.load %arg7[%c64, %c0_23] : memref<144x512xbf16, #tpu.memory_space<vmem>>, vector<16x256xbf16>
    tpu.vector_store %arg7[%c64, %c0_23], %46 {strides = array<i32>} : memref<144x512xbf16, #tpu.memory_space<vmem>>, vector<16x256xbf16>,
    %c0_24 = arith.constant 0 : index
    %c129 = arith.constant 129 : index
    %48 = vector.load %arg6[%c0_24, %c129] : memref<16x401xbf16, #tpu.memory_space<vmem>>, vector<16x256xbf16>
    %cst_25 = arith.constant 0.000000e+00 : bf16
    %49 = vector.shape_cast %20 : vector<1x256xi1> to vector<1x256xi1>
    %50 = vector.broadcast %49 : vector<1x256xi1> to vector<16x256xi1>
    %51 = vector.broadcast %cst_25 : bf16 to vector<16x256xbf16>
    %52 = arith.select %50, %48, %51 : vector<16x256xi1>, vector<16x256xbf16>
    %c80 = arith.constant 80 : index
    %c0_26 = arith.constant 0 : index
    %53 = vector.load %arg7[%c80, %c0_26] : memref<144x512xbf16, #tpu.memory_space<vmem>>, vector<16x256xbf16>
    tpu.vector_store %arg7[%c80, %c0_26], %52 {strides = array<i32>} : memref<144x512xbf16, #tpu.memory_space<vmem>>, vector<16x256xbf16>,
    %c0_27 = arith.constant 0 : index
    %c143 = arith.constant 143 : index
    %54 = vector.load %arg6[%c0_27, %c143] : memref<16x401xbf16, #tpu.memory_space<vmem>>, vector<16x256xbf16>
    %cst_28 = arith.constant 0.000000e+00 : bf16
    %55 = vector.shape_cast %18 : vector<1x256xi1> to vector<1x256xi1>
    %56 = vector.broadcast %55 : vector<1x256xi1> to vector<16x256xi1>
    %57 = vector.broadcast %cst_28 : bf16 to vector<16x256xbf16>
    %58 = arith.select %56, %54, %57 : vector<16x256xi1>, vector<16x256xbf16>
    %c96 = arith.constant 96 : index
    %c0_29 = arith.constant 0 : index
    %59 = vector.load %arg7[%c96, %c0_29] : memref<144x512xbf16, #tpu.memory_space<vmem>>, vector<16x256xbf16>
    tpu.vector_store %arg7[%c96, %c0_29], %58 {strides = array<i32>} : memref<144x512xbf16, #tpu.memory_space<vmem>>, vector<16x256xbf16>,
    %c0_30 = arith.constant 0 : index
    %c144 = arith.constant 144 : index
    %60 = vector.load %arg6[%c0_30, %c144] : memref<16x401xbf16, #tpu.memory_space<vmem>>, vector<16x256xbf16>
    %c112_31 = arith.constant 112 : index
    %c0_32 = arith.constant 0 : index
    %61 = vector.load %arg7[%c112_31, %c0_32] : memref<144x512xbf16, #tpu.memory_space<vmem>>, vector<16x256xbf16>
    tpu.vector_store %arg7[%c112_31, %c0_32], %60 {strides = array<i32>} : memref<144x512xbf16, #tpu.memory_space<vmem>>, vector<16x256xbf16>,
    %c0_33 = arith.constant 0 : index
    %c145 = arith.constant 145 : index
    %62 = vector.load %arg6[%c0_33, %c145] : memref<16x401xbf16, #tpu.memory_space<vmem>>, vector<16x256xbf16>
    %cst_34 = arith.constant 0.000000e+00 : bf16
    %63 = vector.shape_cast %20 : vector<1x256xi1> to vector<1x256xi1>
    %64 = vector.broadcast %63 : vector<1x256xi1> to vector<16x256xi1>
    %65 = vector.broadcast %cst_34 : bf16 to vector<16x256xbf16>
    %66 = arith.select %64, %62, %65 : vector<16x256xi1>, vector<16x256xbf16>
    %c128_35 = arith.constant 128 : index
    %c0_36 = arith.constant 0 : index
    %67 = vector.load %arg7[%c128_35, %c0_36] : memref<144x512xbf16, #tpu.memory_space<vmem>>, vector<16x256xbf16>
    tpu.vector_store %arg7[%c128_35, %c0_36], %66 {strides = array<i32>} : memref<144x512xbf16, #tpu.memory_space<vmem>>, vector<16x256xbf16>,
    %c1 = arith.constant 1 : index
    %c0_37 = arith.constant 0 : index
    %c0_38 = arith.constant 0 : index
    %68 = vector.load %arg1[%c1, %c0_37, %c0_38] : memref<2x16x256xbf16, #tpu.memory_space<vmem>>, vector<1x16x256xbf16>
    %69 = vector.shape_cast %68 : vector<1x16x256xbf16> to vector<16x256xbf16>
    %c0_39 = arith.constant 0 : index
    %c128_40 = arith.constant 128 : index
    %70 = vector.load %arg6[%c0_39, %c128_40] : memref<16x401xbf16, #tpu.memory_space<vmem>>, vector<16x256xbf16>
    tpu.vector_store %arg6[%c0_39, %c128_40], %69 {strides = array<i32>} : memref<16x401xbf16, #tpu.memory_space<vmem>>, vector<16x256xbf16>,
    %c0_41 = arith.constant 0 : index
    %c111_42 = arith.constant 111 : index
    %71 = vector.load %arg6[%c0_41, %c111_42] : memref<16x401xbf16, #tpu.memory_space<vmem>>, vector<16x256xbf16>
    %cst_43 = arith.constant 0.000000e+00 : bf16
    %72 = vector.shape_cast %18 : vector<1x256xi1> to vector<1x256xi1>
    %73 = vector.broadcast %72 : vector<1x256xi1> to vector<16x256xi1>
    %74 = vector.broadcast %cst_43 : bf16 to vector<16x256xbf16>
    %75 = arith.select %73, %71, %74 : vector<16x256xi1>, vector<16x256xbf16>
    %c0_44 = arith.constant 0 : index
    %c256 = arith.constant 256 : index
    %76 = vector.load %arg7[%c0_44, %c256] : memref<144x512xbf16, #tpu.memory_space<vmem>>, vector<16x256xbf16>
    tpu.vector_store %arg7[%c0_44, %c256], %75 {strides = array<i32>} : memref<144x512xbf16, #tpu.memory_space<vmem>>, vector<16x256xbf16>,
    %c0_45 = arith.constant 0 : index
    %c112_46 = arith.constant 112 : index
    %77 = vector.load %arg6[%c0_45, %c112_46] : memref<16x401xbf16, #tpu.memory_space<vmem>>, vector<16x256xbf16>
    %c16_47 = arith.constant 16 : index
    %c256_48 = arith.constant 256 : index
    %78 = vector.load %arg7[%c16_47, %c256_48] : memref<144x512xbf16, #tpu.memory_space<vmem>>, vector<16x256xbf16>
    tpu.vector_store %arg7[%c16_47, %c256_48], %77 {strides = array<i32>} : memref<144x512xbf16, #tpu.memory_space<vmem>>, vector<16x256xbf16>,
    %c0_49 = arith.constant 0 : index
    %c113_50 = arith.constant 113 : index
    %79 = vector.load %arg6[%c0_49, %c113_50] : memref<16x401xbf16, #tpu.memory_space<vmem>>, vector<16x256xbf16>
    %cst_51 = arith.constant 0.000000e+00 : bf16
    %80 = vector.shape_cast %20 : vector<1x256xi1> to vector<1x256xi1>
    %81 = vector.broadcast %80 : vector<1x256xi1> to vector<16x256xi1>
    %82 = vector.broadcast %cst_51 : bf16 to vector<16x256xbf16>
    %83 = arith.select %81, %79, %82 : vector<16x256xi1>, vector<16x256xbf16>
    %c32_52 = arith.constant 32 : index
    %c256_53 = arith.constant 256 : index
    %84 = vector.load %arg7[%c32_52, %c256_53] : memref<144x512xbf16, #tpu.memory_space<vmem>>, vector<16x256xbf16>
    tpu.vector_store %arg7[%c32_52, %c256_53], %83 {strides = array<i32>} : memref<144x512xbf16, #tpu.memory_space<vmem>>, vector<16x256xbf16>,
    %c0_54 = arith.constant 0 : index
    %c127_55 = arith.constant 127 : index
    %85 = vector.load %arg6[%c0_54, %c127_55] : memref<16x401xbf16, #tpu.memory_space<vmem>>, vector<16x256xbf16>
    %cst_56 = arith.constant 0.000000e+00 : bf16
    %86 = vector.shape_cast %18 : vector<1x256xi1> to vector<1x256xi1>
    %87 = vector.broadcast %86 : vector<1x256xi1> to vector<16x256xi1>
    %88 = vector.broadcast %cst_56 : bf16 to vector<16x256xbf16>
    %89 = arith.select %87, %85, %88 : vector<16x256xi1>, vector<16x256xbf16>
    %c48_57 = arith.constant 48 : index
    %c256_58 = arith.constant 256 : index
    %90 = vector.load %arg7[%c48_57, %c256_58] : memref<144x512xbf16, #tpu.memory_space<vmem>>, vector<16x256xbf16>
    tpu.vector_store %arg7[%c48_57, %c256_58], %89 {strides = array<i32>} : memref<144x512xbf16, #tpu.memory_space<vmem>>, vector<16x256xbf16>,
    %c0_59 = arith.constant 0 : index
    %c128_60 = arith.constant 128 : index
    %91 = vector.load %arg6[%c0_59, %c128_60] : memref<16x401xbf16, #tpu.memory_space<vmem>>, vector<16x256xbf16>
    %c64_61 = arith.constant 64 : index
    %c256_62 = arith.constant 256 : index
    %92 = vector.load %arg7[%c64_61, %c256_62] : memref<144x512xbf16, #tpu.memory_space<vmem>>, vector<16x256xbf16>
    tpu.vector_store %arg7[%c64_61, %c256_62], %91 {strides = array<i32>} : memref<144x512xbf16, #tpu.memory_space<vmem>>, vector<16x256xbf16>,
    %c0_63 = arith.constant 0 : index
    %c129_64 = arith.constant 129 : index
    %93 = vector.load %arg6[%c0_63, %c129_64] : memref<16x401xbf16, #tpu.memory_space<vmem>>, vector<16x256xbf16>
    %cst_65 = arith.constant 0.000000e+00 : bf16
    %94 = vector.shape_cast %20 : vector<1x256xi1> to vector<1x256xi1>
    %95 = vector.broadcast %94 : vector<1x256xi1> to vector<16x256xi1>
    %96 = vector.broadcast %cst_65 : bf16 to vector<16x256xbf16>
    %97 = arith.select %95, %93, %96 : vector<16x256xi1>, vector<16x256xbf16>
    %c80_66 = arith.constant 80 : index
    %c256_67 = arith.constant 256 : index
    %98 = vector.load %arg7[%c80_66, %c256_67] : memref<144x512xbf16, #tpu.memory_space<vmem>>, vector<16x256xbf16>
    tpu.vector_store %arg7[%c80_66, %c256_67], %97 {strides = array<i32>} : memref<144x512xbf16, #tpu.memory_space<vmem>>, vector<16x256xbf16>,
    %c0_68 = arith.constant 0 : index
    %c143_69 = arith.constant 143 : index
    %99 = vector.load %arg6[%c0_68, %c143_69] : memref<16x401xbf16, #tpu.memory_space<vmem>>, vector<16x256xbf16>
    %cst_70 = arith.constant 0.000000e+00 : bf16
    %100 = vector.shape_cast %18 : vector<1x256xi1> to vector<1x256xi1>
    %101 = vector.broadcast %100 : vector<1x256xi1> to vector<16x256xi1>
    %102 = vector.broadcast %cst_70 : bf16 to vector<16x256xbf16>
    %103 = arith.select %101, %99, %102 : vector<16x256xi1>, vector<16x256xbf16>
    %c96_71 = arith.constant 96 : index
    %c256_72 = arith.constant 256 : index
    %104 = vector.load %arg7[%c96_71, %c256_72] : memref<144x512xbf16, #tpu.memory_space<vmem>>, vector<16x256xbf16>
    tpu.vector_store %arg7[%c96_71, %c256_72], %103 {strides = array<i32>} : memref<144x512xbf16, #tpu.memory_space<vmem>>, vector<16x256xbf16>,
    %c0_73 = arith.constant 0 : index
    %c144_74 = arith.constant 144 : index
    %105 = vector.load %arg6[%c0_73, %c144_74] : memref<16x401xbf16, #tpu.memory_space<vmem>>, vector<16x256xbf16>
    %c112_75 = arith.constant 112 : index
    %c256_76 = arith.constant 256 : index
    %106 = vector.load %arg7[%c112_75, %c256_76] : memref<144x512xbf16, #tpu.memory_space<vmem>>, vector<16x256xbf16>
    tpu.vector_store %arg7[%c112_75, %c256_76], %105 {strides = array<i32>} : memref<144x512xbf16, #tpu.memory_space<vmem>>, vector<16x256xbf16>,
    %c0_77 = arith.constant 0 : index
    %c145_78 = arith.constant 145 : index
    %107 = vector.load %arg6[%c0_77, %c145_78] : memref<16x401xbf16, #tpu.memory_space<vmem>>, vector<16x256xbf16>
    %cst_79 = arith.constant 0.000000e+00 : bf16
    %108 = vector.shape_cast %20 : vector<1x256xi1> to vector<1x256xi1>
    %109 = vector.broadcast %108 : vector<1x256xi1> to vector<16x256xi1>
    %110 = vector.broadcast %cst_79 : bf16 to vector<16x256xbf16>
    %111 = arith.select %109, %107, %110 : vector<16x256xi1>, vector<16x256xbf16>
    %c128_80 = arith.constant 128 : index
    %c256_81 = arith.constant 256 : index
    %112 = vector.load %arg7[%c128_80, %c256_81] : memref<144x512xbf16, #tpu.memory_space<vmem>>, vector<16x256xbf16>
    tpu.vector_store %arg7[%c128_80, %c256_81], %111 {strides = array<i32>} : memref<144x512xbf16, #tpu.memory_space<vmem>>, vector<16x256xbf16>,
    %c0_82 = arith.constant 0 : index
    %c0_83 = arith.constant 0 : index
    %113 = vector.load %arg2[%c0_82, %c0_83] : memref<16x144xbf16, #tpu.memory_space<vmem>>, vector<16x144xbf16>
    %c0_84 = arith.constant 0 : index
    %c0_85 = arith.constant 0 : index
    %114 = vector.load %arg7[%c0_84, %c0_85] : memref<144x512xbf16, #tpu.memory_space<vmem>>, vector<144x512xbf16>
    %cst_86 = arith.constant dense<0.000000e+00> : vector<16x512xf32>
    %115 = tpu.matmul %113, %114, %cst_86 {dimension_numbers = #tpu.dot_dimension_numbers<[1], [0], [0], [1], [0, 0, 1, 1], [], []>} : vector<16x144xbf16>, vector<144x512xbf16>, vector<16x512xf32> -> vector<16x512xf32>
    %c0_87 = arith.constant 0 : index
    %c0_88 = arith.constant 0 : index
    %116 = vector.load %arg3[%c0_87, %c0_88] : memref<16x1xf32, #tpu.memory_space<vmem>>, vector<16x1xf32>
    %117 = vector.broadcast %116 : vector<16x1xf32> to vector<16x512xf32>
    %118 = arith.addf %115, %117 : vector<16x512xf32>
    %119 = vector.extract_strided_slice %118 {offsets = [0, 0], sizes = [16, 256], strides = [1, 1]} : vector<16x512xf32> to vector<16x256xf32>
    %c0_89 = arith.constant 0 : index
    %c0_90 = arith.constant 0 : index
    %c0_91 = arith.constant 0 : index
    %120 = vector.load %arg4[%c0_89, %c0_90, %c0_91] : memref<2x16x256xbf16, #tpu.memory_space<vmem>>, vector<1x16x256xbf16>
    %121 = vector.shape_cast %120 : vector<1x16x256xbf16> to vector<16x256xbf16>
    %122 = arith.extf %121 : vector<16x256xbf16> to vector<16x256xf32>
    %123 = arith.addf %119, %122 : vector<16x256xf32>
    %124 = arith.truncf %123 : vector<16x256xf32> to vector<16x256xbf16>
    %c0_92 = arith.constant 0 : index
    %c0_93 = arith.constant 0 : index
    %c0_94 = arith.constant 0 : index
    %125 = vector.load %arg5[%c0_92, %c0_93, %c0_94] : memref<2x16x256xbf16, #tpu.memory_space<vmem>>, vector<1x16x256xbf16>
    %126 = vector.shape_cast %125 : vector<1x16x256xbf16> to vector<16x256xbf16>
    %127 = vector.shape_cast %124 : vector<16x256xbf16> to vector<1x16x256xbf16>
    tpu.vector_store %arg5[%c0_92, %c0_93, %c0_94], %127 {strides = array<i32>} : memref<2x16x256xbf16, #tpu.memory_space<vmem>>, vector<1x16x256xbf16>,
    %128 = vector.extract_strided_slice %118 {offsets = [0, 256], sizes = [16, 256], strides = [1, 1]} : vector<16x512xf32> to vector<16x256xf32>
    %c1_95 = arith.constant 1 : index
    %c0_96 = arith.constant 0 : index
    %c0_97 = arith.constant 0 : index
    %129 = vector.load %arg4[%c1_95, %c0_96, %c0_97] : memref<2x16x256xbf16, #tpu.memory_space<vmem>>, vector<1x16x256xbf16>
    %130 = vector.shape_cast %129 : vector<1x16x256xbf16> to vector<16x256xbf16>
    %131 = arith.extf %130 : vector<16x256xbf16> to vector<16x256xf32>
    %132 = arith.addf %128, %131 : vector<16x256xf32>
    %133 = arith.truncf %132 : vector<16x256xf32> to vector<16x256xbf16>
    %c1_98 = arith.constant 1 : index
    %c0_99 = arith.constant 0 : index
    %c0_100 = arith.constant 0 : index
    %134 = vector.load %arg5[%c1_98, %c0_99, %c0_100] : memref<2x16x256xbf16, #tpu.memory_space<vmem>>, vector<1x16x256xbf16>
    %135 = vector.shape_cast %134 : vector<1x16x256xbf16> to vector<16x256xbf16>
    %136 = vector.shape_cast %133 : vector<16x256xbf16> to vector<1x16x256xbf16>
    tpu.vector_store %arg5[%c1_98, %c0_99, %c0_100], %136 {strides = array<i32>} : memref<2x16x256xbf16, #tpu.memory_space<vmem>>, vector<1x16x256xbf16>,
    return
  }
  func.func @transform_0(%arg0: i32) -> (i32, i32, i32) {
    %c0_i32 = arith.constant 0 : i32
    %c0_i32_0 = arith.constant 0 : i32
    %c0_i32_1 = arith.constant 0 : i32
    %c0_i32_2 = arith.constant 0 : i32
    return %c0_i32, %c0_i32_0, %c0_i32_1 : i32, i32, i32
  }
  func.func @transform_1(%arg0: i32) -> (i32, i32) {
    %c0_i32 = arith.constant 0 : i32
    %c0_i32_0 = arith.constant 0 : i32
    %c0_i32_1 = arith.constant 0 : i32
    return %c0_i32, %c0_i32_0 : i32, i32
  }
  func.func @transform_2(%arg0: i32) -> (i32, i32) {
    %c0_i32 = arith.constant 0 : i32
    %c0_i32_0 = arith.constant 0 : i32
    %c0_i32_1 = arith.constant 0 : i32
    return %c0_i32, %c0_i32_0 : i32, i32
  }
  func.func @transform_3(%arg0: i32) -> (i32, i32, i32) {
    %c0_i32 = arith.constant 0 : i32
    %c0_i32_0 = arith.constant 0 : i32
    %c0_i32_1 = arith.constant 0 : i32
    %c0_i32_2 = arith.constant 0 : i32
    return %c0_i32, %c0_i32_0, %c0_i32_1 : i32, i32, i32
  }
  func.func @transform_4(%arg0: i32) -> (i32, i32, i32) {
    %c0_i32 = arith.constant 0 : i32
    %c0_i32_0 = arith.constant 0 : i32
    %c0_i32_1 = arith.constant 0 : i32
    %c0_i32_2 = arith.constant 0 : i32
    return %c0_i32, %c0_i32_0, %c0_i32_1 : i32, i32, i32
  }
}

module attributes {stable_mosaic.version = 11 : i64} {
  func.func @kernel(%arg0: i32, %arg1: memref<2x16x256xbf16, #tpu.memory_space<vmem>>, %arg2: memref<2x16x256xbf16, #tpu.memory_space<vmem>>, %arg3: memref<2x16x256xbf16, #tpu.memory_space<vmem>>, %arg4: memref<2x16x256xbf16, #tpu.memory_space<vmem>>, %arg5: memref<16x16xbf16, #tpu.memory_space<vmem>>, %arg6: memref<16x16xbf16, #tpu.memory_space<vmem>>, %arg7: memref<16x16xbf16, #tpu.memory_space<vmem>>, %arg8: memref<16x16xbf16, #tpu.memory_space<vmem>>, %arg9: memref<16x1xf32, #tpu.memory_space<vmem>>, %arg10: memref<2x16x256xbf16, #tpu.memory_space<vmem>>) attributes {dimension_semantics = [#tpu.dimension_semantics<arbitrary>], iteration_bounds = array<i64: 1>, scalar_prefetch = 0 : i64, scratch_operands = 0 : i64, tpu.core_type = #tpu.core_type<tc>, window_params = [{pipeline_mode = #tpu.pipeline_mode<synchronous>, transform_indices = @transform_0, window_bounds = array<i64: 2, 16, 256>}, {pipeline_mode = #tpu.pipeline_mode<synchronous>, transform_indices = @transform_1, window_bounds = array<i64: 2, 16, 256>}, {pipeline_mode = #tpu.pipeline_mode<synchronous>, transform_indices = @transform_2, window_bounds = array<i64: 2, 16, 256>}, {pipeline_mode = #tpu.pipeline_mode<synchronous>, transform_indices = @transform_3, window_bounds = array<i64: 2, 16, 256>}, {pipeline_mode = #tpu.pipeline_mode<synchronous>, transform_indices = @transform_4, window_bounds = array<i64: 16, 16>}, {pipeline_mode = #tpu.pipeline_mode<synchronous>, transform_indices = @transform_5, window_bounds = array<i64: 16, 16>}, {pipeline_mode = #tpu.pipeline_mode<synchronous>, transform_indices = @transform_6, window_bounds = array<i64: 16, 16>}, {pipeline_mode = #tpu.pipeline_mode<synchronous>, transform_indices = @transform_7, window_bounds = array<i64: 16, 16>}, {pipeline_mode = #tpu.pipeline_mode<synchronous>, transform_indices = @transform_8, window_bounds = array<i64: 16, 1>}, {pipeline_mode = #tpu.pipeline_mode<synchronous>, transform_indices = @transform_9, window_bounds = array<i64: 2, 16, 256>}]} {
    %c0 = arith.constant 0 : index
    %c0_0 = arith.constant 0 : index
    %0 = vector.load %arg9[%c0, %c0_0] : memref<16x1xf32, #tpu.memory_space<vmem>>, vector<16x1xf32>
    %c0_1 = arith.constant 0 : index
    %c0_2 = arith.constant 0 : index
    %1 = vector.load %arg5[%c0_1, %c0_2] : memref<16x16xbf16, #tpu.memory_space<vmem>>, vector<16x16xbf16>
    %c0_3 = arith.constant 0 : index
    %c0_4 = arith.constant 0 : index
    %c0_5 = arith.constant 0 : index
    %2 = vector.load %arg1[%c0_3, %c0_4, %c0_5] : memref<2x16x256xbf16, #tpu.memory_space<vmem>>, vector<1x16x256xbf16>
    %3 = vector.shape_cast %2 : vector<1x16x256xbf16> to vector<16x256xbf16>
    %cst = arith.constant dense<0.000000e+00> : vector<16x256xf32>
    %4 = tpu.matmul %1, %3, %cst {dimension_numbers = #tpu.dot_dimension_numbers<[1], [0], [0], [1], [0, 0, 1, 1], [], []>} : vector<16x16xbf16>, vector<16x256xbf16>, vector<16x256xf32> -> vector<16x256xf32>
    %5 = vector.broadcast %0 : vector<16x1xf32> to vector<16x256xf32>
    %6 = arith.addf %5, %4 : vector<16x256xf32>
    %c0_6 = arith.constant 0 : index
    %c0_7 = arith.constant 0 : index
    %7 = vector.load %arg6[%c0_6, %c0_7] : memref<16x16xbf16, #tpu.memory_space<vmem>>, vector<16x16xbf16>
    %c0_8 = arith.constant 0 : index
    %c0_9 = arith.constant 0 : index
    %c0_10 = arith.constant 0 : index
    %8 = vector.load %arg2[%c0_8, %c0_9, %c0_10] : memref<2x16x256xbf16, #tpu.memory_space<vmem>>, vector<1x16x256xbf16>
    %9 = vector.shape_cast %8 : vector<1x16x256xbf16> to vector<16x256xbf16>
    %cst_11 = arith.constant dense<0.000000e+00> : vector<16x256xf32>
    %10 = tpu.matmul %7, %9, %cst_11 {dimension_numbers = #tpu.dot_dimension_numbers<[1], [0], [0], [1], [0, 0, 1, 1], [], []>} : vector<16x16xbf16>, vector<16x256xbf16>, vector<16x256xf32> -> vector<16x256xf32>
    %11 = arith.addf %6, %10 : vector<16x256xf32>
    %c0_12 = arith.constant 0 : index
    %c0_13 = arith.constant 0 : index
    %12 = vector.load %arg7[%c0_12, %c0_13] : memref<16x16xbf16, #tpu.memory_space<vmem>>, vector<16x16xbf16>
    %c0_14 = arith.constant 0 : index
    %c0_15 = arith.constant 0 : index
    %c0_16 = arith.constant 0 : index
    %13 = vector.load %arg3[%c0_14, %c0_15, %c0_16] : memref<2x16x256xbf16, #tpu.memory_space<vmem>>, vector<1x16x256xbf16>
    %14 = vector.shape_cast %13 : vector<1x16x256xbf16> to vector<16x256xbf16>
    %cst_17 = arith.constant dense<0.000000e+00> : vector<16x256xf32>
    %15 = tpu.matmul %12, %14, %cst_17 {dimension_numbers = #tpu.dot_dimension_numbers<[1], [0], [0], [1], [0, 0, 1, 1], [], []>} : vector<16x16xbf16>, vector<16x256xbf16>, vector<16x256xf32> -> vector<16x256xf32>
    %16 = arith.addf %11, %15 : vector<16x256xf32>
    %c0_18 = arith.constant 0 : index
    %c0_19 = arith.constant 0 : index
    %17 = vector.load %arg8[%c0_18, %c0_19] : memref<16x16xbf16, #tpu.memory_space<vmem>>, vector<16x16xbf16>
    %c0_20 = arith.constant 0 : index
    %c0_21 = arith.constant 0 : index
    %c0_22 = arith.constant 0 : index
    %18 = vector.load %arg4[%c0_20, %c0_21, %c0_22] : memref<2x16x256xbf16, #tpu.memory_space<vmem>>, vector<1x16x256xbf16>
    %19 = vector.shape_cast %18 : vector<1x16x256xbf16> to vector<16x256xbf16>
    %cst_23 = arith.constant dense<0.000000e+00> : vector<16x256xf32>
    %20 = tpu.matmul %17, %19, %cst_23 {dimension_numbers = #tpu.dot_dimension_numbers<[1], [0], [0], [1], [0, 0, 1, 1], [], []>} : vector<16x16xbf16>, vector<16x256xbf16>, vector<16x256xf32> -> vector<16x256xf32>
    %21 = arith.addf %16, %20 : vector<16x256xf32>
    %cst_24 = arith.constant 0.000000e+00 : f32
    %22 = vector.broadcast %cst_24 : f32 to vector<16x256xf32>
    %23 = arith.cmpf oge, %21, %22 : vector<16x256xf32>
    %cst_25 = arith.constant 5.000000e-02 : f32
    %24 = vector.broadcast %cst_25 : f32 to vector<16x256xf32>
    %25 = arith.mulf %24, %21 : vector<16x256xf32>
    %26 = arith.select %23, %21, %25 : vector<16x256xi1>, vector<16x256xf32>
    %27 = arith.truncf %26 : vector<16x256xf32> to vector<16x256xbf16>
    %c0_26 = arith.constant 0 : index
    %c0_27 = arith.constant 0 : index
    %c0_28 = arith.constant 0 : index
    %28 = vector.load %arg10[%c0_26, %c0_27, %c0_28] : memref<2x16x256xbf16, #tpu.memory_space<vmem>>, vector<1x16x256xbf16>
    %29 = vector.shape_cast %28 : vector<1x16x256xbf16> to vector<16x256xbf16>
    %30 = vector.shape_cast %27 : vector<16x256xbf16> to vector<1x16x256xbf16>
    tpu.vector_store %arg10[%c0_26, %c0_27, %c0_28], %30 {strides = array<i32>} : memref<2x16x256xbf16, #tpu.memory_space<vmem>>, vector<1x16x256xbf16>,
    %c0_29 = arith.constant 0 : index
    %c0_30 = arith.constant 0 : index
    %31 = vector.load %arg9[%c0_29, %c0_30] : memref<16x1xf32, #tpu.memory_space<vmem>>, vector<16x1xf32>
    %c0_31 = arith.constant 0 : index
    %c0_32 = arith.constant 0 : index
    %32 = vector.load %arg5[%c0_31, %c0_32] : memref<16x16xbf16, #tpu.memory_space<vmem>>, vector<16x16xbf16>
    %c1 = arith.constant 1 : index
    %c0_33 = arith.constant 0 : index
    %c0_34 = arith.constant 0 : index
    %33 = vector.load %arg1[%c1, %c0_33, %c0_34] : memref<2x16x256xbf16, #tpu.memory_space<vmem>>, vector<1x16x256xbf16>
    %34 = vector.shape_cast %33 : vector<1x16x256xbf16> to vector<16x256xbf16>
    %cst_35 = arith.constant dense<0.000000e+00> : vector<16x256xf32>
    %35 = tpu.matmul %32, %34, %cst_35 {dimension_numbers = #tpu.dot_dimension_numbers<[1], [0], [0], [1], [0, 0, 1, 1], [], []>} : vector<16x16xbf16>, vector<16x256xbf16>, vector<16x256xf32> -> vector<16x256xf32>
    %36 = vector.broadcast %31 : vector<16x1xf32> to vector<16x256xf32>
    %37 = arith.addf %36, %35 : vector<16x256xf32>
    %c0_36 = arith.constant 0 : index
    %c0_37 = arith.constant 0 : index
    %38 = vector.load %arg6[%c0_36, %c0_37] : memref<16x16xbf16, #tpu.memory_space<vmem>>, vector<16x16xbf16>
    %c1_38 = arith.constant 1 : index
    %c0_39 = arith.constant 0 : index
    %c0_40 = arith.constant 0 : index
    %39 = vector.load %arg2[%c1_38, %c0_39, %c0_40] : memref<2x16x256xbf16, #tpu.memory_space<vmem>>, vector<1x16x256xbf16>
    %40 = vector.shape_cast %39 : vector<1x16x256xbf16> to vector<16x256xbf16>
    %cst_41 = arith.constant dense<0.000000e+00> : vector<16x256xf32>
    %41 = tpu.matmul %38, %40, %cst_41 {dimension_numbers = #tpu.dot_dimension_numbers<[1], [0], [0], [1], [0, 0, 1, 1], [], []>} : vector<16x16xbf16>, vector<16x256xbf16>, vector<16x256xf32> -> vector<16x256xf32>
    %42 = arith.addf %37, %41 : vector<16x256xf32>
    %c0_42 = arith.constant 0 : index
    %c0_43 = arith.constant 0 : index
    %43 = vector.load %arg7[%c0_42, %c0_43] : memref<16x16xbf16, #tpu.memory_space<vmem>>, vector<16x16xbf16>
    %c1_44 = arith.constant 1 : index
    %c0_45 = arith.constant 0 : index
    %c0_46 = arith.constant 0 : index
    %44 = vector.load %arg3[%c1_44, %c0_45, %c0_46] : memref<2x16x256xbf16, #tpu.memory_space<vmem>>, vector<1x16x256xbf16>
    %45 = vector.shape_cast %44 : vector<1x16x256xbf16> to vector<16x256xbf16>
    %cst_47 = arith.constant dense<0.000000e+00> : vector<16x256xf32>
    %46 = tpu.matmul %43, %45, %cst_47 {dimension_numbers = #tpu.dot_dimension_numbers<[1], [0], [0], [1], [0, 0, 1, 1], [], []>} : vector<16x16xbf16>, vector<16x256xbf16>, vector<16x256xf32> -> vector<16x256xf32>
    %47 = arith.addf %42, %46 : vector<16x256xf32>
    %c0_48 = arith.constant 0 : index
    %c0_49 = arith.constant 0 : index
    %48 = vector.load %arg8[%c0_48, %c0_49] : memref<16x16xbf16, #tpu.memory_space<vmem>>, vector<16x16xbf16>
    %c1_50 = arith.constant 1 : index
    %c0_51 = arith.constant 0 : index
    %c0_52 = arith.constant 0 : index
    %49 = vector.load %arg4[%c1_50, %c0_51, %c0_52] : memref<2x16x256xbf16, #tpu.memory_space<vmem>>, vector<1x16x256xbf16>
    %50 = vector.shape_cast %49 : vector<1x16x256xbf16> to vector<16x256xbf16>
    %cst_53 = arith.constant dense<0.000000e+00> : vector<16x256xf32>
    %51 = tpu.matmul %48, %50, %cst_53 {dimension_numbers = #tpu.dot_dimension_numbers<[1], [0], [0], [1], [0, 0, 1, 1], [], []>} : vector<16x16xbf16>, vector<16x256xbf16>, vector<16x256xf32> -> vector<16x256xf32>
    %52 = arith.addf %47, %51 : vector<16x256xf32>
    %cst_54 = arith.constant 0.000000e+00 : f32
    %53 = vector.broadcast %cst_54 : f32 to vector<16x256xf32>
    %54 = arith.cmpf oge, %52, %53 : vector<16x256xf32>
    %cst_55 = arith.constant 5.000000e-02 : f32
    %55 = vector.broadcast %cst_55 : f32 to vector<16x256xf32>
    %56 = arith.mulf %55, %52 : vector<16x256xf32>
    %57 = arith.select %54, %52, %56 : vector<16x256xi1>, vector<16x256xf32>
    %58 = arith.truncf %57 : vector<16x256xf32> to vector<16x256xbf16>
    %c1_56 = arith.constant 1 : index
    %c0_57 = arith.constant 0 : index
    %c0_58 = arith.constant 0 : index
    %59 = vector.load %arg10[%c1_56, %c0_57, %c0_58] : memref<2x16x256xbf16, #tpu.memory_space<vmem>>, vector<1x16x256xbf16>
    %60 = vector.shape_cast %59 : vector<1x16x256xbf16> to vector<16x256xbf16>
    %61 = vector.shape_cast %58 : vector<16x256xbf16> to vector<1x16x256xbf16>
    tpu.vector_store %arg10[%c1_56, %c0_57, %c0_58], %61 {strides = array<i32>} : memref<2x16x256xbf16, #tpu.memory_space<vmem>>, vector<1x16x256xbf16>,
    return
  }
  func.func @transform_0(%arg0: i32) -> (i32, i32, i32) {
    %c0_i32 = arith.constant 0 : i32
    %c0_i32_0 = arith.constant 0 : i32
    %c0_i32_1 = arith.constant 0 : i32
    %c0_i32_2 = arith.constant 0 : i32
    return %c0_i32, %c0_i32_0, %c0_i32_1 : i32, i32, i32
  }
  func.func @transform_1(%arg0: i32) -> (i32, i32, i32) {
    %c0_i32 = arith.constant 0 : i32
    %c0_i32_0 = arith.constant 0 : i32
    %c0_i32_1 = arith.constant 0 : i32
    %c0_i32_2 = arith.constant 0 : i32
    return %c0_i32, %c0_i32_0, %c0_i32_1 : i32, i32, i32
  }
  func.func @transform_2(%arg0: i32) -> (i32, i32, i32) {
    %c0_i32 = arith.constant 0 : i32
    %c0_i32_0 = arith.constant 0 : i32
    %c0_i32_1 = arith.constant 0 : i32
    %c0_i32_2 = arith.constant 0 : i32
    return %c0_i32, %c0_i32_0, %c0_i32_1 : i32, i32, i32
  }
  func.func @transform_3(%arg0: i32) -> (i32, i32, i32) {
    %c0_i32 = arith.constant 0 : i32
    %c0_i32_0 = arith.constant 0 : i32
    %c0_i32_1 = arith.constant 0 : i32
    %c0_i32_2 = arith.constant 0 : i32
    return %c0_i32, %c0_i32_0, %c0_i32_1 : i32, i32, i32
  }
  func.func @transform_4(%arg0: i32) -> (i32, i32) {
    %c0_i32 = arith.constant 0 : i32
    %c0_i32_0 = arith.constant 0 : i32
    %c0_i32_1 = arith.constant 0 : i32
    return %c0_i32, %c0_i32_0 : i32, i32
  }
  func.func @transform_5(%arg0: i32) -> (i32, i32) {
    %c0_i32 = arith.constant 0 : i32
    %c0_i32_0 = arith.constant 0 : i32
    %c0_i32_1 = arith.constant 0 : i32
    return %c0_i32, %c0_i32_0 : i32, i32
  }
  func.func @transform_6(%arg0: i32) -> (i32, i32) {
    %c0_i32 = arith.constant 0 : i32
    %c0_i32_0 = arith.constant 0 : i32
    %c0_i32_1 = arith.constant 0 : i32
    return %c0_i32, %c0_i32_0 : i32, i32
  }
  func.func @transform_7(%arg0: i32) -> (i32, i32) {
    %c0_i32 = arith.constant 0 : i32
    %c0_i32_0 = arith.constant 0 : i32
    %c0_i32_1 = arith.constant 0 : i32
    return %c0_i32, %c0_i32_0 : i32, i32
  }
  func.func @transform_8(%arg0: i32) -> (i32, i32) {
    %c0_i32 = arith.constant 0 : i32
    %c0_i32_0 = arith.constant 0 : i32
    %c0_i32_1 = arith.constant 0 : i32
    return %c0_i32, %c0_i32_0 : i32, i32
  }
  func.func @transform_9(%arg0: i32) -> (i32, i32, i32) {
    %c0_i32 = arith.constant 0 : i32
    %c0_i32_0 = arith.constant 0 : i32
    %c0_i32_1 = arith.constant 0 : i32
    %c0_i32_2 = arith.constant 0 : i32
    return %c0_i32, %c0_i32_0, %c0_i32_1 : i32, i32, i32
  }
}

</mosaic_0001>

<bundles_post_ra>
// kernel: rfdn_forward.27
= control target key start
LH: loop header
LB: loop body
LE: loop exit
PB: predicated region body
PF: predicated region fallthrough
CT: control target
= control target key end

     0   :  { %v17_v0 = vlaneseq  ;;  %v740_v1 = vmov 0   ;;  %s741_s16 = smov 113   ;;  %s742_s17 = smov 111   ;;  %vm51_vm6 = vcmask 138240   ;;  %vm88_vm11 = vcmask 908288   ;;  %s971_s0 = inlined_call_operand.vmem [shape: bf16[2,16,256], index: 0, kind: input, shape index: {}]   ;;  %s972_s1 = inlined_call_operand.vmem [shape: bf16[16,144], index: 1, kind: input, shape index: {}]   ;;  %s973_s2 = inlined_call_operand.vmem [shape: f32[16,1], index: 2, kind: input, shape index: {}]   ;;  %s974_s3 = inlined_call_operand.vmem [shape: bf16[2,16,256], index: 3, kind: output, shape index: {}]  }
   0x1   :  { %730 = vset.pattern.permute.xlu1 %v740_v1  ;;  %729 = vset.pattern.permute.xlu0 %v740_v1  ;;  %v774_v4 = vld [vmem:[%s971_s0 + $0x10] ss:$8 sps:$4 sm:$0xff]   ;;  %v779_v5 = vld [vmem:[%s971_s0 + $0x14] ss:$8 sps:$4 sm:$0xff]   ;;  %52 = vst.msk [vmem:[#allocation2 + $0x18] sm:$0xff] %vm51_vm6, %v740_v1  ;;  %s743_s18 = smov 127  }
   0x2   :  { %v18_v2 = vand.u32 127, %v17_v0  ;;  %v77_v3 = vshrl.u32 %v17_v0, 7  ;;  %s744_s19 = smov 1   ;;  %s745_s20 = smov 15   ;;  %v799_v17 = vld [vmem:[%s971_s0] ss:$8 sps:$4 sm:$0xff]  }
   0x3   :  { %s746_s21 = smov 17   ;;  %v805_v18 = vld [vmem:[%s971_s0 + $0x4] ss:$8 sps:$4 sm:$0xff]   ;;  %s747_s26 = smov 16   ;;  %vm152_vm15 = vcmask 924672  }
   0x4   :  { %v19_v6 = vadd.s32 128, %v18_v2  ;;  %v24_v7 = vand.u32 15, %v18_v2  ;;  %v78_v9 = vsub.s32 0, %v77_v3  ;;  %v82_v10 = vsub.s32 4, %v77_v3  ;;  %s748_s27 = smov 112   ;;  %v536_v2 = vld [vmem:[%s973_s2] sm:$0xff] }
   0x5   :  { %v739_v61 = vld [vmem:[%s972_s1 + $0x4] ss:$8 sps:$4 sm:$0xff]  }
   0x6   :  { %v31_v8 = vand.u32 15, %v19_v6  ;;  %vm46_vm0 = vcmp.ne.s32.totalorder %v24_v7, 15  ;;  %vm44_vm1 = vcmp.ne.s32.totalorder %v24_v7, 0  ;;  %v537_v3 = vld [vmem:[%s973_s2 + $0x8] sm:$0xff] }
   0x8   :  { %vm47_vm2 = vcmp.ne.s32.totalorder %v31_v8, 15  ;;  %vm45_vm3 = vcmp.ne.s32.totalorder %v31_v8, 0  ;;  %v833_v35 = vld [vmem:[#allocation2 + $0x18] sm:$0xff] }
   0x9   :  { %vm138_vm4 = vmpackc.low %vm47_vm2, %vm46_vm0  ;;  %vm183_vm2 = vcmask 1039360  }
   0xa   :  { %v139_v11 = vsel %vm138_vm4, 65537, %v740_v1  ;;  %vm74_vm5 = vmpackc.low %vm45_vm3, %vm44_vm1  ;;  %vm200_vm3 = vcmask 7168  }
   0xb   :  { %v143_v12 = vrot.slane %v139_v11, %v78_v9  ;;  %v75_v13 = vsel %vm74_vm5, 65537, %v740_v1  ;;  %v147_v15 = vrot.slane %v139_v11, %v82_v10 }
   0xc   :  { %v79_v14 = vrot.slane %v75_v13, %v78_v9  ;;  %v83_v16 = vrot.slane %v75_v13, %v82_v10 }
   0xd   :  { %148 = vrot.lane.b32.xlu1 %v143_v12, %s741_s16 }
   0xe   :  { %84 = vrot.lane.b32.xlu0 %v79_v14, %s742_s17 }
  0x11   :  { %150 = vrot.lane.b32.xlu1 %v147_v15, %s741_s16 }
  0x12   :  { %86 = vrot.lane.b32.xlu0 %v83_v16, %s742_s17 }
  0x15   :  { %181 = vrot.lane.b32.xlu1 %v83_v16, %s743_s18 }
  0x16   :  { %179 = vrot.lane.b32.xlu0 %v79_v14, %s743_s18 }
  0x19   :  { %216 = vrot.lane.b32.xlu1 %v147_v15, %s744_s19 }
  0x1a   :  { %214 = vrot.lane.b32.xlu0 %v143_v12, %s744_s19 }
  0x1d   :  { %245 = vrot.lane.b32.xlu1 %v83_v16, %s745_s20 }
  0x1e   :  { %243 = vrot.lane.b32.xlu0 %v79_v14, %s745_s20 }
  0x21   :  { %293 = vrot.lane.b32.xlu1 %v147_v15, %s746_s21 }
  0x22   :  { %291 = vrot.lane.b32.xlu0 %v143_v12, %s746_s21 }
  0x25   :  { %120 = vrot.lane.b32.xlu1 %v799_v17, %s747_s26 }
  0x26   :  { %122 = vrot.lane.b32.xlu0 %v805_v18, %s747_s26 }
  0x29   :  { %361 = vrot.lane.b32.xlu1 %v774_v4, %s747_s26 }
  0x2a   :  { %363 = vrot.lane.b32.xlu0 %v779_v5, %s747_s26 }
  0x2d   :  { %710 = vrot.lane.b32.xlu1 %v740_v1, %s747_s26 }
  0x2e   :  { %277 = vrot.lane.b32.xlu0 %v805_v18, %s748_s27 }
  0x32   :  { %715 = vrot.lane.b32.xlu0 %v740_v1, %s746_s21 }
  0x36   :  { %720 = vrot.lane.b32.xlu0 %v740_v1, %s745_s20 }
  0x7f   :  { %v149_v19 = vpop.permute.xlu1 %148 }
  0x80   :  { %v85_v20 = vpop.permute.xlu0 %84 }
  0x83   :  { %v151_v21 = vpop.permute.xlu1 %150 }
  0x84   :  { %v87_v22 = vpop.permute.xlu0 %86  ;;  %vm156_vm9 = vcmp.ne.s16.totalorder %v151_v21, 0  ;;  %v153_v40 = vsel %vm152_vm15, %v149_v19, %v151_v21 }
  0x85   :  { %vm92_vm7 = vcmp.ne.s16.totalorder %v87_v22, 0  ;;  %v159_v29 = vsel %vm156_vm9, %v805_v18, 0  ;;  %v376_v32 = vsel %vm156_vm9, %v779_v5, 0  ;;  %v89_v36 = vsel %vm88_vm11, %v85_v20, %v87_v22 }
  0x86   :  { %v95_v23 = vsel %vm92_vm7, %v805_v18, 0  ;;  %v337_v26 = vsel %vm92_vm7, %v779_v5, 0  ;;  %vm91_vm14 = vcmp.ne.s16.totalorder %v89_v36, 0  ;;  %vm155_vm0 = vcmp.ne.s16.totalorder %v153_v40, 0 }
  0x87   :  { %103 = vrot.lane.b32.xlu1 %v95_v23, %s746_s21  ;;  %v182_v24 = vpop.permute.xlu1 %181  ;;  %v94_v39 = vsel %vm91_vm14, %v799_v17, 0  ;;  %v336_v42 = vsel %vm91_vm14, %v774_v4, 0  ;;  %v158_v44 = vsel %vm155_vm0, %v799_v17, 0  ;;  %v375_v46 = vsel %vm155_vm0, %v774_v4, 0 }
  0x88   :  { %vm187_vm8 = vcmp.ne.s16.totalorder %v182_v24, 0  ;;  %v180_v25 = vpop.permute.xlu0 %179  ;;  %vm169_vm7 = vcmask 121856  }
  0x89   :  { %v190_v27 = vsel %vm187_vm8, %v805_v18, 0  ;;  %v397_v30 = vsel %vm187_vm8, %v779_v5, 0  ;;  %v184_v47 = vsel %vm183_vm2, %v180_v25, %v182_v24 }
  0x8a   :  { %198 = vrot.lane.b32.xlu0 %v190_v27, %s744_s19  ;;  %vm186_vm4 = vcmp.ne.s16.totalorder %v184_v47, 0 }
  0x8b   :  { %345 = vrot.lane.b32.xlu1 %v337_v26, %s746_s21  ;;  %v217_v34 = vpop.permute.xlu1 %216  ;;  %v189_v50 = vsel %vm186_vm4, %v799_v17, 0  ;;  %v396_v53 = vsel %vm186_vm4, %v774_v4, 0 }
  0x8c   :  { %v215_v28 = vpop.permute.xlu0 %214  ;;  %vm221_vm13 = vcmp.ne.s16.totalorder %v217_v34, 0 }
  0x8d   :  { %vm219_vm10 = vcmp.ne.s16.totalorder %v215_v28, 0  ;;  %v224_v38 = vsel %vm221_vm13, %v833_v35, 0  ;;  %v218_v48 = vsel %vm200_vm3, %v215_v28, %v217_v34 }
  0x8e   :  { %405 = vrot.lane.b32.xlu0 %v397_v30, %s744_s19  ;;  %v222_v33 = vsel %vm219_vm10, %v799_v17, 0  ;;  %v420_v43 = vsel %vm219_vm10, %v774_v4, 0  ;;  %vm220_vm5 = vcmp.ne.s16.totalorder %v218_v48, 0 }
  0x8f   :  { %167 = vrot.lane.b32.xlu1 %v159_v29, %s745_s20  ;;  %v246_v41 = vpop.permute.xlu1 %245  ;;  %v223_v51 = vsel %vm220_vm5, %v805_v18, 0  ;;  %v421_v54 = vsel %vm220_vm5, %v779_v5, 0 }
  0x90   :  { %v244_v31 = vpop.permute.xlu0 %243  ;;  %vm250_vm1 = vcmp.ne.s16.totalorder %v246_v41, 0 }
  0x91   :  { %vm248_vm12 = vcmp.ne.s16.totalorder %v244_v31, 0  ;;  %v253_v45 = vsel %vm250_vm1, %v833_v35, 0  ;;  %v247_v52 = vsel %vm169_vm7, %v244_v31, %v246_v41 }
  0x92   :  { %228 = vrot.lane.b32.xlu0 %v222_v33, %s743_s18  ;;  %v251_v37 = vsel %vm248_vm12, %v799_v17, 0  ;;  %v441_v49 = vsel %vm248_vm12, %v774_v4, 0  ;;  %vm249_vm8 = vcmp.ne.s16.totalorder %v247_v52, 0  ;;  %vm124_vm12 = vcmask 130048  }
  0x93   :  { %384 = vrot.lane.b32.xlu1 %v376_v32, %s745_s20  ;;  %v294_v55 = vpop.permute.xlu1 %293  ;;  %v252_v57 = vsel %vm249_vm8, %v805_v18, 0  ;;  %v442_v59 = vsel %vm249_vm8, %v779_v5, 0  ;;  %688 = vmatprep.mubr.msk.bf16.mxu0 %vm124_vm12, %v739_v61 }
  0x94   :  { %v292_v56 = vpop.permute.xlu0 %291  ;;  %vm298_vm10 = vcmp.ne.s16.totalorder %v294_v55, 0  ;;  %689 = vmatprep.mubr.msk.bf16.mxu1 %vm124_vm12, %v739_v61 }
  0x95   :  { %v295_v58 = vsel %vm51_vm6, %v292_v56, %v294_v55  ;;  %v301_v62 = vsel %vm298_vm10, %v833_v35, 0  ;;  %vm296_vm13 = vcmp.ne.s16.totalorder %v292_v56, 0 }
  0x96   :  { %257 = vrot.lane.b32.xlu0 %v251_v37, %s741_s16  ;;  %vm297_vm9 = vcmp.ne.s16.totalorder %v295_v58, 0  ;;  %v299_v0 = vsel %vm296_vm13, %v799_v17, 0 }
  0x97   :  { %725 = vrot.lane.b32.xlu1 %v740_v1, %s744_s19  ;;  %v300_v60 = vsel %vm297_vm9, %v805_v18, 0  ;;  %v481_v63 = vsel %vm297_vm9, %v779_v5, 0  ;;  %v480_v1 = vsel %vm296_vm13, %v774_v4, 0  ;;  %v121_v7 = vpop.permute.xlu1 %120 }
  0x98   :  { %v123_v6 = vpop.permute.xlu0 %122 }
  0x99   :  { %v126_v33 = vsel %vm124_vm12, %v121_v7, %v123_v6 }
  0x9a   :  { %101 = vrot.lane.b32.xlu0 %v94_v39, %s746_s21 }
  0x9b   :  { %232 = vrot.lane.b32.xlu1 %v224_v38, %s743_s18  ;;  %v362_v9 = vpop.permute.xlu1 %361 }
  0x9c   :  { %v364_v8 = vpop.permute.xlu0 %363 }
  0x9d   :  { %v366_v41 = vsel %vm124_vm12, %v362_v9, %v364_v8 }
  0x9e   :  { %343 = vrot.lane.b32.xlu0 %v336_v42, %s746_s21 }
  0x9f   :  { %430 = vrot.lane.b32.xlu1 %v224_v38, %s743_s18  ;;  %v711_v11 = vpop.permute.xlu1 %710 }
  0xa0   :  { %v910_v10 = vpop.permute.xlu0 %277  ;;  %v712_v30 = vunpack.i.l.bf16 %v711_v11  ;;  %v713_v37 = vunpack.i.h.bf16 %v711_v11 }
  0xa2   :  { %165 = vrot.lane.b32.xlu0 %v158_v44, %s745_s20  ;;  %v125_v39 = vsel %vm124_vm12, %v712_v30, %v121_v7 }
  0xa3   :  { %426 = vrot.lane.b32.xlu1 %v420_v43, %s743_s18 }
  0xa4   :  { %v716_v12 = vpop.permute.xlu0 %715 }
  0xa5   :  { %v717_v26 = vunpack.i.l.bf16 %v716_v12  ;;  %v718_v32 = vunpack.i.h.bf16 %v716_v12 }
  0xa6   :  { %382 = vrot.lane.b32.xlu0 %v375_v46, %s745_s20  ;;  %v365_v46 = vsel %vm124_vm12, %v713_v37, %v362_v9 }
  0xa7   :  { %261 = vrot.lane.b32.xlu1 %v253_v45, %s741_s16 }
  0xa8   :  { %v721_v14 = vpop.permute.xlu0 %720 }
  0xa9   :  { %v722_v40 = vunpack.i.l.bf16 %v721_v14  ;;  %v723_v47 = vunpack.i.h.bf16 %v721_v14 }
  0xaa   :  { %467 = vrot.lane.b32.xlu0 %v779_v5, %s748_s27 }
  0xab   :  { %451 = vrot.lane.b32.xlu1 %v253_v45, %s741_s16 }
  0xae   :  { %275 = vrot.lane.b32.xlu0 %v799_v17, %s748_s27 }
  0xaf   :  { %447 = vrot.lane.b32.xlu1 %v441_v49, %s741_s16 }
  0xb2   :  { %230 = vrot.lane.b32.xlu0 %v223_v51, %s743_s18 }
  0xb3   :  { %196 = vrot.lane.b32.xlu1 %v189_v50, %s744_s19 }
  0xb6   :  { %428 = vrot.lane.b32.xlu0 %v421_v54, %s743_s18 }
  0xb7   :  { %403 = vrot.lane.b32.xlu1 %v396_v53, %s744_s19 }
  0xba   :  { %259 = vrot.lane.b32.xlu0 %v252_v57, %s741_s16 }
  0xbb   :  { %279 = vrot.lane.b32.xlu1 %v833_v35, %s748_s27 }
  0xbe   :  { %449 = vrot.lane.b32.xlu0 %v442_v59, %s741_s16 }
  0xbf   :  { %469 = vrot.lane.b32.xlu1 %v833_v35, %s748_s27 }
  0xc2   :  { %307 = vrot.lane.b32.xlu0 %v300_v60, %s742_s17 }
  0xc3   :  { %465 = vrot.lane.b32.xlu1 %v774_v4, %s748_s27 }
  0xc6   :  { %488 = vrot.lane.b32.xlu0 %v481_v63, %s742_s17 }
  0xc7   :  { %309 = vrot.lane.b32.xlu1 %v301_v62, %s742_s17 }
  0xca   :  { %305 = vrot.lane.b32.xlu0 %v299_v0, %s742_s17 }
  0xcb   :  { %490 = vrot.lane.b32.xlu1 %v301_v62, %s742_s17 }
  0xce   :  { %540 = vperm.xlu0 %729, %v536_v2  }
  0xcf   :  { %486 = vrot.lane.b32.xlu1 %v480_v1, %s742_s17 }
  0xd3   :  { %545 = vperm.xlu1 %730, %v537_v3  }
  0xf9   :  { %v104_v13 = vpop.permute.xlu1 %103 }
  0xfc   :  { %v199_v16 = vpop.permute.xlu0 %198 }
  0xfd   :  { %v346_v15 = vpop.permute.xlu1 %345 }
 0x100   :  { %v406_v20 = vpop.permute.xlu0 %405 }
 0x101   :  { %v168_v19 = vpop.permute.xlu1 %167 }
 0x104   :  { %v912_v22 = vpop.permute.xlu0 %228 }
 0x105   :  { %v385_v21 = vpop.permute.xlu1 %384 }
 0x108   :  { %v914_v24 = vpop.permute.xlu0 %257 }
 0x109   :  { %v726_v23 = vpop.permute.xlu1 %725 }
 0x10a   :  { %v727_v55 = vunpack.i.l.bf16 %v726_v23  ;;  %v728_v60 = vunpack.i.h.bf16 %v726_v23 }
 0x10c   :  { %v102_v27 = vpop.permute.xlu0 %101 }
 0x10d   :  { %v233_v25 = vpop.permute.xlu1 %232  ;;  %v107_v28 = vsel %vm51_vm6, %v102_v27, %v104_v13  ;;  %v106_v29 = vsel %vm51_vm6, %v717_v26, %v102_v27  ;;  %v737_v26 = vld [vmem:[%s972_s1] ss:$8 sps:$4 sm:$0xff]  }
 0x10e   :  { %561 = vmatprep.subr.bf16.mxu0 %v107_v28 }
 0x10f   :  { %562 = vmatpush1.bf16.msra.mxu0 %v106_v29 }
 0x110   :  { %563 = vmatprep.subr.bf16.mxu0 %v126_v33  ;;  %v344_v34 = vpop.permute.xlu0 %343 }
 0x111   :  { %v431_v31 = vpop.permute.xlu1 %430  ;;  %v348_v35 = vsel %vm51_vm6, %v344_v34, %v346_v15  ;;  %v347_v36 = vsel %vm51_vm6, %v718_v32, %v344_v34  ;;  %vm281_vm6 = vcmask 916480  }
 0x112   :  { %604 = vmatprep.subr.bf16.mxu1 %v348_v35 }
 0x113   :  { %564 = vmatpush1.bf16.msra.mxu0 %v125_v39  ;;  %605 = vmatpush1.bf16.msra.mxu1 %v347_v36 }
 0x114   :  { %606 = vmatprep.subr.bf16.mxu1 %v366_v41  ;;  %v166_v42 = vpop.permute.xlu0 %165 }
 0x115   :  { %v427_v38 = vpop.permute.xlu1 %426  ;;  %v171_v43 = vsel %vm169_vm7, %v166_v42, %v168_v19  ;;  %v170_v44 = vsel %vm169_vm7, %v722_v40, %v166_v42 }
 0x116   :  { %565 = vmatprep.subr.bf16.mxu0 %v171_v43 }
 0x117   :  { %566 = vmatpush1.bf16.msra.mxu0 %v170_v44  ;;  %607 = vmatpush1.bf16.msra.mxu1 %v365_v46 }
 0x118   :  { %v383_v48 = vpop.permute.xlu0 %382 }
 0x119   :  { %v262_v45 = vpop.permute.xlu1 %261  ;;  %v387_v49 = vsel %vm169_vm7, %v383_v48, %v385_v21  ;;  %v386_v50 = vsel %vm169_vm7, %v723_v47, %v383_v48 }
 0x11a   :  { %608 = vmatprep.subr.bf16.mxu1 %v387_v49 }
 0x11b   :  { %609 = vmatpush1.bf16.msra.mxu1 %v386_v50 }
 0x11c   :  { %v468_v52 = vpop.permute.xlu0 %467 }
 0x11d   :  { %v452_v51 = vpop.permute.xlu1 %451 }
 0x120   :  { %v276_v54 = vpop.permute.xlu0 %275 }
 0x121   :  { %v448_v53 = vpop.permute.xlu1 %447  ;;  %v282_v14 = vsel %vm281_vm6, %v276_v54, %v910_v10 }
 0x124   :  { %v231_v59 = vpop.permute.xlu0 %230 }
 0x125   :  { %v197_v56 = vpop.permute.xlu1 %196  ;;  %v235_v1 = vsel %vm183_vm2, %v231_v59, %v233_v25  ;;  %v234_v6 = vsel %vm183_vm2, %v912_v22, %v231_v59 }
 0x126   :  { %v202_v57 = vsel %vm200_vm3, %v197_v56, %v199_v16  ;;  %v201_v58 = vsel %vm200_vm3, %v727_v55, %v197_v56 }
 0x127   :  { %567 = vmatprep.subr.bf16.mxu0 %v202_v57 }
 0x128   :  { %568 = vmatpush1.bf16.msra.mxu0 %v201_v58  ;;  %v429_v0 = vpop.permute.xlu0 %428 }
 0x129   :  { %v404_v61 = vpop.permute.xlu1 %403  ;;  %569 = vmatprep.subr.bf16.mxu0 %v805_v18  ;;  %v433_v7 = vsel %vm183_vm2, %v429_v0, %v431_v31 }
 0x12a   :  { %v408_v62 = vsel %vm200_vm3, %v404_v61, %v406_v20  ;;  %v407_v63 = vsel %vm200_vm3, %v728_v60, %v404_v61 }
 0x12b   :  { %610 = vmatprep.subr.bf16.mxu1 %v408_v62 }
 0x12c   :  { %570 = vmatpush1.bf16.msra.mxu0 %v799_v17  ;;  %611 = vmatpush1.bf16.msra.mxu1 %v407_v63  ;;  %v260_v3 = vpop.permute.xlu0 %259 }
 0x12d   :  { %v280_v2 = vpop.permute.xlu1 %279  ;;  %571 = vmatprep.subr.bf16.mxu0 %v235_v1  ;;  %612 = vmatprep.subr.bf16.mxu1 %v779_v5  ;;  %v264_v18 = vsel %vm152_vm15, %v260_v3, %v262_v45  ;;  %v263_v9 = vsel %vm152_vm15, %v914_v24, %v260_v3  ;;  %v432_v5 = vsel %vm183_vm2, %v427_v38, %v429_v0 }
 0x12e   :  { %v283_v11 = vsel %vm281_vm6, %v910_v10, %v280_v2 }
 0x130   :  { %572 = vmatpush1.bf16.msra.mxu0 %v234_v6  ;;  %613 = vmatpush1.bf16.msra.mxu1 %v774_v4  ;;  %v450_v17 = vpop.permute.xlu0 %449 }
 0x131   :  { %v470_v8 = vpop.permute.xlu1 %469  ;;  %573 = vmatprep.subr.bf16.mxu0 %v264_v18  ;;  %614 = vmatprep.subr.bf16.mxu1 %v433_v7  ;;  %v454_v4 = vsel %vm152_vm15, %v450_v17, %v452_v51  ;;  %v453_v15 = vsel %vm152_vm15, %v448_v53, %v450_v17 }
 0x132   :  { %v472_v16 = vsel %vm281_vm6, %v468_v52, %v470_v8 }
 0x134   :  { %574 = vmatpush1.bf16.msra.mxu0 %v263_v9  ;;  %615 = vmatpush1.bf16.msra.mxu1 %v432_v5  ;;  %v308_v13 = vpop.permute.xlu0 %307 }
 0x135   :  { %v466_v12 = vpop.permute.xlu1 %465  ;;  %575 = vmatprep.subr.bf16.mxu0 %v283_v11  ;;  %616 = vmatprep.subr.bf16.mxu1 %v454_v4 }
 0x136   :  { %v471_v22 = vsel %vm281_vm6, %v466_v12, %v468_v52 }
 0x138   :  { %576 = vmatpush1.bf16.msra.mxu0 %v282_v14  ;;  %617 = vmatpush1.bf16.msra.mxu1 %v453_v15  ;;  %v489_v21 = vpop.permute.xlu0 %488 }
 0x139   :  { %v310_v19 = vpop.permute.xlu1 %309  ;;  %618 = vmatprep.subr.bf16.mxu1 %v472_v16 }
 0x13a   :  { %v312_v20 = vsel %vm88_vm11, %v308_v13, %v310_v19 }
 0x13b   :  { %577 = vmatprep.subr.bf16.mxu0 %v312_v20 }
 0x13c   :  { %619 = vmatpush1.bf16.msra.mxu1 %v471_v22  ;;  %v306_v10 = vpop.permute.xlu0 %305 }
 0x13d   :  { %v491_v23 = vpop.permute.xlu1 %490  ;;  %v311_v25 = vsel %vm88_vm11, %v306_v10, %v308_v13 }
 0x13e   :  { %v493_v24 = vsel %vm88_vm11, %v489_v21, %v491_v23  ;;  %578 = vmatpush1.bf16.msra.mxu0 %v311_v25 }
 0x13f   :  { %620 = vmatprep.subr.bf16.mxu1 %v493_v24 }
 0x141   :  { %v487_v27 = vpop.permute.xlu1 %486  ;;  %594 = vmatmul.mubr.bf16.vlgmr.msra.gmra.mrb[0].mxu0 %v737_v26 }
 0x142   :  { %v492_v28 = vsel %vm88_vm11, %v487_v27, %v489_v21 }
 0x143   :  { %621 = vmatpush1.bf16.msra.mxu1 %v492_v28 }
 0x146   :  { %637 = vmatmul.mubr.bf16.vlgmr.msra.gmra.mrb[0].mxu1 %v737_v26 }
 0x14d   :  { %v541_v29 = vpop.permute.xlu0 %540 }
 0x152   :  { %v546_v31 = vpop.permute.xlu1 %545 }
 0x214   :  { %v595_v30 = vpop.f32.mrb[0].mxu0 }
 0x215   :  { %v597_v32 = vpop.f32.mrb[1].mxu0  ;;  %v596_v33 = vadd.f32 %v595_v30, %v541_v29 }
 0x216   :  { %v599_v34 = vpop.f32.mrb[2].mxu0  ;;  %v598_v36 = vadd.f32 %v597_v32, %v541_v29 }
 0x217   :  { %v600_v37 = vadd.f32 %v599_v34, %v546_v31  ;;  %v601_v39 = vpop.f32.mrb[3].mxu0 }
 0x218   :  { %v696_v41 = vpack.c.bf16 %v598_v36, %v596_v33  ;;  %v602_v42 = vadd.f32 %v601_v39, %v546_v31 }
 0x219   :  { %v638_v35 = vpop.f32.mrb[0].mxu1 }
 0x21a   :  { %v639_v38 = vadd.f32 %v638_v35, %v541_v29  ;;  %v640_v40 = vpop.f32.mrb[1].mxu1  ;;  %659 = vst [vmem:[%s974_s3] sm:$0xff] %v696_v41  ;;  %v697_v47 = vpack.c.bf16 %v602_v42, %v600_v37 }
 0x21b   :  { %v641_v43 = vadd.f32 %v640_v40, %v541_v29  ;;  %v642_v44 = vpop.f32.mrb[2].mxu1 }
 0x21c   :  { %v643_v45 = vadd.f32 %v642_v44, %v546_v31  ;;  %v644_v46 = vpop.f32.mrb[3].mxu1  ;;  %660 = vst [vmem:[%s974_s3 + $0x8] sm:$0xff] %v697_v47 }
 0x21d   :  { %v698_v48 = vpack.c.bf16 %v641_v43, %v639_v38  ;;  %v645_v49 = vadd.f32 %v644_v46, %v546_v31 }
 0x21f   :  { %694 = vst [vmem:[%s974_s3 + $0x10] sm:$0xff] %v698_v48  ;;  %v699_v50 = vpack.c.bf16 %v645_v49, %v643_v45 }
 0x221   :  { %695 = vst [vmem:[%s974_s3 + $0x18] sm:$0xff] %v699_v50 }

// kernel: rfdn_forward.28
= control target key start
LH: loop header
LB: loop body
LE: loop exit
PB: predicated region body
PF: predicated region fallthrough
CT: control target
= control target key end

     0   :  { %v19_v0 = vlaneseq  ;;  %v864_v2 = vmov 0   ;;  %s865_s19 = smov 113   ;;  %s866_s20 = smov 111   ;;  %vm53_vm6 = vcmask 138240   ;;  %vm90_vm11 = vcmask 908288   ;;  %s1138_s0 = inlined_call_operand.vmem [shape: bf16[2,16,256], index: 0, kind: input, shape index: {}]   ;;  %s1139_s1 = inlined_call_operand.vmem [shape: bf16[24,144], index: 1, kind: input, shape index: {}]   ;;  %s1140_s2 = inlined_call_operand.vmem [shape: f32[24,1], index: 2, kind: input, shape index: {}]   ;;  %s1141_s3 = inlined_call_operand.vmem [shape: bf16[2,16,256], index: 3, kind: output, shape index: {0}]   ;;  %s1142_s4 = inlined_call_operand.vmem [shape: bf16[2,8,256], index: 4, kind: output, shape index: {1}]  }
   0x1   :  { %v901_v1 = vld [vmem:[%s1138_s0 + $0x10] sm:$0xff]  ;;  %853 = vset.pattern.permute.xlu0 %v864_v2  ;;  %854 = vset.pattern.permute.xlu1 %v864_v2  ;;  %v908_v4 = vld [vmem:[%s1138_s0 + $0x18] sm:$0xff]  ;;  %54 = vst.msk [vmem:[#allocation2 + $0x18] sm:$0xff] %vm53_vm6, %v864_v2  ;;  %s867_s21 = smov 127   ;;  %s868_s22 = smov 1   ;;  %v935_v19 = vld [vmem:[%s1138_s0] sm:$0xff] }
   0x2   :  { %v20_v3 = vand.u32 127, %v19_v0  ;;  %v79_v5 = vshrl.u32 %v19_v0, 7  ;;  %v912_v6 = vcombine.low %v901_v1, %v908_v4  ;;  %v916_v7 = vcombine.high %v901_v1, %v908_v4  ;;  %s869_s23 = smov 15   ;;  %v940_v20 = vld [vmem:[%s1138_s0 + $0x8] sm:$0xff]  ;;  %s870_s28 = smov 17  }
   0x3   :  { %v945_v21 = vcombine.low %v935_v19, %v940_v20  ;;  %v950_v22 = vcombine.high %v935_v19, %v940_v20  ;;  %s871_s29 = smov 16   ;;  %s872_s0 = smov 112   ;;  %vm154_vm15 = vcmask 924672  }
   0x4   :  { %v21_v8 = vadd.s32 128, %v20_v3  ;;  %v26_v9 = vand.u32 15, %v20_v3  ;;  %v80_v11 = vsub.s32 0, %v79_v5  ;;  %v84_v12 = vsub.s32 4, %v79_v5 }
   0x6   :  { %v33_v10 = vand.u32 15, %v21_v8  ;;  %vm48_vm0 = vcmp.ne.s32.totalorder %v26_v9, 15  ;;  %vm46_vm1 = vcmp.ne.s32.totalorder %v26_v9, 0 }
   0x8   :  { %vm49_vm2 = vcmp.ne.s32.totalorder %v33_v10, 15  ;;  %vm47_vm3 = vcmp.ne.s32.totalorder %v33_v10, 0  ;;  %v978_v39 = vld [vmem:[#allocation2 + $0x18] sm:$0xff]  ;;  %v539_v10 = vld [vmem:[%s1140_s2] sm:$0xff] }
   0x9   :  { %vm140_vm4 = vmpackc.low %vm49_vm2, %vm48_vm0  ;;  %vm185_vm2 = vcmask 1039360  }
   0xa   :  { %v141_v13 = vsel %vm140_vm4, 65537, %v864_v2  ;;  %vm76_vm5 = vmpackc.low %vm47_vm3, %vm46_vm1  ;;  %vm202_vm3 = vcmask 7168  }
   0xb   :  { %v145_v14 = vrot.slane %v141_v13, %v80_v11  ;;  %v77_v15 = vsel %vm76_vm5, 65537, %v864_v2  ;;  %v149_v17 = vrot.slane %v141_v13, %v84_v12 }
   0xc   :  { %v81_v16 = vrot.slane %v77_v15, %v80_v11  ;;  %v85_v18 = vrot.slane %v77_v15, %v84_v12  ;;  %v540_v11 = vld [vmem:[%s1140_s2 + $0x8] sm:$0xff]  ;;  %v541_v12 = vld [vmem:[%s1140_s2 + $0x10] sm:$0xff] }
   0xd   :  { %150 = vrot.lane.b32.xlu1 %v145_v14, %s865_s19 }
   0xe   :  { %86 = vrot.lane.b32.xlu0 %v81_v16, %s866_s20 }
  0x11   :  { %152 = vrot.lane.b32.xlu1 %v149_v17, %s865_s19 }
  0x12   :  { %88 = vrot.lane.b32.xlu0 %v85_v18, %s866_s20 }
  0x15   :  { %183 = vrot.lane.b32.xlu1 %v85_v18, %s867_s21 }
  0x16   :  { %181 = vrot.lane.b32.xlu0 %v81_v16, %s867_s21 }
  0x19   :  { %218 = vrot.lane.b32.xlu1 %v149_v17, %s868_s22 }
  0x1a   :  { %216 = vrot.lane.b32.xlu0 %v145_v14, %s868_s22 }
  0x1d   :  { %247 = vrot.lane.b32.xlu1 %v85_v18, %s869_s23 }
  0x1e   :  { %245 = vrot.lane.b32.xlu0 %v81_v16, %s869_s23 }
  0x21   :  { %295 = vrot.lane.b32.xlu1 %v149_v17, %s870_s28 }
  0x22   :  { %293 = vrot.lane.b32.xlu0 %v145_v14, %s870_s28 }
  0x25   :  { %122 = vrot.lane.b32.xlu1 %v945_v21, %s871_s29 }
  0x26   :  { %124 = vrot.lane.b32.xlu0 %v950_v22, %s871_s29 }
  0x29   :  { %363 = vrot.lane.b32.xlu1 %v912_v6, %s871_s29 }
  0x2a   :  { %365 = vrot.lane.b32.xlu0 %v916_v7, %s871_s29 }
  0x2d   :  { %834 = vrot.lane.b32.xlu1 %v864_v2, %s871_s29 }
  0x2e   :  { %279 = vrot.lane.b32.xlu0 %v950_v22, %s872_s0 }
  0x32   :  { %839 = vrot.lane.b32.xlu0 %v864_v2, %s870_s28 }
  0x36   :  { %844 = vrot.lane.b32.xlu0 %v864_v2, %s869_s23 }
  0x7f   :  { %v151_v23 = vpop.permute.xlu1 %150 }
  0x80   :  { %v87_v24 = vpop.permute.xlu0 %86 }
  0x83   :  { %v153_v25 = vpop.permute.xlu1 %152 }
  0x84   :  { %v89_v26 = vpop.permute.xlu0 %88  ;;  %vm158_vm9 = vcmp.ne.s16.totalorder %v153_v25, 0  ;;  %v155_v44 = vsel %vm154_vm15, %v151_v23, %v153_v25 }
  0x85   :  { %vm94_vm7 = vcmp.ne.s16.totalorder %v89_v26, 0  ;;  %v161_v33 = vsel %vm158_vm9, %v950_v22, 0  ;;  %v378_v36 = vsel %vm158_vm9, %v916_v7, 0  ;;  %v91_v40 = vsel %vm90_vm11, %v87_v24, %v89_v26 }
  0x86   :  { %v97_v27 = vsel %vm94_vm7, %v950_v22, 0  ;;  %v339_v30 = vsel %vm94_vm7, %v916_v7, 0  ;;  %vm93_vm14 = vcmp.ne.s16.totalorder %v91_v40, 0  ;;  %vm157_vm0 = vcmp.ne.s16.totalorder %v155_v44, 0 }
  0x87   :  { %105 = vrot.lane.b32.xlu1 %v97_v27, %s870_s28  ;;  %v184_v28 = vpop.permute.xlu1 %183  ;;  %v96_v43 = vsel %vm93_vm14, %v945_v21, 0  ;;  %v338_v46 = vsel %vm93_vm14, %v912_v6, 0  ;;  %v160_v48 = vsel %vm157_vm0, %v945_v21, 0  ;;  %v377_v50 = vsel %vm157_vm0, %v912_v6, 0 }
  0x88   :  { %vm189_vm8 = vcmp.ne.s16.totalorder %v184_v28, 0  ;;  %v182_v29 = vpop.permute.xlu0 %181  ;;  %vm171_vm7 = vcmask 121856  }
  0x89   :  { %v192_v31 = vsel %vm189_vm8, %v950_v22, 0  ;;  %v399_v34 = vsel %vm189_vm8, %v916_v7, 0  ;;  %v186_v51 = vsel %vm185_vm2, %v182_v29, %v184_v28 }
  0x8a   :  { %200 = vrot.lane.b32.xlu0 %v192_v31, %s868_s22  ;;  %vm188_vm4 = vcmp.ne.s16.totalorder %v186_v51, 0 }
  0x8b   :  { %347 = vrot.lane.b32.xlu1 %v339_v30, %s870_s28  ;;  %v219_v38 = vpop.permute.xlu1 %218  ;;  %v191_v54 = vsel %vm188_vm4, %v945_v21, 0  ;;  %v398_v57 = vsel %vm188_vm4, %v912_v6, 0 }
  0x8c   :  { %v217_v32 = vpop.permute.xlu0 %216  ;;  %vm223_vm13 = vcmp.ne.s16.totalorder %v219_v38, 0 }
  0x8d   :  { %vm221_vm10 = vcmp.ne.s16.totalorder %v217_v32, 0  ;;  %v226_v42 = vsel %vm223_vm13, %v978_v39, 0  ;;  %v220_v52 = vsel %vm202_vm3, %v217_v32, %v219_v38 }
  0x8e   :  { %407 = vrot.lane.b32.xlu0 %v399_v34, %s868_s22  ;;  %v224_v37 = vsel %vm221_vm10, %v945_v21, 0  ;;  %v422_v47 = vsel %vm221_vm10, %v912_v6, 0  ;;  %vm222_vm5 = vcmp.ne.s16.totalorder %v220_v52, 0 }
  0x8f   :  { %169 = vrot.lane.b32.xlu1 %v161_v33, %s869_s23  ;;  %v248_v45 = vpop.permute.xlu1 %247  ;;  %v225_v55 = vsel %vm222_vm5, %v950_v22, 0  ;;  %v423_v58 = vsel %vm222_vm5, %v916_v7, 0 }
  0x90   :  { %v246_v35 = vpop.permute.xlu0 %245  ;;  %vm252_vm1 = vcmp.ne.s16.totalorder %v248_v45, 0 }
  0x91   :  { %vm250_vm12 = vcmp.ne.s16.totalorder %v246_v35, 0  ;;  %v255_v49 = vsel %vm252_vm1, %v978_v39, 0  ;;  %v249_v56 = vsel %vm171_vm7, %v246_v35, %v248_v45 }
  0x92   :  { %230 = vrot.lane.b32.xlu0 %v224_v37, %s867_s21  ;;  %v253_v41 = vsel %vm250_vm12, %v945_v21, 0  ;;  %v443_v53 = vsel %vm250_vm12, %v912_v6, 0  ;;  %vm251_vm8 = vcmp.ne.s16.totalorder %v249_v56, 0  ;;  %vm126_vm12 = vcmask 130048  }
  0x93   :  { %386 = vrot.lane.b32.xlu1 %v378_v36, %s869_s23  ;;  %v296_v59 = vpop.permute.xlu1 %295  ;;  %v254_v61 = vsel %vm251_vm8, %v950_v22, 0  ;;  %v444_v63 = vsel %vm251_vm8, %v916_v7, 0 }
  0x94   :  { %v294_v60 = vpop.permute.xlu0 %293  ;;  %vm300_vm10 = vcmp.ne.s16.totalorder %v296_v59, 0 }
  0x95   :  { %v297_v62 = vsel %vm53_vm6, %v294_v60, %v296_v59  ;;  %v303_v3 = vsel %vm300_vm10, %v978_v39, 0  ;;  %vm298_vm13 = vcmp.ne.s16.totalorder %v294_v60, 0 }
  0x96   :  { %259 = vrot.lane.b32.xlu0 %v253_v41, %s865_s19  ;;  %vm299_vm9 = vcmp.ne.s16.totalorder %v297_v62, 0  ;;  %v301_v8 = vsel %vm298_vm13, %v945_v21, 0  ;;  %v482_v9 = vsel %vm298_vm13, %v912_v6, 0 }
  0x97   :  { %849 = vrot.lane.b32.xlu1 %v864_v2, %s868_s22  ;;  %v302_v0 = vsel %vm299_vm9, %v950_v22, 0  ;;  %v861_v2 = vld [vmem:[%s1139_s1 + $0x4] ss:$8 sps:$4 sm:$0xff]   ;;  %v483_v5 = vsel %vm299_vm9, %v916_v7, 0  ;;  %v123_v14 = vpop.permute.xlu1 %122 }
  0x98   :  { %803 = vmatprep.mubr.msk.bf16.mxu0 %vm126_vm12, %v861_v2  ;;  %805 = vmatprep.mubr.msk.bf16.mxu1 %vm126_vm12, %v861_v2  ;;  %v125_v13 = vpop.permute.xlu0 %124 }
  0x9a   :  { %103 = vrot.lane.b32.xlu0 %v96_v43, %s870_s28 }
  0x9b   :  { %234 = vrot.lane.b32.xlu1 %v226_v42, %s867_s21  ;;  %v364_v16 = vpop.permute.xlu1 %363 }
  0x9c   :  { %v366_v15 = vpop.permute.xlu0 %365 }
  0x9e   :  { %345 = vrot.lane.b32.xlu0 %v338_v46, %s870_s28 }
  0x9f   :  { %432 = vrot.lane.b32.xlu1 %v226_v42, %s867_s21  ;;  %v835_v18 = vpop.permute.xlu1 %834  ;;  %v128_v42 = vsel %vm126_vm12, %v123_v14, %v125_v13 }
  0xa0   :  { %v1058_v17 = vpop.permute.xlu0 %279  ;;  %v837_v46 = vunpack.i.h.bf16 %v835_v18 }
  0xa2   :  { %167 = vrot.lane.b32.xlu0 %v160_v48, %s869_s23 }
  0xa3   :  { %428 = vrot.lane.b32.xlu1 %v422_v47, %s867_s21 }
  0xa4   :  { %v840_v23 = vpop.permute.xlu0 %839 }
  0xa5   :  { %v841_v35 = vunpack.i.l.bf16 %v840_v23  ;;  %v842_v41 = vunpack.i.h.bf16 %v840_v23 }
  0xa6   :  { %384 = vrot.lane.b32.xlu0 %v377_v50, %s869_s23  ;;  %v368_v50 = vsel %vm126_vm12, %v364_v16, %v366_v15 }
  0xa7   :  { %263 = vrot.lane.b32.xlu1 %v255_v49, %s865_s19 }
  0xa8   :  { %v845_v25 = vpop.permute.xlu0 %844 }
  0xa9   :  { %v847_v56 = vunpack.i.h.bf16 %v845_v25 }
  0xaa   :  { %469 = vrot.lane.b32.xlu0 %v916_v7, %s872_s0 }
  0xab   :  { %453 = vrot.lane.b32.xlu1 %v255_v49, %s865_s19  ;;  %v846_v49 = vunpack.i.l.bf16 %v845_v25 }
  0xae   :  { %277 = vrot.lane.b32.xlu0 %v945_v21, %s872_s0 }
  0xaf   :  { %449 = vrot.lane.b32.xlu1 %v443_v53, %s865_s19 }
  0xb2   :  { %232 = vrot.lane.b32.xlu0 %v225_v55, %s867_s21  ;;  %v367_v55 = vsel %vm126_vm12, %v837_v46, %v364_v16  ;;  %v683_v46 = vunpack.c.l.bf16 %v935_v19 }
  0xb3   :  { %198 = vrot.lane.b32.xlu1 %v191_v54, %s868_s22 }
  0xb6   :  { %430 = vrot.lane.b32.xlu0 %v423_v58, %s867_s21 }
  0xb7   :  { %405 = vrot.lane.b32.xlu1 %v398_v57, %s868_s22 }
  0xba   :  { %261 = vrot.lane.b32.xlu0 %v254_v61, %s865_s19 }
  0xbb   :  { %281 = vrot.lane.b32.xlu1 %v978_v39, %s872_s0 }
  0xbe   :  { %451 = vrot.lane.b32.xlu0 %v444_v63, %s865_s19 }
  0xbf   :  { %471 = vrot.lane.b32.xlu1 %v978_v39, %s872_s0  ;;  %v836_v39 = vunpack.i.l.bf16 %v835_v18 }
  0xc1   :  { %v127_v48 = vsel %vm126_vm12, %v836_v39, %v123_v14 }
  0xc2   :  { %309 = vrot.lane.b32.xlu0 %v302_v0, %s866_s20 }
  0xc3   :  { %467 = vrot.lane.b32.xlu1 %v912_v6, %s872_s0 }
  0xc6   :  { %490 = vrot.lane.b32.xlu0 %v483_v5, %s866_s20 }
  0xc7   :  { %311 = vrot.lane.b32.xlu1 %v303_v3, %s866_s20 }
  0xca   :  { %307 = vrot.lane.b32.xlu0 %v301_v8, %s866_s20 }
  0xcb   :  { %492 = vrot.lane.b32.xlu1 %v303_v3, %s866_s20 }
  0xce   :  { %544 = vperm.xlu0 %853, %v539_v10  }
  0xcf   :  { %488 = vrot.lane.b32.xlu1 %v482_v9, %s866_s20 }
  0xd3   :  { %549 = vperm.xlu1 %854, %v540_v11  }
  0xd7   :  { %554 = vperm.xlu1 %854, %v541_v12  }
  0xf9   :  { %v106_v24 = vpop.permute.xlu1 %105 }
  0xfc   :  { %v201_v27 = vpop.permute.xlu0 %200 }
  0xfd   :  { %v348_v26 = vpop.permute.xlu1 %347 }
 0x100   :  { %v408_v29 = vpop.permute.xlu0 %407 }
 0x101   :  { %v170_v28 = vpop.permute.xlu1 %169 }
 0x104   :  { %v1060_v31 = vpop.permute.xlu0 %230 }
 0x105   :  { %v387_v30 = vpop.permute.xlu1 %386 }
 0x108   :  { %v1062_v33 = vpop.permute.xlu0 %259 }
 0x109   :  { %v850_v32 = vpop.permute.xlu1 %849 }
 0x10a   :  { %v851_v0 = vunpack.i.l.bf16 %v850_v32  ;;  %v852_v9 = vunpack.i.h.bf16 %v850_v32 }
 0x10c   :  { %v104_v36 = vpop.permute.xlu0 %103 }
 0x10d   :  { %v235_v34 = vpop.permute.xlu1 %234  ;;  %v109_v37 = vsel %vm53_vm6, %v104_v36, %v106_v24  ;;  %v108_v38 = vsel %vm53_vm6, %v841_v35, %v104_v36 }
 0x10e   :  { %579 = vmatprep.subr.bf16.mxu0 %v109_v37 }
 0x10f   :  { %580 = vmatpush1.bf16.msra.mxu0 %v108_v38 }
 0x110   :  { %581 = vmatprep.subr.bf16.mxu0 %v128_v42  ;;  %v346_v43 = vpop.permute.xlu0 %345 }
 0x111   :  { %v433_v40 = vpop.permute.xlu1 %432  ;;  %v350_v44 = vsel %vm53_vm6, %v346_v43, %v348_v26  ;;  %v349_v45 = vsel %vm53_vm6, %v842_v41, %v346_v43  ;;  %vm283_vm6 = vcmask 916480  }
 0x112   :  { %630 = vmatprep.subr.bf16.mxu1 %v350_v44 }
 0x113   :  { %582 = vmatpush1.bf16.msra.mxu0 %v127_v48  ;;  %631 = vmatpush1.bf16.msra.mxu1 %v349_v45  ;;  %v684_v48 = vunpack.c.h.bf16 %v935_v19  ;;  %v736_v19 = vunpack.c.l.bf16 %v908_v4 }
 0x114   :  { %632 = vmatprep.subr.bf16.mxu1 %v368_v50  ;;  %v168_v51 = vpop.permute.xlu0 %167 }
 0x115   :  { %v429_v47 = vpop.permute.xlu1 %428  ;;  %v173_v52 = vsel %vm171_vm7, %v168_v51, %v170_v28  ;;  %v172_v53 = vsel %vm171_vm7, %v846_v49, %v168_v51 }
 0x116   :  { %583 = vmatprep.subr.bf16.mxu0 %v173_v52  ;;  %v685_v52 = vunpack.c.l.bf16 %v940_v20 }
 0x117   :  { %584 = vmatpush1.bf16.msra.mxu0 %v172_v53  ;;  %633 = vmatpush1.bf16.msra.mxu1 %v367_v55  ;;  %v734_v53 = vunpack.c.l.bf16 %v901_v1 }
 0x118   :  { %v385_v57 = vpop.permute.xlu0 %384 }
 0x119   :  { %v264_v54 = vpop.permute.xlu1 %263  ;;  %v389_v58 = vsel %vm171_vm7, %v385_v57, %v387_v30  ;;  %v388_v59 = vsel %vm171_vm7, %v847_v56, %v385_v57  ;;  %v686_v57 = vunpack.c.h.bf16 %v940_v20 }
 0x11a   :  { %634 = vmatprep.subr.bf16.mxu1 %v389_v58  ;;  %v735_v58 = vunpack.c.h.bf16 %v901_v1 }
 0x11b   :  { %635 = vmatpush1.bf16.msra.mxu1 %v388_v59 }
 0x11c   :  { %v470_v61 = vpop.permute.xlu0 %469 }
 0x11d   :  { %v454_v60 = vpop.permute.xlu1 %453 }
 0x120   :  { %v278_v63 = vpop.permute.xlu0 %277 }
 0x121   :  { %v450_v62 = vpop.permute.xlu1 %449 }
 0x124   :  { %v233_v8 = vpop.permute.xlu0 %232 }
 0x125   :  { %v199_v2 = vpop.permute.xlu1 %198  ;;  %v237_v14 = vsel %vm185_vm2, %v233_v8, %v235_v34  ;;  %v236_v18 = vsel %vm185_vm2, %v1060_v31, %v233_v8  ;;  %v737_v8 = vunpack.c.h.bf16 %v908_v4 }
 0x126   :  { %v204_v3 = vsel %vm202_vm3, %v199_v2, %v201_v27  ;;  %v203_v5 = vsel %vm202_vm3, %v851_v0, %v199_v2 }
 0x127   :  { %585 = vmatprep.subr.bf16.mxu0 %v204_v3 }
 0x128   :  { %586 = vmatpush1.bf16.msra.mxu0 %v203_v5  ;;  %v431_v13 = vpop.permute.xlu0 %430 }
 0x129   :  { %v406_v10 = vpop.permute.xlu1 %405  ;;  %587 = vmatprep.subr.bf16.mxu0 %v950_v22  ;;  %v435_v23 = vsel %vm185_vm2, %v431_v13, %v433_v40  ;;  %v859_v40 = vld [vmem:[%s1139_s1] ss:$8 sps:$4 sm:$0xff]  }
 0x12a   :  { %v410_v11 = vsel %vm202_vm3, %v406_v10, %v408_v29  ;;  %v409_v12 = vsel %vm202_vm3, %v852_v9, %v406_v10  ;;  %v284_v29 = vsel %vm283_vm6, %v278_v63, %v1058_v17 }
 0x12b   :  { %636 = vmatprep.subr.bf16.mxu1 %v410_v11 }
 0x12c   :  { %588 = vmatpush1.bf16.msra.mxu0 %v945_v21  ;;  %637 = vmatpush1.bf16.msra.mxu1 %v409_v12  ;;  %v262_v16 = vpop.permute.xlu0 %261 }
 0x12d   :  { %v282_v15 = vpop.permute.xlu1 %281  ;;  %589 = vmatprep.subr.bf16.mxu0 %v237_v14  ;;  %638 = vmatprep.subr.bf16.mxu1 %v916_v7  ;;  %v266_v22 = vsel %vm154_vm15, %v262_v16, %v264_v54  ;;  %v265_v25 = vsel %vm154_vm15, %v1062_v33, %v262_v16  ;;  %v434_v7 = vsel %vm185_vm2, %v429_v47, %v431_v13 }
 0x12e   :  { %v285_v26 = vsel %vm283_vm6, %v1058_v17, %v282_v15  ;;  %v502_v17 = vld [vmem:[%s1139_s1 + $0x10] sm:$0xff] }
 0x12f   :  { %v802_v42 = vcombine.high %v502_v17, %v502_v17  ;;  %v801_v44 = vcombine.low %v502_v17, %v502_v17 }
 0x130   :  { %590 = vmatpush1.bf16.msra.mxu0 %v236_v18  ;;  %639 = vmatpush1.bf16.msra.mxu1 %v912_v6  ;;  %v452_v21 = vpop.permute.xlu0 %451 }
 0x131   :  { %v472_v24 = vpop.permute.xlu1 %471  ;;  %591 = vmatprep.subr.bf16.mxu0 %v266_v22  ;;  %640 = vmatprep.subr.bf16.mxu1 %v435_v23  ;;  %v456_v6 = vsel %vm154_vm15, %v452_v21, %v454_v60  ;;  %v455_v30 = vsel %vm154_vm15, %v450_v62, %v452_v21 }
 0x132   :  { %v474_v31 = vsel %vm283_vm6, %v470_v61, %v472_v24 }
 0x134   :  { %592 = vmatpush1.bf16.msra.mxu0 %v265_v25  ;;  %641 = vmatpush1.bf16.msra.mxu1 %v434_v7  ;;  %v310_v28 = vpop.permute.xlu0 %309 }
 0x135   :  { %v468_v27 = vpop.permute.xlu1 %467  ;;  %593 = vmatprep.subr.bf16.mxu0 %v285_v26  ;;  %642 = vmatprep.subr.bf16.mxu1 %v456_v6 }
 0x136   :  { %v473_v35 = vsel %vm283_vm6, %v468_v27, %v470_v61 }
 0x138   :  { %594 = vmatpush1.bf16.msra.mxu0 %v284_v29  ;;  %643 = vmatpush1.bf16.msra.mxu1 %v455_v30  ;;  %v491_v34 = vpop.permute.xlu0 %490 }
 0x139   :  { %v312_v32 = vpop.permute.xlu1 %311  ;;  %644 = vmatprep.subr.bf16.mxu1 %v474_v31 }
 0x13a   :  { %v314_v33 = vsel %vm90_vm11, %v310_v28, %v312_v32 }
 0x13b   :  { %595 = vmatprep.subr.bf16.mxu0 %v314_v33 }
 0x13c   :  { %645 = vmatpush1.bf16.msra.mxu1 %v473_v35  ;;  %v308_v38 = vpop.permute.xlu0 %307 }
 0x13d   :  { %v493_v36 = vpop.permute.xlu1 %492  ;;  %v313_v39 = vsel %vm90_vm11, %v308_v38, %v310_v28 }
 0x13e   :  { %v495_v37 = vsel %vm90_vm11, %v491_v34, %v493_v36  ;;  %596 = vmatpush1.bf16.msra.mxu0 %v313_v39 }
 0x13f   :  { %646 = vmatprep.subr.bf16.mxu1 %v495_v37 }
 0x141   :  { %v489_v41 = vpop.permute.xlu1 %488  ;;  %612 = vmatmul.mubr.bf16.vlgmr.msra.gmra.mrb[0].mxu0 %v859_v40 }
 0x142   :  { %v494_v43 = vsel %vm90_vm11, %v489_v41, %v491_v34  ;;  %804 = vmatprep.mubr.msk.bf16.mxu0 %vm126_vm12, %v802_v42 }
 0x143   :  { %647 = vmatpush1.bf16.msra.mxu1 %v494_v43 }
 0x146   :  { %663 = vmatmul.mubr.bf16.vlgmr.msra.gmra.mrb[0].mxu1 %v859_v40 }
 0x147   :  { %806 = vmatprep.mubr.msk.bf16.mxu1 %vm126_vm12, %v802_v42 }
 0x149   :  { %622 = vmatmul.mubr.bf16.gmra.mrb[4].mxu0 %v801_v44 }
 0x14d   :  { %v545_v45 = vpop.permute.xlu0 %544 }
 0x14e   :  { %673 = vmatmul.mubr.bf16.gmra.mrb[4].mxu1 %v801_v44 }
 0x152   :  { %v550_v49 = vpop.permute.xlu1 %549 }
 0x156   :  { %v555_v23 = vpop.permute.xlu1 %554 }
 0x214   :  { %v613_v47 = vpop.f32.mrb[0].mxu0 }
 0x215   :  { %v614_v50 = vadd.f32 %v613_v47, %v545_v45  ;;  %v615_v51 = vpop.f32.mrb[1].mxu0 }
 0x216   :  { %v616_v54 = vadd.f32 %v615_v51, %v545_v45  ;;  %v617_v55 = vpop.f32.mrb[2].mxu0 }
 0x217   :  { %v687_v59 = vadd.f32 %v683_v46, %v614_v50  ;;  %v618_v60 = vadd.f32 %v617_v55, %v550_v49  ;;  %v619_v62 = vpop.f32.mrb[3].mxu0 }
 0x218   :  { %v688_v0 = vadd.f32 %v684_v48, %v616_v54  ;;  %v620_v2 = vadd.f32 %v619_v62, %v550_v49 }
 0x219   :  { %v664_v56 = vpop.f32.mrb[0].mxu1  ;;  %vm691_vm11 = vcmp.ge.f32.partialorder %v687_v59, 0.0  ;;  %v695_v9 = vmul.f32 0.05, %v687_v59  ;;  %v689_v10 = vadd.f32 %v685_v52, %v618_v60 }
 0x21a   :  { %v665_v61 = vadd.f32 %v664_v56, %v545_v45  ;;  %v666_v63 = vpop.f32.mrb[1].mxu1  ;;  %vm692_vm14 = vcmp.ge.f32.partialorder %v688_v0, 0.0  ;;  %v696_v1 = vmul.f32 0.05, %v688_v0  ;;  %v690_v12 = vadd.f32 %v686_v57, %v620_v2 }
 0x21b   :  { %v667_v3 = vadd.f32 %v666_v63, %v545_v45  ;;  %v668_v5 = vpop.f32.mrb[2].mxu1  ;;  %v699_v14 = vsel %vm691_vm11, %v687_v59, %v695_v9  ;;  %vm693_vm15 = vcmp.ge.f32.partialorder %v689_v10, 0.0  ;;  %v697_v15 = vmul.f32 0.05, %v689_v10 }
 0x21c   :  { %v738_v11 = vadd.f32 %v734_v53, %v665_v61  ;;  %v670_v20 = vpop.f32.mrb[3].mxu1  ;;  %v700_v16 = vsel %vm692_vm14, %v688_v0, %v696_v1  ;;  %vm694_vm1 = vcmp.ge.f32.partialorder %v690_v12, 0.0  ;;  %v698_v22 = vmul.f32 0.05, %v690_v12  ;;  %v623_v24 = vpop.f32.mrb[4].mxu0 }
 0x21d   :  { %v739_v13 = vadd.f32 %v735_v58, %v667_v3  ;;  %v818_v4 = vpack.c.bf16 %v700_v16, %v699_v14  ;;  %v701_v21 = vsel %vm693_vm15, %v689_v10, %v697_v15  ;;  %v625_v7 = vpop.f32.mrb[5].mxu0  ;;  %v669_v27 = vadd.f32 %v668_v5, %v550_v49 }
 0x21e   :  { %vm742_vm0 = vcmp.ge.f32.partialorder %v738_v11, 0.0  ;;  %v746_v18 = vmul.f32 0.05, %v738_v11  ;;  %v702_v6 = vsel %vm694_vm1, %v690_v12, %v698_v22  ;;  %v671_v28 = vadd.f32 %v670_v20, %v550_v49  ;;  %v627_v29 = vpop.f32.mrb[6].mxu0 }
 0x21f   :  { %vm743_vm2 = vcmp.ge.f32.partialorder %v739_v13, 0.0  ;;  %v747_v25 = vmul.f32 0.05, %v739_v13  ;;  %715 = vst [vmem:[%s1141_s3] sm:$0xff] %v818_v4  ;;  %v819_v31 = vpack.c.bf16 %v702_v6, %v701_v21  ;;  %v624_v33 = vadd.f32 %v623_v24, %v555_v23  ;;  %v628_v35 = vpop.f32.mrb[7].mxu0 }
 0x220   :  { %v750_v26 = vsel %vm742_vm0, %v738_v11, %v746_v18  ;;  %v626_v34 = vadd.f32 %v625_v7, %v555_v23  ;;  %v740_v17 = vadd.f32 %v736_v19, %v669_v27  ;;  %v741_v38 = vadd.f32 %v737_v8, %v671_v28 }
 0x221   :  { %v674_v30 = vpop.f32.mrb[4].mxu1  ;;  %v751_v32 = vsel %vm743_vm2, %v739_v13, %v747_v25  ;;  %716 = vst [vmem:[%s1141_s3 + $0x8] sm:$0xff] %v819_v31  ;;  %vm717_vm3 = vcmp.ge.f32.partialorder %v624_v33, 0.0  ;;  %v719_v41 = vmul.f32 0.05, %v624_v33 }
 0x222   :  { %v676_v36 = vpop.f32.mrb[5].mxu1  ;;  %v821_v37 = vpack.c.bf16 %v751_v32, %v750_v26  ;;  %v675_v39 = vadd.f32 %v674_v30, %v555_v23  ;;  %vm718_vm4 = vcmp.ge.f32.partialorder %v626_v34, 0.0  ;;  %v720_v42 = vmul.f32 0.05, %v626_v34 }
 0x223   :  { %v678_v40 = vpop.f32.mrb[6].mxu1  ;;  %vm744_vm5 = vcmp.ge.f32.partialorder %v740_v17, 0.0  ;;  %v748_v43 = vmul.f32 0.05, %v740_v17  ;;  %vm745_vm7 = vcmp.ge.f32.partialorder %v741_v38, 0.0  ;;  %v721_v45 = vsel %vm717_vm3, %v624_v33, %v719_v41 }
 0x224   :  { %814 = vst [vmem:[%s1141_s3 + $0x10] sm:$0xff] %v821_v37  ;;  %v749_v44 = vmul.f32 0.05, %v741_v38  ;;  %v722_v46 = vsel %vm718_vm4, %v626_v34, %v720_v42  ;;  %vm769_vm8 = vcmp.ge.f32.partialorder %v675_v39, 0.0  ;;  %v771_v47 = vmul.f32 0.05, %v675_v39 }
 0x225   :  { %v679_v48 = vpop.f32.mrb[7].mxu1  ;;  %v752_v49 = vsel %vm744_vm5, %v740_v17, %v748_v43  ;;  %v820_v51 = vpack.c.bf16 %v722_v46, %v721_v45  ;;  %v677_v52 = vadd.f32 %v676_v36, %v555_v23 }
 0x226   :  { %v753_v50 = vsel %vm745_vm7, %v741_v38, %v749_v44  ;;  %v773_v54 = vsel %vm769_vm8, %v675_v39, %v771_v47 }
 0x227   :  { %v822_v53 = vpack.c.bf16 %v753_v50, %v752_v49  ;;  %731 = vst [vmem:[%s1142_s4] sm:$0xff] %v820_v51  ;;  %vm770_vm9 = vcmp.ge.f32.partialorder %v677_v52, 0.0  ;;  %v772_v55 = vmul.f32 0.05, %v677_v52 }
 0x229   :  { %815 = vst [vmem:[%s1141_s3 + $0x18] sm:$0xff] %v822_v53  ;;  %v774_v56 = vsel %vm770_vm9, %v677_v52, %v772_v55 }
 0x22a   :  { %v823_v57 = vpack.c.bf16 %v774_v56, %v773_v54 }
 0x22c   :  { %817 = vst [vmem:[%s1142_s4 + $0x8] sm:$0xff] %v823_v57 }

// kernel: rfdn_forward.31
= control target key start
LH: loop header
LB: loop body
LE: loop exit
PB: predicated region body
PF: predicated region fallthrough
CT: control target
= control target key end

     0   :  { %v17_v0 = vlaneseq  ;;  %vm51_vm0 = vcmask 138240   ;;  %v721_v1 = vmov 0   ;;  %s722_s16 = smov 113   ;;  %s723_s17 = smov 111   ;;  %vm88_vm11 = vcmask 908288   ;;  %s945_s0 = inlined_call_operand.vmem [shape: bf16[2,16,256], index: 0, kind: input, shape index: {}]   ;;  %s946_s1 = inlined_call_operand.vmem [shape: bf16[8,144], index: 1, kind: input, shape index: {}]   ;;  %s947_s2 = inlined_call_operand.vmem [shape: f32[8,1], index: 2, kind: input, shape index: {}]   ;;  %s948_s3 = inlined_call_operand.vmem [shape: bf16[2,8,256], index: 3, kind: output, shape index: {}]  }
   0x1   :  { %52 = vst.msk [vmem:[#allocation2 + $0x18] sm:$0xff] %vm51_vm0, %v721_v1  ;;  %712 = vset.pattern.permute.xlu0 %v721_v1  ;;  %v756_v4 = vld [vmem:[%s945_s0 + $0x10] ss:$8 sps:$4 sm:$0xff]   ;;  %v761_v5 = vld [vmem:[%s945_s0 + $0x14] ss:$8 sps:$4 sm:$0xff]   ;;  %s724_s18 = smov 127  }
   0x2   :  { %v18_v2 = vand.u32 127, %v17_v0  ;;  %v77_v3 = vshrl.u32 %v17_v0, 7  ;;  %s725_s19 = smov 1   ;;  %s726_s20 = smov 15   ;;  %v778_v17 = vld [vmem:[%s945_s0] ss:$8 sps:$4 sm:$0xff]  }
   0x3   :  { %s727_s23 = smov 17   ;;  %v784_v18 = vld [vmem:[%s945_s0 + $0x4] ss:$8 sps:$4 sm:$0xff]   ;;  %s728_s26 = smov 16   ;;  %vm152_vm15 = vcmask 924672  }
   0x4   :  { %v19_v6 = vadd.s32 128, %v18_v2  ;;  %v24_v7 = vand.u32 15, %v18_v2  ;;  %v78_v9 = vsub.s32 0, %v77_v3  ;;  %v82_v10 = vsub.s32 4, %v77_v3  ;;  %s729_s27 = smov 112   ;;  %v868_v60 = vld [vmem:[%s946_s1] sm:$0xff] }
   0x5   :  { %v675_v61 = vcombine.high %v868_v60, %v868_v60  ;;  %v535_v3 = vld [vmem:[%s947_s2] sm:$0xff] }
   0x6   :  { %v31_v8 = vand.u32 15, %v19_v6  ;;  %vm46_vm1 = vcmp.ne.s32.totalorder %v24_v7, 15  ;;  %vm44_vm2 = vcmp.ne.s32.totalorder %v24_v7, 0 }
   0x8   :  { %vm47_vm3 = vcmp.ne.s32.totalorder %v31_v8, 15  ;;  %vm45_vm4 = vcmp.ne.s32.totalorder %v31_v8, 0  ;;  %v813_v35 = vld [vmem:[#allocation2 + $0x18] sm:$0xff] }
   0x9   :  { %vm138_vm5 = vmpackc.low %vm47_vm3, %vm46_vm1  ;;  %vm183_vm3 = vcmask 1039360  }
   0xa   :  { %v139_v11 = vsel %vm138_vm5, 65537, %v721_v1  ;;  %vm74_vm6 = vmpackc.low %vm45_vm4, %vm44_vm2  ;;  %vm200_vm4 = vcmask 7168  }
   0xb   :  { %v143_v12 = vrot.slane %v139_v11, %v78_v9  ;;  %v75_v13 = vsel %vm74_vm6, 65537, %v721_v1  ;;  %v147_v15 = vrot.slane %v139_v11, %v82_v10 }
   0xc   :  { %v79_v14 = vrot.slane %v75_v13, %v78_v9  ;;  %v83_v16 = vrot.slane %v75_v13, %v82_v10 }
   0xd   :  { %148 = vrot.lane.b32.xlu1 %v143_v12, %s722_s16 }
   0xe   :  { %84 = vrot.lane.b32.xlu0 %v79_v14, %s723_s17 }
  0x11   :  { %150 = vrot.lane.b32.xlu1 %v147_v15, %s722_s16 }
  0x12   :  { %86 = vrot.lane.b32.xlu0 %v83_v16, %s723_s17 }
  0x15   :  { %181 = vrot.lane.b32.xlu1 %v83_v16, %s724_s18 }
  0x16   :  { %179 = vrot.lane.b32.xlu0 %v79_v14, %s724_s18 }
  0x19   :  { %216 = vrot.lane.b32.xlu1 %v147_v15, %s725_s19 }
  0x1a   :  { %214 = vrot.lane.b32.xlu0 %v143_v12, %s725_s19 }
  0x1d   :  { %245 = vrot.lane.b32.xlu1 %v83_v16, %s726_s20 }
  0x1e   :  { %243 = vrot.lane.b32.xlu0 %v79_v14, %s726_s20 }
  0x21   :  { %293 = vrot.lane.b32.xlu1 %v147_v15, %s727_s23 }
  0x22   :  { %291 = vrot.lane.b32.xlu0 %v143_v12, %s727_s23 }
  0x25   :  { %120 = vrot.lane.b32.xlu1 %v778_v17, %s728_s26 }
  0x26   :  { %122 = vrot.lane.b32.xlu0 %v784_v18, %s728_s26 }
  0x29   :  { %361 = vrot.lane.b32.xlu1 %v756_v4, %s728_s26 }
  0x2a   :  { %363 = vrot.lane.b32.xlu0 %v761_v5, %s728_s26 }
  0x2d   :  { %693 = vrot.lane.b32.xlu1 %v721_v1, %s728_s26 }
  0x2e   :  { %277 = vrot.lane.b32.xlu0 %v784_v18, %s729_s27 }
  0x32   :  { %698 = vrot.lane.b32.xlu0 %v721_v1, %s727_s23 }
  0x36   :  { %703 = vrot.lane.b32.xlu0 %v721_v1, %s726_s20 }
  0x7f   :  { %v149_v19 = vpop.permute.xlu1 %148 }
  0x80   :  { %v85_v20 = vpop.permute.xlu0 %84 }
  0x83   :  { %v151_v21 = vpop.permute.xlu1 %150 }
  0x84   :  { %v87_v22 = vpop.permute.xlu0 %86  ;;  %vm156_vm9 = vcmp.ne.s16.totalorder %v151_v21, 0  ;;  %v153_v40 = vsel %vm152_vm15, %v149_v19, %v151_v21 }
  0x85   :  { %vm92_vm7 = vcmp.ne.s16.totalorder %v87_v22, 0  ;;  %v159_v29 = vsel %vm156_vm9, %v784_v18, 0  ;;  %v376_v32 = vsel %vm156_vm9, %v761_v5, 0  ;;  %v89_v36 = vsel %vm88_vm11, %v85_v20, %v87_v22 }
  0x86   :  { %v95_v23 = vsel %vm92_vm7, %v784_v18, 0  ;;  %v337_v26 = vsel %vm92_vm7, %v761_v5, 0  ;;  %vm91_vm14 = vcmp.ne.s16.totalorder %v89_v36, 0  ;;  %vm155_vm1 = vcmp.ne.s16.totalorder %v153_v40, 0 }
  0x87   :  { %103 = vrot.lane.b32.xlu1 %v95_v23, %s727_s23  ;;  %v182_v24 = vpop.permute.xlu1 %181  ;;  %v94_v39 = vsel %vm91_vm14, %v778_v17, 0  ;;  %v336_v42 = vsel %vm91_vm14, %v756_v4, 0  ;;  %v158_v44 = vsel %vm155_vm1, %v778_v17, 0  ;;  %v375_v46 = vsel %vm155_vm1, %v756_v4, 0 }
  0x88   :  { %vm187_vm8 = vcmp.ne.s16.totalorder %v182_v24, 0  ;;  %v180_v25 = vpop.permute.xlu0 %179  ;;  %vm169_vm7 = vcmask 121856  }
  0x89   :  { %v190_v27 = vsel %vm187_vm8, %v784_v18, 0  ;;  %v397_v30 = vsel %vm187_vm8, %v761_v5, 0  ;;  %v184_v47 = vsel %vm183_vm3, %v180_v25, %v182_v24 }
  0x8a   :  { %198 = vrot.lane.b32.xlu0 %v190_v27, %s725_s19  ;;  %vm186_vm5 = vcmp.ne.s16.totalorder %v184_v47, 0 }
  0x8b   :  { %345 = vrot.lane.b32.xlu1 %v337_v26, %s727_s23  ;;  %v217_v34 = vpop.permute.xlu1 %216  ;;  %v189_v50 = vsel %vm186_vm5, %v778_v17, 0  ;;  %v396_v53 = vsel %vm186_vm5, %v756_v4, 0 }
  0x8c   :  { %v215_v28 = vpop.permute.xlu0 %214  ;;  %vm221_vm13 = vcmp.ne.s16.totalorder %v217_v34, 0 }
  0x8d   :  { %vm219_vm10 = vcmp.ne.s16.totalorder %v215_v28, 0  ;;  %v224_v38 = vsel %vm221_vm13, %v813_v35, 0  ;;  %v218_v48 = vsel %vm200_vm4, %v215_v28, %v217_v34 }
  0x8e   :  { %405 = vrot.lane.b32.xlu0 %v397_v30, %s725_s19  ;;  %v222_v33 = vsel %vm219_vm10, %v778_v17, 0  ;;  %v420_v43 = vsel %vm219_vm10, %v756_v4, 0  ;;  %vm220_vm6 = vcmp.ne.s16.totalorder %v218_v48, 0 }
  0x8f   :  { %167 = vrot.lane.b32.xlu1 %v159_v29, %s726_s20  ;;  %v246_v41 = vpop.permute.xlu1 %245  ;;  %v223_v51 = vsel %vm220_vm6, %v784_v18, 0  ;;  %v421_v54 = vsel %vm220_vm6, %v761_v5, 0 }
  0x90   :  { %v244_v31 = vpop.permute.xlu0 %243  ;;  %vm250_vm2 = vcmp.ne.s16.totalorder %v246_v41, 0 }
  0x91   :  { %vm248_vm12 = vcmp.ne.s16.totalorder %v244_v31, 0  ;;  %v253_v45 = vsel %vm250_vm2, %v813_v35, 0  ;;  %v247_v52 = vsel %vm169_vm7, %v244_v31, %v246_v41 }
  0x92   :  { %228 = vrot.lane.b32.xlu0 %v222_v33, %s724_s18  ;;  %v251_v37 = vsel %vm248_vm12, %v778_v17, 0  ;;  %v441_v49 = vsel %vm248_vm12, %v756_v4, 0  ;;  %vm249_vm8 = vcmp.ne.s16.totalorder %v247_v52, 0  ;;  %vm124_vm12 = vcmask 130048  }
  0x93   :  { %384 = vrot.lane.b32.xlu1 %v376_v32, %s726_s20  ;;  %v294_v55 = vpop.permute.xlu1 %293  ;;  %v252_v57 = vsel %vm249_vm8, %v784_v18, 0  ;;  %v442_v59 = vsel %vm249_vm8, %v761_v5, 0  ;;  %676 = vmatprep.mubr.msk.bf16.mxu0 %vm124_vm12, %v675_v61 }
  0x94   :  { %v292_v56 = vpop.permute.xlu0 %291  ;;  %vm298_vm10 = vcmp.ne.s16.totalorder %v294_v55, 0  ;;  %677 = vmatprep.mubr.msk.bf16.mxu1 %vm124_vm12, %v675_v61 }
  0x95   :  { %v295_v58 = vsel %vm51_vm0, %v292_v56, %v294_v55  ;;  %v301_v63 = vsel %vm298_vm10, %v813_v35, 0  ;;  %vm296_vm13 = vcmp.ne.s16.totalorder %v292_v56, 0 }
  0x96   :  { %257 = vrot.lane.b32.xlu0 %v251_v37, %s722_s16  ;;  %vm297_vm9 = vcmp.ne.s16.totalorder %v295_v58, 0  ;;  %v480_v2 = vsel %vm296_vm13, %v756_v4, 0 }
  0x97   :  { %708 = vrot.lane.b32.xlu1 %v721_v1, %s725_s19  ;;  %v300_v62 = vsel %vm297_vm9, %v784_v18, 0  ;;  %v481_v0 = vsel %vm297_vm9, %v761_v5, 0  ;;  %v299_v1 = vsel %vm296_vm13, %v778_v17, 0  ;;  %v121_v7 = vpop.permute.xlu1 %120 }
  0x98   :  { %v123_v6 = vpop.permute.xlu0 %122 }
  0x99   :  { %v126_v33 = vsel %vm124_vm12, %v121_v7, %v123_v6 }
  0x9a   :  { %101 = vrot.lane.b32.xlu0 %v94_v39, %s727_s23 }
  0x9b   :  { %232 = vrot.lane.b32.xlu1 %v224_v38, %s724_s18  ;;  %v362_v9 = vpop.permute.xlu1 %361 }
  0x9c   :  { %v364_v8 = vpop.permute.xlu0 %363 }
  0x9d   :  { %v366_v41 = vsel %vm124_vm12, %v362_v9, %v364_v8 }
  0x9e   :  { %343 = vrot.lane.b32.xlu0 %v336_v42, %s727_s23 }
  0x9f   :  { %430 = vrot.lane.b32.xlu1 %v224_v38, %s724_s18  ;;  %v694_v11 = vpop.permute.xlu1 %693 }
  0xa0   :  { %v891_v10 = vpop.permute.xlu0 %277  ;;  %v695_v30 = vunpack.i.l.bf16 %v694_v11  ;;  %v696_v37 = vunpack.i.h.bf16 %v694_v11 }
  0xa2   :  { %165 = vrot.lane.b32.xlu0 %v158_v44, %s726_s20  ;;  %v125_v39 = vsel %vm124_vm12, %v695_v30, %v121_v7 }
  0xa3   :  { %426 = vrot.lane.b32.xlu1 %v420_v43, %s724_s18 }
  0xa4   :  { %v699_v12 = vpop.permute.xlu0 %698 }
  0xa5   :  { %v700_v26 = vunpack.i.l.bf16 %v699_v12  ;;  %v701_v32 = vunpack.i.h.bf16 %v699_v12 }
  0xa6   :  { %382 = vrot.lane.b32.xlu0 %v375_v46, %s726_s20  ;;  %v365_v46 = vsel %vm124_vm12, %v696_v37, %v362_v9 }
  0xa7   :  { %261 = vrot.lane.b32.xlu1 %v253_v45, %s722_s16 }
  0xa8   :  { %v704_v14 = vpop.permute.xlu0 %703 }
  0xa9   :  { %v705_v40 = vunpack.i.l.bf16 %v704_v14  ;;  %v706_v47 = vunpack.i.h.bf16 %v704_v14 }
  0xaa   :  { %467 = vrot.lane.b32.xlu0 %v761_v5, %s729_s27 }
  0xab   :  { %451 = vrot.lane.b32.xlu1 %v253_v45, %s722_s16 }
  0xae   :  { %275 = vrot.lane.b32.xlu0 %v778_v17, %s729_s27 }
  0xaf   :  { %447 = vrot.lane.b32.xlu1 %v441_v49, %s722_s16 }
  0xb2   :  { %230 = vrot.lane.b32.xlu0 %v223_v51, %s724_s18 }
  0xb3   :  { %196 = vrot.lane.b32.xlu1 %v189_v50, %s725_s19 }
  0xb6   :  { %428 = vrot.lane.b32.xlu0 %v421_v54, %s724_s18 }
  0xb7   :  { %403 = vrot.lane.b32.xlu1 %v396_v53, %s725_s19 }
  0xba   :  { %259 = vrot.lane.b32.xlu0 %v252_v57, %s722_s16 }
  0xbb   :  { %279 = vrot.lane.b32.xlu1 %v813_v35, %s729_s27 }
  0xbe   :  { %449 = vrot.lane.b32.xlu0 %v442_v59, %s722_s16 }
  0xbf   :  { %469 = vrot.lane.b32.xlu1 %v813_v35, %s729_s27 }
  0xc2   :  { %307 = vrot.lane.b32.xlu0 %v300_v62, %s723_s17 }
  0xc3   :  { %465 = vrot.lane.b32.xlu1 %v756_v4, %s729_s27 }
  0xc6   :  { %488 = vrot.lane.b32.xlu0 %v481_v0, %s723_s17 }
  0xc7   :  { %309 = vrot.lane.b32.xlu1 %v301_v63, %s723_s17 }
  0xca   :  { %305 = vrot.lane.b32.xlu0 %v299_v1, %s723_s17 }
  0xcb   :  { %490 = vrot.lane.b32.xlu1 %v301_v63, %s723_s17 }
  0xce   :  { %538 = vperm.xlu0 %712, %v535_v3  }
  0xcf   :  { %486 = vrot.lane.b32.xlu1 %v480_v2, %s723_s17 }
  0xf9   :  { %v104_v13 = vpop.permute.xlu1 %103 }
  0xfc   :  { %v199_v16 = vpop.permute.xlu0 %198 }
  0xfd   :  { %v346_v15 = vpop.permute.xlu1 %345 }
 0x100   :  { %v406_v20 = vpop.permute.xlu0 %405 }
 0x101   :  { %v168_v19 = vpop.permute.xlu1 %167 }
 0x104   :  { %v893_v22 = vpop.permute.xlu0 %228 }
 0x105   :  { %v385_v21 = vpop.permute.xlu1 %384 }
 0x108   :  { %v895_v24 = vpop.permute.xlu0 %257 }
 0x109   :  { %v709_v23 = vpop.permute.xlu1 %708 }
 0x10a   :  { %v710_v55 = vunpack.i.l.bf16 %v709_v23  ;;  %v711_v61 = vunpack.i.h.bf16 %v709_v23 }
 0x10c   :  { %v102_v27 = vpop.permute.xlu0 %101 }
 0x10d   :  { %v233_v25 = vpop.permute.xlu1 %232  ;;  %v107_v28 = vsel %vm51_vm0, %v102_v27, %v104_v13  ;;  %v106_v29 = vsel %vm51_vm0, %v700_v26, %v102_v27  ;;  %v674_v27 = vcombine.low %v868_v60, %v868_v60 }
 0x10e   :  { %551 = vmatprep.subr.bf16.mxu0 %v107_v28 }
 0x10f   :  { %552 = vmatpush1.bf16.msra.mxu0 %v106_v29 }
 0x110   :  { %553 = vmatprep.subr.bf16.mxu0 %v126_v33  ;;  %v344_v34 = vpop.permute.xlu0 %343 }
 0x111   :  { %v431_v31 = vpop.permute.xlu1 %430  ;;  %v348_v35 = vsel %vm51_vm0, %v344_v34, %v346_v15  ;;  %v347_v36 = vsel %vm51_vm0, %v701_v32, %v344_v34  ;;  %vm281_vm0 = vcmask 916480  }
 0x112   :  { %592 = vmatprep.subr.bf16.mxu1 %v348_v35 }
 0x113   :  { %554 = vmatpush1.bf16.msra.mxu0 %v125_v39  ;;  %593 = vmatpush1.bf16.msra.mxu1 %v347_v36 }
 0x114   :  { %594 = vmatprep.subr.bf16.mxu1 %v366_v41  ;;  %v166_v42 = vpop.permute.xlu0 %165 }
 0x115   :  { %v427_v38 = vpop.permute.xlu1 %426  ;;  %v171_v43 = vsel %vm169_vm7, %v166_v42, %v168_v19  ;;  %v170_v44 = vsel %vm169_vm7, %v705_v40, %v166_v42 }
 0x116   :  { %555 = vmatprep.subr.bf16.mxu0 %v171_v43 }
 0x117   :  { %556 = vmatpush1.bf16.msra.mxu0 %v170_v44  ;;  %595 = vmatpush1.bf16.msra.mxu1 %v365_v46 }
 0x118   :  { %v383_v48 = vpop.permute.xlu0 %382 }
 0x119   :  { %v262_v45 = vpop.permute.xlu1 %261  ;;  %v387_v49 = vsel %vm169_vm7, %v383_v48, %v385_v21  ;;  %v386_v50 = vsel %vm169_vm7, %v706_v47, %v383_v48 }
 0x11a   :  { %596 = vmatprep.subr.bf16.mxu1 %v387_v49 }
 0x11b   :  { %597 = vmatpush1.bf16.msra.mxu1 %v386_v50 }
 0x11c   :  { %v468_v52 = vpop.permute.xlu0 %467 }
 0x11d   :  { %v452_v51 = vpop.permute.xlu1 %451 }
 0x120   :  { %v276_v54 = vpop.permute.xlu0 %275 }
 0x121   :  { %v448_v53 = vpop.permute.xlu1 %447  ;;  %v282_v15 = vsel %vm281_vm0, %v276_v54, %v891_v10 }
 0x124   :  { %v231_v59 = vpop.permute.xlu0 %230 }
 0x125   :  { %v197_v56 = vpop.permute.xlu1 %196  ;;  %v235_v2 = vsel %vm183_vm3, %v231_v59, %v233_v25  ;;  %v234_v7 = vsel %vm183_vm3, %v893_v22, %v231_v59 }
 0x126   :  { %v202_v57 = vsel %vm200_vm4, %v197_v56, %v199_v16  ;;  %v201_v58 = vsel %vm200_vm4, %v710_v55, %v197_v56 }
 0x127   :  { %557 = vmatprep.subr.bf16.mxu0 %v202_v57 }
 0x128   :  { %558 = vmatpush1.bf16.msra.mxu0 %v201_v58  ;;  %v429_v1 = vpop.permute.xlu0 %428 }
 0x129   :  { %v404_v62 = vpop.permute.xlu1 %403  ;;  %559 = vmatprep.subr.bf16.mxu0 %v784_v18  ;;  %v433_v8 = vsel %vm183_vm3, %v429_v1, %v431_v31 }
 0x12a   :  { %v408_v63 = vsel %vm200_vm4, %v404_v62, %v406_v20  ;;  %v407_v0 = vsel %vm200_vm4, %v711_v61, %v404_v62 }
 0x12b   :  { %598 = vmatprep.subr.bf16.mxu1 %v408_v63 }
 0x12c   :  { %560 = vmatpush1.bf16.msra.mxu0 %v778_v17  ;;  %599 = vmatpush1.bf16.msra.mxu1 %v407_v0  ;;  %v260_v6 = vpop.permute.xlu0 %259 }
 0x12d   :  { %v280_v3 = vpop.permute.xlu1 %279  ;;  %561 = vmatprep.subr.bf16.mxu0 %v235_v2  ;;  %600 = vmatprep.subr.bf16.mxu1 %v761_v5  ;;  %v264_v18 = vsel %vm152_vm15, %v260_v6, %v262_v45  ;;  %v263_v11 = vsel %vm152_vm15, %v895_v24, %v260_v6  ;;  %v432_v5 = vsel %vm183_vm3, %v427_v38, %v429_v1 }
 0x12e   :  { %v283_v12 = vsel %vm281_vm0, %v891_v10, %v280_v3 }
 0x130   :  { %562 = vmatpush1.bf16.msra.mxu0 %v234_v7  ;;  %601 = vmatpush1.bf16.msra.mxu1 %v756_v4  ;;  %v450_v17 = vpop.permute.xlu0 %449 }
 0x131   :  { %v470_v9 = vpop.permute.xlu1 %469  ;;  %563 = vmatprep.subr.bf16.mxu0 %v264_v18  ;;  %602 = vmatprep.subr.bf16.mxu1 %v433_v8  ;;  %v454_v4 = vsel %vm152_vm15, %v450_v17, %v452_v51  ;;  %v453_v16 = vsel %vm152_vm15, %v448_v53, %v450_v17 }
 0x132   :  { %v472_v19 = vsel %vm281_vm0, %v468_v52, %v470_v9 }
 0x134   :  { %564 = vmatpush1.bf16.msra.mxu0 %v263_v11  ;;  %603 = vmatpush1.bf16.msra.mxu1 %v432_v5  ;;  %v308_v14 = vpop.permute.xlu0 %307 }
 0x135   :  { %v466_v13 = vpop.permute.xlu1 %465  ;;  %565 = vmatprep.subr.bf16.mxu0 %v283_v12  ;;  %604 = vmatprep.subr.bf16.mxu1 %v454_v4 }
 0x136   :  { %v471_v23 = vsel %vm281_vm0, %v466_v13, %v468_v52 }
 0x138   :  { %566 = vmatpush1.bf16.msra.mxu0 %v282_v15  ;;  %605 = vmatpush1.bf16.msra.mxu1 %v453_v16  ;;  %v489_v22 = vpop.permute.xlu0 %488 }
 0x139   :  { %v310_v20 = vpop.permute.xlu1 %309  ;;  %606 = vmatprep.subr.bf16.mxu1 %v472_v19 }
 0x13a   :  { %v312_v21 = vsel %vm88_vm11, %v308_v14, %v310_v20 }
 0x13b   :  { %567 = vmatprep.subr.bf16.mxu0 %v312_v21 }
 0x13c   :  { %607 = vmatpush1.bf16.msra.mxu1 %v471_v23  ;;  %v306_v10 = vpop.permute.xlu0 %305 }
 0x13d   :  { %v491_v24 = vpop.permute.xlu1 %490  ;;  %v311_v26 = vsel %vm88_vm11, %v306_v10, %v308_v14 }
 0x13e   :  { %v493_v25 = vsel %vm88_vm11, %v489_v22, %v491_v24  ;;  %568 = vmatpush1.bf16.msra.mxu0 %v311_v26 }
 0x13f   :  { %608 = vmatprep.subr.bf16.mxu1 %v493_v25 }
 0x141   :  { %v487_v28 = vpop.permute.xlu1 %486  ;;  %584 = vmatmul.mubr.bf16.vlgmr.msra.gmra.mrb[0].mxu0 %v674_v27 }
 0x142   :  { %v492_v29 = vsel %vm88_vm11, %v487_v28, %v489_v22 }
 0x143   :  { %609 = vmatpush1.bf16.msra.mxu1 %v492_v29 }
 0x146   :  { %625 = vmatmul.mubr.bf16.vlgmr.msra.gmra.mrb[0].mxu1 %v674_v27 }
 0x14d   :  { %v539_v30 = vpop.permute.xlu0 %538 }
 0x214   :  { %v585_v31 = vpop.f32.mrb[0].mxu0 }
 0x215   :  { %v586_v32 = vadd.f32 %v585_v31, %v539_v30  ;;  %v587_v33 = vpop.f32.mrb[1].mxu0 }
 0x216   :  { %v588_v34 = vadd.f32 %v587_v33, %v539_v30  ;;  %v589_v35 = vpop.f32.mrb[2].mxu0 }
 0x217   :  { %vm633_vm14 = vcmp.ge.f32.partialorder %v586_v32, 0.0  ;;  %v635_v37 = vmul.f32 0.05, %v586_v32  ;;  %v590_v39 = vpop.f32.mrb[3].mxu0 }
 0x218   :  { %vm634_vm15 = vcmp.ge.f32.partialorder %v588_v34, 0.0  ;;  %v636_v60 = vmul.f32 0.05, %v588_v34 }
 0x219   :  { %v626_v36 = vpop.f32.mrb[0].mxu1  ;;  %v637_v43 = vsel %vm633_vm14, %v586_v32, %v635_v37 }
 0x21a   :  { %v627_v38 = vadd.f32 %v626_v36, %v539_v30  ;;  %v628_v40 = vpop.f32.mrb[1].mxu1  ;;  %v638_v46 = vsel %vm634_vm15, %v588_v34, %v636_v60 }
 0x21b   :  { %v629_v41 = vadd.f32 %v628_v40, %v539_v30  ;;  %v630_v42 = vpop.f32.mrb[2].mxu1  ;;  %v681_v48 = vpack.c.bf16 %v638_v46, %v637_v43 }
 0x21c   :  { %vm648_vm11 = vcmp.ge.f32.partialorder %v627_v38, 0.0  ;;  %v650_v44 = vmul.f32 0.05, %v627_v38  ;;  %v631_v45 = vpop.f32.mrb[3].mxu1 }
 0x21d   :  { %vm649_vm1 = vcmp.ge.f32.partialorder %v629_v41, 0.0  ;;  %v651_v47 = vmul.f32 0.05, %v629_v41  ;;  %647 = vst [vmem:[%s948_s3] sm:$0xff] %v681_v48 }
 0x21e   :  { %v652_v49 = vsel %vm648_vm11, %v627_v38, %v650_v44 }
 0x21f   :  { %v653_v50 = vsel %vm649_vm1, %v629_v41, %v651_v47 }
 0x220   :  { %v682_v51 = vpack.c.bf16 %v653_v50, %v652_v49 }
 0x222   :  { %680 = vst [vmem:[%s948_s3 + $0x8] sm:$0xff] %v682_v51 }

// kernel: rfdn_forward.32
= control target key start
LH: loop header
LB: loop body
LE: loop exit
PB: predicated region body
PF: predicated region fallthrough
CT: control target
= control target key end

     0   :  { %vm52_vm0 = vcmask 1043456   ;;  %v761_v2 = vmov 0   ;;  %vm48_vm1 = vcmask 64512   ;;  %s912_s0 = inlined_call_operand.vmem [shape: bf16[2,8,256], index: 0, kind: input, shape index: {}]   ;;  %s913_s4 = inlined_call_operand.vmem [shape: bf16[16,8], index: 4, kind: input, shape index: {}]   ;;  %s914_s1 = inlined_call_operand.vmem [shape: bf16[2,8,256], index: 1, kind: input, shape index: {}]   ;;  %s915_s2 = inlined_call_operand.vmem [shape: bf16[2,8,256], index: 2, kind: input, shape index: {}]   ;;  %s916_s5 = inlined_call_operand.vmem [shape: bf16[16,8], index: 5, kind: input, shape index: {}]   ;;  %s917_s6 = inlined_call_operand.vmem [shape: bf16[16,8], index: 6, kind: input, shape index: {}]   ;;  %s918_s7 = inlined_call_operand.vmem [shape: bf16[16,8], index: 7, kind: input, shape index: {}]   ;;  %s919_s8 = inlined_call_operand.vmem [shape: f32[16,1], index: 8, kind: input, shape index: {}]   ;;  %s920_s3 = inlined_call_operand.vmem [shape: bf16[2,8,256], index: 3, kind: input, shape index: {}]   ;;  %s921_s9 = inlined_call_operand.vmem [shape: bf16[2,16,256], index: 9, kind: output, shape index: {}]  }
   0x1   :  { %v37_v0 = vld [vmem:[%s912_s0] sm:$0xff]  ;;  %v670_v1 = vld [vmem:[%s912_s0 + $0x8] sm:$0xff]  ;;  %91 = vmatprep.mubr.bf16.mxu0 %v761_v2  ;;  %394 = vmatprep.mubr.bf16.mxu1 %v761_v2 }
   0x2   :  { %v650_v3 = vcombine.high %v37_v0, %v37_v0  ;;  %v673_v4 = vcombine.high %v670_v1, %v670_v1  ;;  %v649_v5 = vcombine.low %v37_v0, %v37_v0  ;;  %v672_v6 = vcombine.low %v670_v1, %v670_v1  ;;  %v118_v7 = vld [vmem:[%s914_s1] sm:$0xff]  ;;  %736 = vset.pattern.permute.xlu1 %v761_v2  ;;  %v676_v14 = vld [vmem:[%s914_s1 + $0x8] sm:$0xff] }
   0x3   :  { %v741_v8 = vld [vmem:[%s913_s4] sm:$0xff]   ;;  %v655_v9 = vcombine.high %v118_v7, %v118_v7  ;;  %v654_v10 = vcombine.low %v118_v7, %v118_v7  ;;  %735 = vset.pattern.permute.xlu0 %v761_v2  ;;  %v679_v15 = vcombine.high %v676_v14, %v676_v14  ;;  %v678_v16 = vcombine.low %v676_v14, %v676_v14  ;;  %v682_v19 = vld [vmem:[%s915_s2 + $0x8] sm:$0xff] }
   0x4   :  { %651 = vmatprep.subr.msk.bf16.mxu0 %vm52_vm0, %v650_v3  ;;  %674 = vmatprep.subr.msk.bf16.mxu1 %vm52_vm0, %v673_v4  ;;  %v54_v11 = vsel %vm52_vm0, %v649_v5, 0  ;;  %v357_v12 = vsel %vm52_vm0, %v672_v6, 0  ;;  %v743_v13 = vld [vmem:[%s913_s4] sm:$0xff]   ;;  %v685_v22 = vcombine.high %v682_v19, %v682_v19  ;;  %v338_v24 = vld [vmem:[%s919_s8 + $0x8] sm:$0xff]  ;;  %v684_v26 = vcombine.low %v682_v19, %v682_v19 }
   0x5   :  { %60 = vmatpush1.bf16.msra.mxu0 %v54_v11  ;;  %363 = vmatpush1.bf16.msra.mxu1 %v357_v12  ;;  %v187_v17 = vld [vmem:[%s915_s2] sm:$0xff]  ;;  %v133_v18 = vsel %vm52_vm0, %v654_v10, 0  ;;  %v437_v20 = vsel %vm52_vm0, %v678_v16, 0  ;;  %v688_v30 = vld [vmem:[%s920_s3 + $0x8] sm:$0xff] }
   0x6   :  { %656 = vmatprep.subr.msk.bf16.mxu0 %vm52_vm0, %v655_v9  ;;  %680 = vmatprep.subr.msk.bf16.mxu1 %vm52_vm0, %v679_v15  ;;  %v660_v21 = vcombine.high %v187_v17, %v187_v17  ;;  %v337_v23 = vld [vmem:[%s919_s8] sm:$0xff]  ;;  %v659_v25 = vcombine.low %v187_v17, %v187_v17  ;;  %v507_v32 = vsel %vm52_vm0, %v684_v26, 0  ;;  %v691_v34 = vcombine.high %v688_v30, %v688_v30 }
   0x7   :  { %407 = vperm.xlu1 %736, %v337_v23   ;;  %104 = vperm.xlu0 %735, %v337_v23   ;;  %v747_v27 = vld [vmem:[%s916_s5] sm:$0xff]   ;;  %v690_v36 = vcombine.low %v688_v30, %v688_v30 }
   0x8   :  { %652 = vmatmul.mubr.msk.bf16.vlgmr.msra.gmra.mrb[0].mxu0 %vm48_vm1, %v741_v8  ;;  %675 = vmatmul.mubr.msk.bf16.vlgmr.msra.gmra.mrb[0].mxu1 %vm48_vm1, %v743_v13  ;;  %v749_v28 = vld [vmem:[%s916_s5] sm:$0xff]   ;;  %v202_v31 = vsel %vm52_vm0, %v659_v25, 0 }
   0x9   :  { %139 = vmatpush1.bf16.msra.mxu0 %v133_v18  ;;  %443 = vmatpush1.bf16.msra.mxu1 %v437_v20  ;;  %v256_v29 = vld [vmem:[%s920_s3] sm:$0xff]  ;;  %v577_v40 = vsel %vm52_vm0, %v690_v36, 0 }
   0xa   :  { %170 = vmatprep.mubr.bf16.mxu0 %v761_v2  ;;  %474 = vmatprep.mubr.bf16.mxu1 %v761_v2  ;;  %v665_v33 = vcombine.high %v256_v29, %v256_v29  ;;  %v664_v35 = vcombine.low %v256_v29, %v256_v29  ;;  %v753_v37 = vld [vmem:[%s917_s6] sm:$0xff]  }
   0xb   :  { %661 = vmatprep.subr.msk.bf16.mxu0 %vm52_vm0, %v660_v21  ;;  %686 = vmatprep.subr.msk.bf16.mxu1 %vm52_vm0, %v685_v22  ;;  %v755_v38 = vld [vmem:[%s917_s6] sm:$0xff]  }
   0xc   :  { %412 = vperm.xlu1 %736, %v338_v24   ;;  %109 = vperm.xlu0 %735, %v338_v24   ;;  %v271_v39 = vsel %vm52_vm0, %v664_v35, 0  ;;  %v759_v41 = vld [vmem:[%s918_s7] sm:$0xff]  }
   0xd   :  { %v760_v42 = vld [vmem:[%s918_s7] sm:$0xff]  }
  0x14   :  { %657 = vmatmul.mubr.msk.bf16.vlgmr.msra.gmra.mrb[0].mxu0 %vm48_vm1, %v747_v27  ;;  %681 = vmatmul.mubr.msk.bf16.vlgmr.msra.gmra.mrb[0].mxu1 %vm48_vm1, %v749_v28 }
  0x15   :  { %208 = vmatpush1.bf16.msra.mxu0 %v202_v31  ;;  %513 = vmatpush1.bf16.msra.mxu1 %v507_v32 }
  0x16   :  { %239 = vmatprep.mubr.bf16.mxu0 %v761_v2  ;;  %544 = vmatprep.mubr.bf16.mxu1 %v761_v2 }
  0x17   :  { %666 = vmatprep.subr.msk.bf16.mxu0 %vm52_vm0, %v665_v33  ;;  %692 = vmatprep.subr.msk.bf16.mxu1 %vm52_vm0, %v691_v34 }
  0x20   :  { %662 = vmatmul.mubr.msk.bf16.vlgmr.msra.gmra.mrb[0].mxu0 %vm48_vm1, %v753_v37  ;;  %687 = vmatmul.mubr.msk.bf16.vlgmr.msra.gmra.mrb[0].mxu1 %vm48_vm1, %v755_v38 }
  0x21   :  { %277 = vmatpush1.bf16.msra.mxu0 %v271_v39  ;;  %583 = vmatpush1.bf16.msra.mxu1 %v577_v40 }
  0x22   :  { %308 = vmatprep.mubr.bf16.mxu0 %v761_v2  ;;  %614 = vmatprep.mubr.bf16.mxu1 %v761_v2 }
  0x2c   :  { %667 = vmatmul.mubr.msk.bf16.vlgmr.msra.gmra.mrb[0].mxu0 %vm48_vm1, %v759_v41  ;;  %693 = vmatmul.mubr.msk.bf16.vlgmr.msra.gmra.mrb[0].mxu1 %vm48_vm1, %v760_v42 }
  0x86   :  { %v408_v43 = vpop.permute.xlu1 %407  ;;  %v105_v44 = vpop.permute.xlu0 %104 }
  0x8b   :  { %v413_v45 = vpop.permute.xlu1 %412  ;;  %v110_v46 = vpop.permute.xlu0 %109 }
  0xff   :  { %v310_v47 = vpop.f32.mrb[0].mxu0  ;;  %v616_v48 = vpop.f32.mrb[0].mxu1 }
 0x100   :  { %v702_v49 = vadd.f32 %v310_v47, %v105_v44  ;;  %v706_v50 = vadd.f32 %v616_v48, %v408_v43  ;;  %v312_v51 = vpop.f32.mrb[1].mxu0  ;;  %v618_v52 = vpop.f32.mrb[1].mxu1 }
 0x101   :  { %v703_v53 = vadd.f32 %v312_v51, %v105_v44  ;;  %v707_v54 = vadd.f32 %v618_v52, %v408_v43  ;;  %v314_v55 = vpop.f32.mrb[2].mxu0  ;;  %v620_v56 = vpop.f32.mrb[2].mxu1 }
 0x102   :  { %v704_v57 = vadd.f32 %v314_v55, %v110_v46  ;;  %v708_v58 = vadd.f32 %v620_v56, %v413_v45  ;;  %v316_v59 = vpop.f32.mrb[3].mxu0  ;;  %v622_v60 = vpop.f32.mrb[3].mxu1 }
 0x103   :  { %v698_v61 = vpack.c.bf16 %v703_v53, %v702_v49  ;;  %v700_v62 = vpack.c.bf16 %v707_v54, %v706_v50  ;;  %v705_v63 = vadd.f32 %v316_v59, %v110_v46  ;;  %v709_v0 = vadd.f32 %v622_v60, %v413_v45 }
 0x105   :  { %335 = vst [vmem:[%s921_s9] sm:$0xff] %v698_v61  ;;  %696 = vst [vmem:[%s921_s9 + $0x10] sm:$0xff] %v700_v62  ;;  %v699_v1 = vpack.c.bf16 %v705_v63, %v704_v57  ;;  %v701_v2 = vpack.c.bf16 %v709_v0, %v708_v58 }
 0x107   :  { %336 = vst [vmem:[%s921_s9 + $0x8] sm:$0xff] %v699_v1  ;;  %697 = vst [vmem:[%s921_s9 + $0x18] sm:$0xff] %v701_v2 }

// kernel: reverse
= control target key start
LH: loop header
LB: loop body
LE: loop exit
PB: predicated region body
PF: predicated region fallthrough
CT: control target
= control target key end

     0   :  { %v62_v3 = vmov 0.0   ;;  %s127_s0 = inlined_call_operand.vmem [shape: f32[4,4,3,3], index: 0, kind: input, shape index: {}]   ;;  %s128_s1 = inlined_call_operand.vmem [shape: bf16[4,4,3,3], index: 1, kind: output, shape index: {}]  }
   0x1   :  { %v45_v0 = vld [vmem:[%s127_s0 + $0x20] sm:$0xf]  ;;  %v46_v1 = vld [vmem:[%s127_s0 + $0x14] sm:$0xf]  ;;  %v48_v2 = vld [vmem:[%s127_s0 + $0x8] sm:$0xf] }
   0x2   :  { %v4_v4 = vpack.c.bf16 %v62_v3, %v45_v0  ;;  %v9_v5 = vpack.c.bf16 %v62_v3, %v46_v1  ;;  %v14_v6 = vpack.c.bf16 %v62_v3, %v48_v2  ;;  %v50_v7 = vld [vmem:[%s127_s0 + $0x1c] sm:$0xf]  ;;  %v52_v8 = vld [vmem:[%s127_s0 + $0x10] sm:$0xf]  ;;  %v54_v9 = vld [vmem:[%s127_s0 + $0x4] sm:$0xf] }
   0x3   :  { %v19_v10 = vpack.c.bf16 %v62_v3, %v50_v7  ;;  %v24_v11 = vpack.c.bf16 %v62_v3, %v52_v8  ;;  %v29_v12 = vpack.c.bf16 %v62_v3, %v54_v9  ;;  %v56_v13 = vld [vmem:[%s127_s0 + $0x18] sm:$0xf]  ;;  %v58_v14 = vld [vmem:[%s127_s0 + $0xc] sm:$0xf]  ;;  %v41_v15 = vld [vmem:[%s127_s0] sm:$0xf] }
   0x4   :  { %5 = vst [vmem:[%s128_s1] sm:$0x3] %v4_v4  ;;  %47 = vst [vmem:[%s128_s1 + $0x6] sm:$0x3] %v9_v5  ;;  %v34_v16 = vpack.c.bf16 %v62_v3, %v56_v13  ;;  %v39_v17 = vpack.c.bf16 %v62_v3, %v58_v14  ;;  %v43_v18 = vpack.c.bf16 %v62_v3, %v41_v15 }
   0x5   :  { %49 = vst [vmem:[%s128_s1 + $0xc] sm:$0x3] %v14_v6  ;;  %51 = vst [vmem:[%s128_s1 + $0x2] sm:$0x3] %v19_v10 }
   0x6   :  { %53 = vst [vmem:[%s128_s1 + $0x8] sm:$0x3] %v24_v11  ;;  %55 = vst [vmem:[%s128_s1 + $0xe] sm:$0x3] %v29_v12 }
   0x7   :  { %57 = vst [vmem:[%s128_s1 + $0x4] sm:$0x3] %v34_v16  ;;  %59 = vst [vmem:[%s128_s1 + $0xa] sm:$0x3] %v39_v17 }
   0x8   :  { %60 = vst [vmem:[%s128_s1 + $0x10] sm:$0x3] %v43_v18 }

// kernel: rfdn_forward.33
= control target key start
LH: loop header
LB: loop body
LE: loop exit
PB: predicated region body
PF: predicated region fallthrough
CT: control target
= control target key end

     0   :  { %vm51_vm0 = vcmask 1041408   ;;  %v351_v1 = vmov 0   ;;  %vm47_vm1 = vcmask 31744   ;;  %s423_s0 = inlined_call_operand.vmem [shape: bf16[2,4,256], index: 0, kind: input, shape index: {}]   ;;  %s424_s1 = inlined_call_operand.vmem [shape: bf16[16,4], index: 1, kind: input, shape index: {}]   ;;  %s425_s2 = inlined_call_operand.vmem [shape: f32[16,1], index: 2, kind: input, shape index: {}]   ;;  %s426_s3 = inlined_call_operand.vmem [shape: bf16[2,16,256], index: 3, kind: input, shape index: {}]   ;;  %s427_s4 = inlined_call_operand.vmem [shape: bf16[2,16,256], index: 4, kind: output, shape index: {}]  }
   0x1   :  { %v286_v0 = vld.sshfl [vmem:[%s423_s0] sm:$0x33 pattern:$0x76325410]  ;;  %90 = vmatprep.mubr.bf16.mxu0 %v351_v1  ;;  %220 = vmatprep.mubr.bf16.mxu1 %v351_v1  ;;  %v154_v10 = vld [vmem:[%s425_s2 + $0x8] sm:$0xff]  ;;  %v300_v55 = vld [vmem:[%s426_s3 + $0x10] sm:$0xff] }
   0x2   :  { %v46_v2 = vcombine.high %v286_v0, %v286_v0  ;;  %v297_v3 = vld.sshfl [vmem:[%s423_s0 + $0x4] sm:$0x33 pattern:$0x76325410]  ;;  %v53_v4 = vsel %vm51_vm0, %v286_v0, 0  ;;  %316 = vset.pattern.permute.xlu1 %v351_v1  ;;  %315 = vset.pattern.permute.xlu0 %v351_v1  ;;  %v234_v58 = vunpack.c.l.bf16 %v300_v55  ;;  %v102_v59 = vld [vmem:[%s426_s3 + $0x8] sm:$0xff]  ;;  %v235_v63 = vunpack.c.h.bf16 %v300_v55 }
   0x3   :  { %v178_v5 = vcombine.high %v297_v3, %v297_v3  ;;  %v183_v6 = vsel %vm51_vm0, %v297_v3, 0  ;;  %v317_v7 = vld [vmem:[%s424_s1] sm:$0xff]   ;;  %v301_v61 = vld [vmem:[%s426_s3 + $0x18] sm:$0xff] }
   0x4   :  { %287 = vmatprep.subr.msk.bf16.mxu0 %vm51_vm0, %v46_v2  ;;  %v153_v8 = vld [vmem:[%s425_s2] sm:$0xff]  ;;  %v105_v2 = vunpack.c.l.bf16 %v102_v59 }
   0x5   :  { %298 = vmatprep.subr.msk.bf16.mxu1 %vm51_vm0, %v178_v5  ;;  %59 = vmatpush1.bf16.msra.mxu0 %v53_v4  ;;  %v318_v9 = vld [vmem:[%s424_s1] sm:$0xff]   ;;  %v236_v5 = vunpack.c.l.bf16 %v301_v61 }
   0x6   :  { %189 = vmatpush1.bf16.msra.mxu1 %v183_v6  ;;  %157 = vperm.xlu1 %316, %v153_v8   ;;  %v101_v53 = vld [vmem:[%s426_s3] sm:$0xff] }
   0x7   :  { %25 = vperm.xlu0 %315, %v153_v8   ;;  %v103_v57 = vunpack.c.l.bf16 %v101_v53  ;;  %v104_v60 = vunpack.c.h.bf16 %v101_v53  ;;  %v106_v8 = vunpack.c.h.bf16 %v102_v59 }
   0x8   :  { %288 = vmatmul.mubr.msk.bf16.vlgmr.msra.gmra.mrb[0].mxu0 %vm47_vm1, %v317_v7 }
   0x9   :  { %299 = vmatmul.mubr.msk.bf16.vlgmr.msra.gmra.mrb[0].mxu1 %vm47_vm1, %v318_v9 }
   0xa   :  { %162 = vperm.xlu1 %316, %v154_v10  }
   0xb   :  { %30 = vperm.xlu0 %315, %v154_v10  }
  0x85   :  { %v158_v11 = vpop.permute.xlu1 %157 }
  0x86   :  { %v26_v12 = vpop.permute.xlu0 %25 }
  0x89   :  { %v163_v13 = vpop.permute.xlu1 %162 }
  0x8a   :  { %v31_v14 = vpop.permute.xlu0 %30 }
  0xdb   :  { %v92_v15 = vpop.f32.mrb[0].mxu0 }
  0xdc   :  { %v93_v16 = vadd.f32 %v92_v15, %v26_v12  ;;  %v222_v17 = vpop.f32.mrb[0].mxu1  ;;  %v94_v18 = vpop.f32.mrb[1].mxu0 }
  0xdd   :  { %v223_v19 = vadd.f32 %v222_v17, %v158_v11  ;;  %v95_v20 = vadd.f32 %v94_v18, %v26_v12  ;;  %v224_v21 = vpop.f32.mrb[1].mxu1  ;;  %v96_v22 = vpop.f32.mrb[2].mxu0 }
  0xde   :  { %v289_v23 = vmul.f32 -1.442695, %v93_v16  ;;  %v225_v24 = vadd.f32 %v224_v21, %v158_v11  ;;  %v97_v25 = vadd.f32 %v96_v22, %v31_v14  ;;  %v226_v26 = vpop.f32.mrb[2].mxu1  ;;  %v98_v27 = vpop.f32.mrb[3].mxu0  ;;  %v237_v11 = vunpack.c.h.bf16 %v301_v61 }
  0xdf   :  { %v302_v28 = vmul.f32 -1.442695, %v223_v19  ;;  %v290_v29 = vmul.f32 -1.442695, %v95_v20  ;;  %v227_v30 = vadd.f32 %v226_v26, %v163_v13  ;;  %v99_v31 = vadd.f32 %v98_v27, %v31_v14  ;;  %v228_v32 = vpop.f32.mrb[3].mxu1 }
  0xe0   :  { %319 = vpow2.f32 %v289_v23  ;;  %v303_v33 = vmul.f32 -1.442695, %v225_v24  ;;  %v291_v34 = vmul.f32 -1.442695, %v97_v25  ;;  %v229_v35 = vadd.f32 %v228_v32, %v163_v13 }
  0xe1   :  { %321 = vpow2.f32 %v302_v28  ;;  %v304_v36 = vmul.f32 -1.442695, %v227_v30  ;;  %v292_v37 = vmul.f32 -1.442695, %v99_v31 }
  0xe2   :  { %323 = vpow2.f32 %v290_v29  ;;  %v305_v38 = vmul.f32 -1.442695, %v229_v35 }
  0xe3   :  { %325 = vpow2.f32 %v303_v33 }
  0xe4   :  { %327 = vpow2.f32 %v291_v34 }
  0xe5   :  { %329 = vpow2.f32 %v304_v36 }
  0xe6   :  { %331 = vpow2.f32 %v292_v37 }
  0xe7   :  { %333 = vpow2.f32 %v305_v38 }
  0xea   :  { %v320_v39 = vpop.eup %319 }
  0xeb   :  { %v322_v40 = vpop.eup %321  ;;  %v119_v41 = vadd.f32 1.0, %v320_v39 }
  0xec   :  { %v324_v42 = vpop.eup %323  ;;  %v250_v43 = vadd.f32 1.0, %v322_v40 }
  0xed   :  { %v326_v44 = vpop.eup %325  ;;  %335 = vrcp.f32 %v119_v41  ;;  %v120_v45 = vadd.f32 1.0, %v324_v42 }
  0xee   :  { %v328_v46 = vpop.eup %327  ;;  %337 = vrcp.f32 %v250_v43  ;;  %v251_v47 = vadd.f32 1.0, %v326_v44 }
  0xef   :  { %v330_v48 = vpop.eup %329  ;;  %339 = vrcp.f32 %v120_v45  ;;  %v121_v49 = vadd.f32 1.0, %v328_v46 }
  0xf0   :  { %v332_v50 = vpop.eup %331  ;;  %341 = vrcp.f32 %v251_v47  ;;  %v252_v51 = vadd.f32 1.0, %v330_v48 }
  0xf1   :  { %v334_v52 = vpop.eup %333  ;;  %343 = vrcp.f32 %v121_v49  ;;  %v122_v54 = vadd.f32 1.0, %v332_v50 }
  0xf2   :  { %345 = vrcp.f32 %v252_v51  ;;  %v253_v56 = vadd.f32 1.0, %v334_v52 }
  0xf3   :  { %347 = vrcp.f32 %v122_v54 }
  0xf4   :  { %349 = vrcp.f32 %v253_v56 }
  0xf7   :  { %v336_v62 = vpop.eup %335 }
  0xf8   :  { %v338_v0 = vpop.eup %337  ;;  %v131_v1 = vmul.f32 %v336_v62, %v103_v57 }
  0xf9   :  { %v340_v3 = vpop.eup %339  ;;  %v262_v4 = vmul.f32 %v338_v0, %v234_v58 }
  0xfa   :  { %v342_v6 = vpop.eup %341  ;;  %v132_v7 = vmul.f32 %v340_v3, %v104_v60 }
  0xfb   :  { %v344_v9 = vpop.eup %343  ;;  %v263_v10 = vmul.f32 %v342_v6, %v235_v63 }
  0xfc   :  { %v346_v12 = vpop.eup %345  ;;  %v310_v13 = vpack.c.bf16 %v132_v7, %v131_v1  ;;  %v133_v14 = vmul.f32 %v344_v9, %v105_v2 }
  0xfd   :  { %v348_v15 = vpop.eup %347  ;;  %v312_v16 = vpack.c.bf16 %v263_v10, %v262_v4  ;;  %v264_v17 = vmul.f32 %v346_v12, %v236_v5 }
  0xfe   :  { %v350_v18 = vpop.eup %349  ;;  %147 = vst [vmem:[%s427_s4] sm:$0xff] %v310_v13  ;;  %v134_v19 = vmul.f32 %v348_v15, %v106_v8 }
  0xff   :  { %308 = vst [vmem:[%s427_s4 + $0x10] sm:$0xff] %v312_v16  ;;  %v265_v20 = vmul.f32 %v350_v18, %v237_v11 }
 0x100   :  { %v311_v21 = vpack.c.bf16 %v134_v19, %v133_v14 }
 0x101   :  { %v313_v22 = vpack.c.bf16 %v265_v20, %v264_v17 }
 0x102   :  { %148 = vst [vmem:[%s427_s4 + $0x8] sm:$0xff] %v311_v21 }
 0x103   :  { %309 = vst [vmem:[%s427_s4 + $0x18] sm:$0xff] %v313_v22 }

// kernel: rfdn_forward.52
= control target key start
LH: loop header
LB: loop body
LE: loop exit
PB: predicated region body
PF: predicated region fallthrough
CT: control target
= control target key end

     0   :  { %v788_v1 = vmov 0   ;;  %vm54_vm0 = vcmask 130048   ;;  %s947_s0 = inlined_call_operand.vmem [shape: bf16[2,16,256], index: 0, kind: input, shape index: {}]   ;;  %s948_s4 = inlined_call_operand.vmem [shape: bf16[16,16], index: 4, kind: input, shape index: {}]   ;;  %s949_s1 = inlined_call_operand.vmem [shape: bf16[2,16,256], index: 1, kind: input, shape index: {}]   ;;  %s950_s5 = inlined_call_operand.vmem [shape: bf16[16,16], index: 5, kind: input, shape index: {}]   ;;  %s951_s2 = inlined_call_operand.vmem [shape: bf16[2,16,256], index: 2, kind: input, shape index: {}]   ;;  %s952_s6 = inlined_call_operand.vmem [shape: bf16[16,16], index: 6, kind: input, shape index: {}]   ;;  %s953_s3 = inlined_call_operand.vmem [shape: bf16[2,16,256], index: 3, kind: input, shape index: {}]   ;;  %s954_s7 = inlined_call_operand.vmem [shape: bf16[16,16], index: 7, kind: input, shape index: {}]   ;;  %s955_s8 = inlined_call_operand.vmem [shape: f32[16,1], index: 8, kind: input, shape index: {}]   ;;  %s956_s9 = inlined_call_operand.vmem [shape: bf16[2,16,256], index: 9, kind: output, shape index: {}]  }
   0x1   :  { %v756_v0 = vld [vmem:[%s947_s0 + $0x4] ss:$8 sps:$4 sm:$0xff]   ;;  %90 = vmatprep.mubr.bf16.mxu0 %v788_v1  ;;  %405 = vmatprep.mubr.bf16.mxu1 %v788_v1  ;;  %v758_v2 = vld [vmem:[%s947_s0 + $0x14] ss:$8 sps:$4 sm:$0xff]   ;;  %v760_v3 = vld [vmem:[%s947_s0] ss:$8 sps:$4 sm:$0xff]  }
   0x2   :  { %755 = vset.pattern.permute.xlu1 %v788_v1  ;;  %754 = vset.pattern.permute.xlu0 %v788_v1  ;;  %v761_v4 = vld [vmem:[%s947_s0 + $0x10] ss:$8 sps:$4 sm:$0xff]   ;;  %v762_v5 = vld [vmem:[%s948_s4] sm:$0xff]   ;;  %v769_v10 = vld [vmem:[%s949_s1 + $0x14] ss:$8 sps:$4 sm:$0xff]  }
   0x3   :  { %58 = vmatprep.subr.bf16.mxu0 %v756_v0  ;;  %373 = vmatprep.subr.bf16.mxu1 %v758_v2  ;;  %v763_v6 = vld [vmem:[%s949_s1] ss:$8 sps:$4 sm:$0xff]   ;;  %v765_v7 = vld [vmem:[%s949_s1 + $0x4] ss:$8 sps:$4 sm:$0xff]   ;;  %v767_v9 = vld [vmem:[%s949_s1 + $0x10] ss:$8 sps:$4 sm:$0xff]  }
   0x4   :  { %59 = vmatpush1.bf16.msra.mxu0 %v760_v3  ;;  %374 = vmatpush1.bf16.msra.mxu1 %v761_v4  ;;  %v766_v8 = vld [vmem:[%s948_s4] sm:$0xff]   ;;  %v777_v12 = vld [vmem:[%s951_s2 + $0x14] ss:$8 sps:$4 sm:$0xff]   ;;  %v775_v16 = vld [vmem:[%s951_s2 + $0x10] ss:$8 sps:$4 sm:$0xff]  }
   0x5   :  { %137 = vmatprep.subr.bf16.mxu0 %v765_v7  ;;  %453 = vmatprep.subr.bf16.mxu1 %v769_v10  ;;  %v773_v11 = vld [vmem:[%s951_s2 + $0x4] ss:$8 sps:$4 sm:$0xff]   ;;  %v771_v15 = vld [vmem:[%s951_s2] ss:$8 sps:$4 sm:$0xff]   ;;  %v785_v18 = vld [vmem:[%s953_s3 + $0x14] ss:$8 sps:$4 sm:$0xff]  }
   0x6   :  { %v770_v13 = vld [vmem:[%s950_s5] sm:$0xff]   ;;  %v349_v20 = vld [vmem:[%s955_s8 + $0x8] sm:$0xff]  ;;  %v783_v24 = vld [vmem:[%s953_s3 + $0x10] ss:$8 sps:$4 sm:$0xff]  }
   0x7   :  { %674 = vmatmul.mubr.msk.bf16.vlgmr.msra.gmra.mrb[0].mxu0 %vm54_vm0, %v762_v5  ;;  %694 = vmatmul.mubr.msk.bf16.vlgmr.msra.gmra.mrb[0].mxu1 %vm54_vm0, %v766_v8  ;;  %v774_v14 = vld [vmem:[%s950_s5] sm:$0xff]  }
   0x8   :  { %138 = vmatpush1.bf16.msra.mxu0 %v763_v6  ;;  %169 = vmatprep.mubr.bf16.mxu0 %v788_v1  ;;  %v781_v17 = vld [vmem:[%s953_s3 + $0x4] ss:$8 sps:$4 sm:$0xff]   ;;  %v779_v23 = vld [vmem:[%s953_s3] ss:$8 sps:$4 sm:$0xff]  }
   0x9   :  { %485 = vmatprep.mubr.bf16.mxu1 %v788_v1  ;;  %454 = vmatpush1.bf16.msra.mxu1 %v767_v9  ;;  %v348_v19 = vld [vmem:[%s955_s8] sm:$0xff] }
   0xa   :  { %206 = vmatprep.subr.bf16.mxu0 %v773_v11  ;;  %523 = vmatprep.subr.bf16.mxu1 %v777_v12  ;;  %v778_v21 = vld [vmem:[%s952_s6] sm:$0xff]  }
   0xb   :  { %418 = vperm.xlu1 %755, %v348_v19   ;;  %103 = vperm.xlu0 %754, %v348_v19   ;;  %v782_v22 = vld [vmem:[%s952_s6] sm:$0xff]  }
   0xc   :  { %v786_v25 = vld [vmem:[%s954_s7] sm:$0xff]  }
   0xd   :  { %v787_v26 = vld [vmem:[%s954_s7] sm:$0xff]  }
   0xf   :  { %423 = vperm.xlu1 %755, %v349_v20   ;;  %108 = vperm.xlu0 %754, %v349_v20  }
  0x13   :  { %678 = vmatmul.mubr.msk.bf16.vlgmr.msra.gmra.mrb[0].mxu0 %vm54_vm0, %v770_v13  ;;  %700 = vmatmul.mubr.msk.bf16.vlgmr.msra.gmra.mrb[0].mxu1 %vm54_vm0, %v774_v14 }
  0x14   :  { %207 = vmatpush1.bf16.msra.mxu0 %v771_v15  ;;  %524 = vmatpush1.bf16.msra.mxu1 %v775_v16 }
  0x15   :  { %238 = vmatprep.mubr.bf16.mxu0 %v788_v1  ;;  %555 = vmatprep.mubr.bf16.mxu1 %v788_v1 }
  0x16   :  { %275 = vmatprep.subr.bf16.mxu0 %v781_v17  ;;  %593 = vmatprep.subr.bf16.mxu1 %v785_v18 }
  0x1f   :  { %682 = vmatmul.mubr.msk.bf16.vlgmr.msra.gmra.mrb[0].mxu0 %vm54_vm0, %v778_v21  ;;  %706 = vmatmul.mubr.msk.bf16.vlgmr.msra.gmra.mrb[0].mxu1 %vm54_vm0, %v782_v22 }
  0x20   :  { %276 = vmatpush1.bf16.msra.mxu0 %v779_v23  ;;  %594 = vmatpush1.bf16.msra.mxu1 %v783_v24 }
  0x21   :  { %307 = vmatprep.mubr.bf16.mxu0 %v788_v1  ;;  %625 = vmatprep.mubr.bf16.mxu1 %v788_v1 }
  0x2b   :  { %686 = vmatmul.mubr.msk.bf16.vlgmr.msra.gmra.mrb[0].mxu0 %vm54_vm0, %v786_v25  ;;  %712 = vmatmul.mubr.msk.bf16.vlgmr.msra.gmra.mrb[0].mxu1 %vm54_vm0, %v787_v26 }
  0x8a   :  { %v419_v27 = vpop.permute.xlu1 %418  ;;  %v104_v28 = vpop.permute.xlu0 %103 }
  0x8e   :  { %v424_v41 = vpop.permute.xlu1 %423  ;;  %v109_v42 = vpop.permute.xlu0 %108 }
  0xfe   :  { %v309_v29 = vpop.f32.mrb[0].mxu0  ;;  %v627_v30 = vpop.f32.mrb[0].mxu1 }
  0xff   :  { %v721_v31 = vadd.f32 %v309_v29, %v104_v28  ;;  %v725_v32 = vadd.f32 %v627_v30, %v419_v27  ;;  %v311_v33 = vpop.f32.mrb[1].mxu0  ;;  %v629_v34 = vpop.f32.mrb[1].mxu1 }
 0x100   :  { %v722_v35 = vadd.f32 %v311_v33, %v104_v28  ;;  %v726_v36 = vadd.f32 %v629_v34, %v419_v27  ;;  %v313_v37 = vpop.f32.mrb[2].mxu0  ;;  %v631_v38 = vpop.f32.mrb[2].mxu1 }
 0x101   :  { %vm322_vm1 = vcmp.ge.f32.partialorder %v721_v31, 0.0  ;;  %v326_v39 = vmul.f32 0.05, %v721_v31  ;;  %vm640_vm2 = vcmp.ge.f32.partialorder %v725_v32, 0.0  ;;  %v644_v40 = vmul.f32 0.05, %v725_v32 }
 0x102   :  { %vm323_vm3 = vcmp.ge.f32.partialorder %v722_v35, 0.0  ;;  %v327_v43 = vmul.f32 0.05, %v722_v35  ;;  %vm641_vm4 = vcmp.ge.f32.partialorder %v726_v36, 0.0  ;;  %v645_v44 = vmul.f32 0.05, %v726_v36 }
 0x103   :  { %v330_v45 = vsel %vm322_vm1, %v721_v31, %v326_v39  ;;  %v648_v46 = vsel %vm640_vm2, %v725_v32, %v644_v40  ;;  %v723_v47 = vadd.f32 %v313_v37, %v109_v42  ;;  %v727_v48 = vadd.f32 %v631_v38, %v424_v41  ;;  %v315_v49 = vpop.f32.mrb[3].mxu0  ;;  %v633_v50 = vpop.f32.mrb[3].mxu1 }
 0x104   :  { %v331_v51 = vsel %vm323_vm3, %v722_v35, %v327_v43  ;;  %v649_v52 = vsel %vm641_vm4, %v726_v36, %v645_v44  ;;  %v724_v53 = vadd.f32 %v315_v49, %v109_v42  ;;  %v728_v54 = vadd.f32 %v633_v50, %v424_v41 }
 0x105   :  { %v717_v55 = vpack.c.bf16 %v331_v51, %v330_v45  ;;  %v719_v56 = vpack.c.bf16 %v649_v52, %v648_v46  ;;  %vm324_vm5 = vcmp.ge.f32.partialorder %v723_v47, 0.0  ;;  %v328_v57 = vmul.f32 0.05, %v723_v47 }
 0x106   :  { %vm642_vm6 = vcmp.ge.f32.partialorder %v727_v48, 0.0  ;;  %v646_v58 = vmul.f32 0.05, %v727_v48  ;;  %vm325_vm7 = vcmp.ge.f32.partialorder %v724_v53, 0.0  ;;  %v329_v59 = vmul.f32 0.05, %v724_v53 }
 0x107   :  { %346 = vst [vmem:[%s956_s9] sm:$0xff] %v717_v55  ;;  %715 = vst [vmem:[%s956_s9 + $0x10] sm:$0xff] %v719_v56  ;;  %v332_v60 = vsel %vm324_vm5, %v723_v47, %v328_v57  ;;  %vm643_vm8 = vcmp.ge.f32.partialorder %v728_v54, 0.0  ;;  %v647_v61 = vmul.f32 0.05, %v728_v54 }
 0x108   :  { %v650_v62 = vsel %vm642_vm6, %v727_v48, %v646_v58  ;;  %v333_v63 = vsel %vm325_vm7, %v724_v53, %v329_v59 }
 0x109   :  { %v718_v0 = vpack.c.bf16 %v333_v63, %v332_v60  ;;  %v651_v1 = vsel %vm643_vm8, %v728_v54, %v647_v61 }
 0x10a   :  { %v720_v2 = vpack.c.bf16 %v651_v1, %v650_v62 }
 0x10b   :  { %347 = vst [vmem:[%s956_s9 + $0x8] sm:$0xff] %v718_v0 }
 0x10c   :  { %716 = vst [vmem:[%s956_s9 + $0x18] sm:$0xff] %v720_v2 }

// kernel: rfdn_forward.53
= control target key start
LH: loop header
LB: loop body
LE: loop exit
PB: predicated region body
PF: predicated region fallthrough
CT: control target
= control target key end

     0   :  { %v20_v0 = vlaneseq  ;;  %v766_v1 = vmov 0   ;;  %s767_s19 = smov 113   ;;  %s768_s20 = smov 111   ;;  %vm54_vm6 = vcmask 138240   ;;  %vm91_vm11 = vcmask 908288   ;;  %s1014_s0 = inlined_call_operand.vmem [shape: bf16[2,16,256], index: 0, kind: input, shape index: {}]   ;;  %s1015_s1 = inlined_call_operand.vmem [shape: bf16[16,144], index: 1, kind: input, shape index: {}]   ;;  %s1016_s2 = inlined_call_operand.vmem [shape: f32[16,1], index: 2, kind: input, shape index: {}]   ;;  %s1017_s3 = inlined_call_operand.vmem [shape: bf16[2,16,256], index: 3, kind: input, shape index: {}]   ;;  %s1018_s4 = inlined_call_operand.vmem [shape: bf16[2,16,256], index: 4, kind: output, shape index: {}]  }
   0x1   :  { %756 = vset.pattern.permute.xlu1 %v766_v1  ;;  %755 = vset.pattern.permute.xlu0 %v766_v1  ;;  %v805_v4 = vld [vmem:[%s1014_s0 + $0x10] ss:$8 sps:$4 sm:$0xff]   ;;  %v810_v5 = vld [vmem:[%s1014_s0 + $0x14] ss:$8 sps:$4 sm:$0xff]   ;;  %55 = vst.msk [vmem:[#allocation2 + $0x18] sm:$0xff] %vm54_vm6, %v766_v1  ;;  %s769_s21 = smov 127  }
   0x2   :  { %v21_v2 = vand.u32 127, %v20_v0  ;;  %v80_v3 = vshrl.u32 %v20_v0, 7  ;;  %s770_s22 = smov 1   ;;  %s771_s23 = smov 15   ;;  %v830_v17 = vld [vmem:[%s1014_s0] ss:$8 sps:$4 sm:$0xff]  }
   0x3   :  { %s772_s24 = smov 17   ;;  %v836_v18 = vld [vmem:[%s1014_s0 + $0x4] ss:$8 sps:$4 sm:$0xff]   ;;  %s773_s29 = smov 16   ;;  %vm155_vm15 = vcmask 924672  }
   0x4   :  { %v22_v6 = vadd.s32 128, %v21_v2  ;;  %v27_v7 = vand.u32 15, %v21_v2  ;;  %v81_v9 = vsub.s32 0, %v80_v3  ;;  %v85_v10 = vsub.s32 4, %v80_v3  ;;  %s774_s30 = smov 112   ;;  %v539_v2 = vld [vmem:[%s1016_s2] sm:$0xff] }
   0x5   :  { %v765_v61 = vld [vmem:[%s1015_s1 + $0x4] ss:$8 sps:$4 sm:$0xff]  }
   0x6   :  { %v34_v8 = vand.u32 15, %v22_v6  ;;  %vm49_vm0 = vcmp.ne.s32.totalorder %v27_v7, 15  ;;  %vm47_vm1 = vcmp.ne.s32.totalorder %v27_v7, 0  ;;  %v540_v3 = vld [vmem:[%s1016_s2 + $0x8] sm:$0xff] }
   0x8   :  { %vm50_vm2 = vcmp.ne.s32.totalorder %v34_v8, 15  ;;  %vm48_vm3 = vcmp.ne.s32.totalorder %v34_v8, 0  ;;  %v864_v35 = vld [vmem:[#allocation2 + $0x18] sm:$0xff] }
   0x9   :  { %vm141_vm4 = vmpackc.low %vm50_vm2, %vm49_vm0  ;;  %vm186_vm2 = vcmask 1039360  }
   0xa   :  { %v142_v11 = vsel %vm141_vm4, 65537, %v766_v1  ;;  %vm77_vm5 = vmpackc.low %vm48_vm3, %vm47_vm1  ;;  %vm203_vm3 = vcmask 7168  }
   0xb   :  { %v146_v12 = vrot.slane %v142_v11, %v81_v9  ;;  %v78_v13 = vsel %vm77_vm5, 65537, %v766_v1  ;;  %v150_v15 = vrot.slane %v142_v11, %v85_v10 }
   0xc   :  { %v82_v14 = vrot.slane %v78_v13, %v81_v9  ;;  %v86_v16 = vrot.slane %v78_v13, %v85_v10 }
   0xd   :  { %151 = vrot.lane.b32.xlu1 %v146_v12, %s767_s19 }
   0xe   :  { %87 = vrot.lane.b32.xlu0 %v82_v14, %s768_s20 }
  0x11   :  { %153 = vrot.lane.b32.xlu1 %v150_v15, %s767_s19 }
  0x12   :  { %89 = vrot.lane.b32.xlu0 %v86_v16, %s768_s20 }
  0x15   :  { %184 = vrot.lane.b32.xlu1 %v86_v16, %s769_s21 }
  0x16   :  { %182 = vrot.lane.b32.xlu0 %v82_v14, %s769_s21 }
  0x19   :  { %219 = vrot.lane.b32.xlu1 %v150_v15, %s770_s22 }
  0x1a   :  { %217 = vrot.lane.b32.xlu0 %v146_v12, %s770_s22 }
  0x1d   :  { %248 = vrot.lane.b32.xlu1 %v86_v16, %s771_s23 }
  0x1e   :  { %246 = vrot.lane.b32.xlu0 %v82_v14, %s771_s23 }
  0x21   :  { %296 = vrot.lane.b32.xlu1 %v150_v15, %s772_s24 }
  0x22   :  { %294 = vrot.lane.b32.xlu0 %v146_v12, %s772_s24 }
  0x25   :  { %123 = vrot.lane.b32.xlu1 %v830_v17, %s773_s29 }
  0x26   :  { %125 = vrot.lane.b32.xlu0 %v836_v18, %s773_s29 }
  0x29   :  { %364 = vrot.lane.b32.xlu1 %v805_v4, %s773_s29 }
  0x2a   :  { %366 = vrot.lane.b32.xlu0 %v810_v5, %s773_s29 }
  0x2d   :  { %736 = vrot.lane.b32.xlu1 %v766_v1, %s773_s29 }
  0x2e   :  { %280 = vrot.lane.b32.xlu0 %v836_v18, %s774_s30 }
  0x32   :  { %741 = vrot.lane.b32.xlu0 %v766_v1, %s772_s24 }
  0x36   :  { %746 = vrot.lane.b32.xlu0 %v766_v1, %s771_s23 }
  0x7f   :  { %v152_v19 = vpop.permute.xlu1 %151 }
  0x80   :  { %v88_v20 = vpop.permute.xlu0 %87 }
  0x83   :  { %v154_v21 = vpop.permute.xlu1 %153 }
  0x84   :  { %v90_v22 = vpop.permute.xlu0 %89  ;;  %vm159_vm9 = vcmp.ne.s16.totalorder %v154_v21, 0  ;;  %v156_v40 = vsel %vm155_vm15, %v152_v19, %v154_v21 }
  0x85   :  { %vm95_vm7 = vcmp.ne.s16.totalorder %v90_v22, 0  ;;  %v162_v29 = vsel %vm159_vm9, %v836_v18, 0  ;;  %v379_v32 = vsel %vm159_vm9, %v810_v5, 0  ;;  %v92_v36 = vsel %vm91_vm11, %v88_v20, %v90_v22 }
  0x86   :  { %v98_v23 = vsel %vm95_vm7, %v836_v18, 0  ;;  %v340_v26 = vsel %vm95_vm7, %v810_v5, 0  ;;  %vm94_vm14 = vcmp.ne.s16.totalorder %v92_v36, 0  ;;  %vm158_vm0 = vcmp.ne.s16.totalorder %v156_v40, 0 }
  0x87   :  { %106 = vrot.lane.b32.xlu1 %v98_v23, %s772_s24  ;;  %v185_v24 = vpop.permute.xlu1 %184  ;;  %v97_v39 = vsel %vm94_vm14, %v830_v17, 0  ;;  %v339_v42 = vsel %vm94_vm14, %v805_v4, 0  ;;  %v161_v44 = vsel %vm158_vm0, %v830_v17, 0  ;;  %v378_v46 = vsel %vm158_vm0, %v805_v4, 0 }
  0x88   :  { %vm190_vm8 = vcmp.ne.s16.totalorder %v185_v24, 0  ;;  %v183_v25 = vpop.permute.xlu0 %182  ;;  %vm172_vm7 = vcmask 121856  }
  0x89   :  { %v193_v27 = vsel %vm190_vm8, %v836_v18, 0  ;;  %v400_v30 = vsel %vm190_vm8, %v810_v5, 0  ;;  %v187_v47 = vsel %vm186_vm2, %v183_v25, %v185_v24 }
  0x8a   :  { %201 = vrot.lane.b32.xlu0 %v193_v27, %s770_s22  ;;  %vm189_vm4 = vcmp.ne.s16.totalorder %v187_v47, 0 }
  0x8b   :  { %348 = vrot.lane.b32.xlu1 %v340_v26, %s772_s24  ;;  %v220_v34 = vpop.permute.xlu1 %219  ;;  %v192_v50 = vsel %vm189_vm4, %v830_v17, 0  ;;  %v399_v53 = vsel %vm189_vm4, %v805_v4, 0 }
  0x8c   :  { %v218_v28 = vpop.permute.xlu0 %217  ;;  %vm224_vm13 = vcmp.ne.s16.totalorder %v220_v34, 0 }
  0x8d   :  { %vm222_vm10 = vcmp.ne.s16.totalorder %v218_v28, 0  ;;  %v227_v38 = vsel %vm224_vm13, %v864_v35, 0  ;;  %v221_v48 = vsel %vm203_vm3, %v218_v28, %v220_v34 }
  0x8e   :  { %408 = vrot.lane.b32.xlu0 %v400_v30, %s770_s22  ;;  %v225_v33 = vsel %vm222_vm10, %v830_v17, 0  ;;  %v423_v43 = vsel %vm222_vm10, %v805_v4, 0  ;;  %vm223_vm5 = vcmp.ne.s16.totalorder %v221_v48, 0 }
  0x8f   :  { %170 = vrot.lane.b32.xlu1 %v162_v29, %s771_s23  ;;  %v249_v41 = vpop.permute.xlu1 %248  ;;  %v226_v51 = vsel %vm223_vm5, %v836_v18, 0  ;;  %v424_v54 = vsel %vm223_vm5, %v810_v5, 0 }
  0x90   :  { %v247_v31 = vpop.permute.xlu0 %246  ;;  %vm253_vm1 = vcmp.ne.s16.totalorder %v249_v41, 0 }
  0x91   :  { %vm251_vm12 = vcmp.ne.s16.totalorder %v247_v31, 0  ;;  %v256_v45 = vsel %vm253_vm1, %v864_v35, 0  ;;  %v250_v52 = vsel %vm172_vm7, %v247_v31, %v249_v41 }
  0x92   :  { %231 = vrot.lane.b32.xlu0 %v225_v33, %s769_s21  ;;  %v254_v37 = vsel %vm251_vm12, %v830_v17, 0  ;;  %v444_v49 = vsel %vm251_vm12, %v805_v4, 0  ;;  %vm252_vm8 = vcmp.ne.s16.totalorder %v250_v52, 0  ;;  %vm127_vm12 = vcmask 130048  }
  0x93   :  { %387 = vrot.lane.b32.xlu1 %v379_v32, %s771_s23  ;;  %v297_v55 = vpop.permute.xlu1 %296  ;;  %v255_v57 = vsel %vm252_vm8, %v836_v18, 0  ;;  %v445_v59 = vsel %vm252_vm8, %v810_v5, 0  ;;  %712 = vmatprep.mubr.msk.bf16.mxu0 %vm127_vm12, %v765_v61 }
  0x94   :  { %v295_v56 = vpop.permute.xlu0 %294  ;;  %vm301_vm10 = vcmp.ne.s16.totalorder %v297_v55, 0  ;;  %713 = vmatprep.mubr.msk.bf16.mxu1 %vm127_vm12, %v765_v61 }
  0x95   :  { %v298_v58 = vsel %vm54_vm6, %v295_v56, %v297_v55  ;;  %v304_v62 = vsel %vm301_vm10, %v864_v35, 0  ;;  %vm299_vm13 = vcmp.ne.s16.totalorder %v295_v56, 0 }
  0x96   :  { %260 = vrot.lane.b32.xlu0 %v254_v37, %s767_s19  ;;  %vm300_vm9 = vcmp.ne.s16.totalorder %v298_v58, 0  ;;  %v302_v0 = vsel %vm299_vm13, %v830_v17, 0 }
  0x97   :  { %751 = vrot.lane.b32.xlu1 %v766_v1, %s770_s22  ;;  %v303_v60 = vsel %vm300_vm9, %v836_v18, 0  ;;  %v484_v63 = vsel %vm300_vm9, %v810_v5, 0  ;;  %v483_v1 = vsel %vm299_vm13, %v805_v4, 0  ;;  %v124_v7 = vpop.permute.xlu1 %123 }
  0x98   :  { %v126_v6 = vpop.permute.xlu0 %125 }
  0x99   :  { %v129_v33 = vsel %vm127_vm12, %v124_v7, %v126_v6 }
  0x9a   :  { %104 = vrot.lane.b32.xlu0 %v97_v39, %s772_s24 }
  0x9b   :  { %235 = vrot.lane.b32.xlu1 %v227_v38, %s769_s21  ;;  %v365_v9 = vpop.permute.xlu1 %364 }
  0x9c   :  { %v367_v8 = vpop.permute.xlu0 %366 }
  0x9d   :  { %v369_v41 = vsel %vm127_vm12, %v365_v9, %v367_v8 }
  0x9e   :  { %346 = vrot.lane.b32.xlu0 %v339_v42, %s772_s24 }
  0x9f   :  { %433 = vrot.lane.b32.xlu1 %v227_v38, %s769_s21  ;;  %v737_v11 = vpop.permute.xlu1 %736 }
  0xa0   :  { %v941_v10 = vpop.permute.xlu0 %280  ;;  %v738_v30 = vunpack.i.l.bf16 %v737_v11  ;;  %v739_v37 = vunpack.i.h.bf16 %v737_v11 }
  0xa2   :  { %168 = vrot.lane.b32.xlu0 %v161_v44, %s771_s23  ;;  %v128_v39 = vsel %vm127_vm12, %v738_v30, %v124_v7  ;;  %v651_v30 = vld [vmem:[%s1017_s3 + $0x8] sm:$0xff] }
  0xa3   :  { %429 = vrot.lane.b32.xlu1 %v423_v43, %s769_s21 }
  0xa4   :  { %v742_v12 = vpop.permute.xlu0 %741 }
  0xa5   :  { %v743_v26 = vunpack.i.l.bf16 %v742_v12  ;;  %v744_v32 = vunpack.i.h.bf16 %v742_v12 }
  0xa6   :  { %385 = vrot.lane.b32.xlu0 %v378_v46, %s771_s23  ;;  %v368_v46 = vsel %vm127_vm12, %v739_v37, %v365_v9  ;;  %v717_v37 = vld [vmem:[%s1017_s3 + $0x18] sm:$0xff] }
  0xa7   :  { %264 = vrot.lane.b32.xlu1 %v256_v45, %s767_s19 }
  0xa8   :  { %v747_v14 = vpop.permute.xlu0 %746 }
  0xa9   :  { %v748_v40 = vunpack.i.l.bf16 %v747_v14  ;;  %v749_v47 = vunpack.i.h.bf16 %v747_v14 }
  0xaa   :  { %470 = vrot.lane.b32.xlu0 %v810_v5, %s774_s30 }
  0xab   :  { %454 = vrot.lane.b32.xlu1 %v256_v45, %s767_s19 }
  0xae   :  { %278 = vrot.lane.b32.xlu0 %v830_v17, %s774_s30 }
  0xaf   :  { %450 = vrot.lane.b32.xlu1 %v444_v49, %s767_s19 }
  0xb2   :  { %233 = vrot.lane.b32.xlu0 %v226_v51, %s769_s21 }
  0xb3   :  { %199 = vrot.lane.b32.xlu1 %v192_v50, %s770_s22 }
  0xb6   :  { %431 = vrot.lane.b32.xlu0 %v424_v54, %s769_s21 }
  0xb7   :  { %406 = vrot.lane.b32.xlu1 %v399_v53, %s770_s22 }
  0xba   :  { %262 = vrot.lane.b32.xlu0 %v255_v57, %s767_s19 }
  0xbb   :  { %282 = vrot.lane.b32.xlu1 %v864_v35, %s774_s30 }
  0xbe   :  { %452 = vrot.lane.b32.xlu0 %v445_v59, %s767_s19 }
  0xbf   :  { %472 = vrot.lane.b32.xlu1 %v864_v35, %s774_s30 }
  0xc2   :  { %310 = vrot.lane.b32.xlu0 %v303_v60, %s768_s20 }
  0xc3   :  { %468 = vrot.lane.b32.xlu1 %v805_v4, %s774_s30 }
  0xc6   :  { %491 = vrot.lane.b32.xlu0 %v484_v63, %s768_s20 }
  0xc7   :  { %312 = vrot.lane.b32.xlu1 %v304_v62, %s768_s20 }
  0xca   :  { %308 = vrot.lane.b32.xlu0 %v302_v0, %s768_s20 }
  0xcb   :  { %493 = vrot.lane.b32.xlu1 %v304_v62, %s768_s20 }
  0xce   :  { %543 = vperm.xlu0 %755, %v539_v2  }
  0xcf   :  { %489 = vrot.lane.b32.xlu1 %v483_v1, %s768_s20 }
  0xd3   :  { %548 = vperm.xlu1 %756, %v540_v3  }
  0xf9   :  { %v107_v13 = vpop.permute.xlu1 %106 }
  0xfc   :  { %v202_v16 = vpop.permute.xlu0 %201 }
  0xfd   :  { %v349_v15 = vpop.permute.xlu1 %348 }
 0x100   :  { %v409_v20 = vpop.permute.xlu0 %408 }
 0x101   :  { %v171_v19 = vpop.permute.xlu1 %170 }
 0x104   :  { %v943_v22 = vpop.permute.xlu0 %231 }
 0x105   :  { %v388_v21 = vpop.permute.xlu1 %387 }
 0x108   :  { %v945_v24 = vpop.permute.xlu0 %260 }
 0x109   :  { %v752_v23 = vpop.permute.xlu1 %751 }
 0x10a   :  { %v753_v55 = vunpack.i.l.bf16 %v752_v23  ;;  %v754_v60 = vunpack.i.h.bf16 %v752_v23 }
 0x10c   :  { %v105_v27 = vpop.permute.xlu0 %104 }
 0x10d   :  { %v236_v25 = vpop.permute.xlu1 %235  ;;  %v110_v28 = vsel %vm54_vm6, %v105_v27, %v107_v13  ;;  %v109_v29 = vsel %vm54_vm6, %v743_v26, %v105_v27  ;;  %v763_v26 = vld [vmem:[%s1015_s1] ss:$8 sps:$4 sm:$0xff]  }
 0x10e   :  { %564 = vmatprep.subr.bf16.mxu0 %v110_v28 }
 0x10f   :  { %565 = vmatpush1.bf16.msra.mxu0 %v109_v29  ;;  %v650_v29 = vld [vmem:[%s1017_s3] sm:$0xff] }
 0x110   :  { %566 = vmatprep.subr.bf16.mxu0 %v129_v33  ;;  %v347_v34 = vpop.permute.xlu0 %346  ;;  %v652_v33 = vunpack.c.l.bf16 %v650_v29 }
 0x111   :  { %v434_v31 = vpop.permute.xlu1 %433  ;;  %v351_v35 = vsel %vm54_vm6, %v347_v34, %v349_v15  ;;  %v350_v36 = vsel %vm54_vm6, %v744_v32, %v347_v34  ;;  %vm284_vm6 = vcmask 916480  }
 0x112   :  { %607 = vmatprep.subr.bf16.mxu1 %v351_v35 }
 0x113   :  { %567 = vmatpush1.bf16.msra.mxu0 %v128_v39  ;;  %608 = vmatpush1.bf16.msra.mxu1 %v350_v36  ;;  %v653_v36 = vunpack.c.h.bf16 %v650_v29  ;;  %v654_v39 = vunpack.c.l.bf16 %v651_v30 }
 0x114   :  { %609 = vmatprep.subr.bf16.mxu1 %v369_v41  ;;  %v169_v42 = vpop.permute.xlu0 %168 }
 0x115   :  { %v430_v38 = vpop.permute.xlu1 %429  ;;  %v174_v43 = vsel %vm172_vm7, %v169_v42, %v171_v19  ;;  %v173_v44 = vsel %vm172_vm7, %v748_v40, %v169_v42 }
 0x116   :  { %568 = vmatprep.subr.bf16.mxu0 %v174_v43 }
 0x117   :  { %569 = vmatpush1.bf16.msra.mxu0 %v173_v44  ;;  %610 = vmatpush1.bf16.msra.mxu1 %v368_v46 }
 0x118   :  { %v386_v48 = vpop.permute.xlu0 %385 }
 0x119   :  { %v265_v45 = vpop.permute.xlu1 %264  ;;  %v390_v49 = vsel %vm172_vm7, %v386_v48, %v388_v21  ;;  %v389_v50 = vsel %vm172_vm7, %v749_v47, %v386_v48 }
 0x11a   :  { %611 = vmatprep.subr.bf16.mxu1 %v390_v49 }
 0x11b   :  { %612 = vmatpush1.bf16.msra.mxu1 %v389_v50 }
 0x11c   :  { %v471_v52 = vpop.permute.xlu0 %470 }
 0x11d   :  { %v455_v51 = vpop.permute.xlu1 %454 }
 0x120   :  { %v279_v54 = vpop.permute.xlu0 %278 }
 0x121   :  { %v451_v53 = vpop.permute.xlu1 %450  ;;  %v285_v14 = vsel %vm284_vm6, %v279_v54, %v941_v10 }
 0x124   :  { %v234_v59 = vpop.permute.xlu0 %233 }
 0x125   :  { %v200_v56 = vpop.permute.xlu1 %199  ;;  %v238_v1 = vsel %vm186_vm2, %v234_v59, %v236_v25  ;;  %v237_v6 = vsel %vm186_vm2, %v943_v22, %v234_v59 }
 0x126   :  { %v205_v57 = vsel %vm203_vm3, %v200_v56, %v202_v16  ;;  %v204_v58 = vsel %vm203_vm3, %v753_v55, %v200_v56 }
 0x127   :  { %570 = vmatprep.subr.bf16.mxu0 %v205_v57  ;;  %v680_v57 = vunpack.c.h.bf16 %v717_v37 }
 0x128   :  { %571 = vmatpush1.bf16.msra.mxu0 %v204_v58  ;;  %v432_v0 = vpop.permute.xlu0 %431 }
 0x129   :  { %v407_v61 = vpop.permute.xlu1 %406  ;;  %572 = vmatprep.subr.bf16.mxu0 %v836_v18  ;;  %v436_v7 = vsel %vm186_vm2, %v432_v0, %v434_v31  ;;  %v716_v31 = vld [vmem:[%s1017_s3 + $0x10] sm:$0xff] }
 0x12a   :  { %v411_v62 = vsel %vm203_vm3, %v407_v61, %v409_v20  ;;  %v410_v63 = vsel %vm203_vm3, %v754_v60, %v407_v61  ;;  %v677_v40 = vunpack.c.l.bf16 %v716_v31  ;;  %v678_v46 = vunpack.c.h.bf16 %v716_v31 }
 0x12b   :  { %613 = vmatprep.subr.bf16.mxu1 %v411_v62 }
 0x12c   :  { %573 = vmatpush1.bf16.msra.mxu0 %v830_v17  ;;  %614 = vmatpush1.bf16.msra.mxu1 %v410_v63  ;;  %v263_v3 = vpop.permute.xlu0 %262 }
 0x12d   :  { %v283_v2 = vpop.permute.xlu1 %282  ;;  %574 = vmatprep.subr.bf16.mxu0 %v238_v1  ;;  %615 = vmatprep.subr.bf16.mxu1 %v810_v5  ;;  %v267_v18 = vsel %vm155_vm15, %v263_v3, %v265_v45  ;;  %v266_v9 = vsel %vm155_vm15, %v945_v24, %v263_v3  ;;  %v435_v5 = vsel %vm186_vm2, %v430_v38, %v432_v0  ;;  %v655_v45 = vunpack.c.h.bf16 %v651_v30 }
 0x12e   :  { %v286_v11 = vsel %vm284_vm6, %v941_v10, %v283_v2 }
 0x130   :  { %575 = vmatpush1.bf16.msra.mxu0 %v237_v6  ;;  %616 = vmatpush1.bf16.msra.mxu1 %v805_v4  ;;  %v453_v17 = vpop.permute.xlu0 %452 }
 0x131   :  { %v473_v8 = vpop.permute.xlu1 %472  ;;  %576 = vmatprep.subr.bf16.mxu0 %v267_v18  ;;  %617 = vmatprep.subr.bf16.mxu1 %v436_v7  ;;  %v457_v4 = vsel %vm155_vm15, %v453_v17, %v455_v51  ;;  %v456_v15 = vsel %vm155_vm15, %v451_v53, %v453_v17 }
 0x132   :  { %v475_v16 = vsel %vm284_vm6, %v471_v52, %v473_v8 }
 0x134   :  { %577 = vmatpush1.bf16.msra.mxu0 %v266_v9  ;;  %618 = vmatpush1.bf16.msra.mxu1 %v435_v5  ;;  %v311_v13 = vpop.permute.xlu0 %310 }
 0x135   :  { %v469_v12 = vpop.permute.xlu1 %468  ;;  %578 = vmatprep.subr.bf16.mxu0 %v286_v11  ;;  %619 = vmatprep.subr.bf16.mxu1 %v457_v4 }
 0x136   :  { %v474_v22 = vsel %vm284_vm6, %v469_v12, %v471_v52  ;;  %v679_v52 = vunpack.c.l.bf16 %v717_v37 }
 0x138   :  { %579 = vmatpush1.bf16.msra.mxu0 %v285_v14  ;;  %620 = vmatpush1.bf16.msra.mxu1 %v456_v15  ;;  %v492_v21 = vpop.permute.xlu0 %491 }
 0x139   :  { %v313_v19 = vpop.permute.xlu1 %312  ;;  %621 = vmatprep.subr.bf16.mxu1 %v475_v16 }
 0x13a   :  { %v315_v20 = vsel %vm91_vm11, %v311_v13, %v313_v19 }
 0x13b   :  { %580 = vmatprep.subr.bf16.mxu0 %v315_v20 }
 0x13c   :  { %622 = vmatpush1.bf16.msra.mxu1 %v474_v22  ;;  %v309_v10 = vpop.permute.xlu0 %308 }
 0x13d   :  { %v494_v23 = vpop.permute.xlu1 %493  ;;  %v314_v25 = vsel %vm91_vm11, %v309_v10, %v311_v13 }
 0x13e   :  { %v496_v24 = vsel %vm91_vm11, %v492_v21, %v494_v23  ;;  %581 = vmatpush1.bf16.msra.mxu0 %v314_v25 }
 0x13f   :  { %623 = vmatprep.subr.bf16.mxu1 %v496_v24 }
 0x141   :  { %v490_v27 = vpop.permute.xlu1 %489  ;;  %597 = vmatmul.mubr.bf16.vlgmr.msra.gmra.mrb[0].mxu0 %v763_v26 }
 0x142   :  { %v495_v28 = vsel %vm91_vm11, %v490_v27, %v492_v21 }
 0x143   :  { %624 = vmatpush1.bf16.msra.mxu1 %v495_v28 }
 0x146   :  { %640 = vmatmul.mubr.bf16.vlgmr.msra.gmra.mrb[0].mxu1 %v763_v26 }
 0x14d   :  { %v544_v32 = vpop.permute.xlu0 %543 }
 0x152   :  { %v549_v35 = vpop.permute.xlu1 %548 }
 0x214   :  { %v598_v34 = vpop.f32.mrb[0].mxu0 }
 0x215   :  { %v600_v38 = vpop.f32.mrb[1].mxu0  ;;  %v599_v41 = vadd.f32 %v598_v34, %v544_v32 }
 0x216   :  { %v602_v42 = vpop.f32.mrb[2].mxu0  ;;  %v601_v44 = vadd.f32 %v600_v38, %v544_v32 }
 0x217   :  { %v603_v47 = vadd.f32 %v602_v42, %v549_v35  ;;  %v656_v49 = vadd.f32 %v652_v33, %v599_v41  ;;  %v604_v50 = vpop.f32.mrb[3].mxu0 }
 0x218   :  { %v657_v53 = vadd.f32 %v653_v36, %v601_v44  ;;  %v605_v54 = vadd.f32 %v604_v50, %v549_v35 }
 0x219   :  { %v641_v43 = vpop.f32.mrb[0].mxu1  ;;  %v658_v58 = vadd.f32 %v654_v39, %v603_v47 }
 0x21a   :  { %v642_v48 = vadd.f32 %v641_v43, %v544_v32  ;;  %v643_v51 = vpop.f32.mrb[1].mxu1  ;;  %v722_v62 = vpack.c.bf16 %v657_v53, %v656_v49  ;;  %v659_v63 = vadd.f32 %v655_v45, %v605_v54 }
 0x21b   :  { %v644_v55 = vadd.f32 %v643_v51, %v544_v32  ;;  %v645_v56 = vpop.f32.mrb[2].mxu1 }
 0x21c   :  { %v681_v59 = vadd.f32 %v677_v40, %v642_v48  ;;  %v646_v60 = vadd.f32 %v645_v56, %v549_v35  ;;  %v647_v61 = vpop.f32.mrb[3].mxu1  ;;  %672 = vst [vmem:[%s1018_s4] sm:$0xff] %v722_v62  ;;  %v723_v3 = vpack.c.bf16 %v659_v63, %v658_v58 }
 0x21d   :  { %v682_v0 = vadd.f32 %v678_v46, %v644_v55  ;;  %v648_v1 = vadd.f32 %v647_v61, %v549_v35 }
 0x21e   :  { %v683_v2 = vadd.f32 %v679_v52, %v646_v60  ;;  %673 = vst [vmem:[%s1018_s4 + $0x8] sm:$0xff] %v723_v3 }
 0x21f   :  { %v724_v6 = vpack.c.bf16 %v682_v0, %v681_v59  ;;  %v684_v18 = vadd.f32 %v680_v57, %v648_v1 }
 0x221   :  { %720 = vst [vmem:[%s1018_s4 + $0x10] sm:$0xff] %v724_v6  ;;  %v725_v7 = vpack.c.bf16 %v684_v18, %v683_v2 }
 0x223   :  { %721 = vst [vmem:[%s1018_s4 + $0x18] sm:$0xff] %v725_v7 }

</bundles_post_ra>
